<compile_context>
chip_gen: v7x
topology: tpu7x:2x2x1
jax: 0.10.0
libtpu: 0.0.40
codegen_flags: <defaults>
</compile_context>

<pallas_src>
import functools

import jax
import jax.numpy as jnp
from jax.experimental import pallas as pl
from jax.experimental.pallas import tpu as pltpu

LANE = 128


def _round_up(x, m):
    return (x + m - 1) // m * m


@functools.lru_cache(maxsize=1)
def _vmem_limit_bytes():
    """~80% of physical VMEM (headroom for compiler scratch), safe fallback."""
    try:
        cap = int(pltpu.get_tpu_info().vmem_capacity_bytes)
        return min(int(cap * 0.8), 100 * 1024 * 1024)
    except Exception:
        return 48 * 1024 * 1024  # safe on v5e / v6e / v7x


def _cparams(n_axes):
    return pltpu.CompilerParams(
        dimension_semantics=("parallel",) * n_axes,
        vmem_limit_bytes=_vmem_limit_bytes(),
    )


def _row_tile(H, W, cmax, budget_bytes=4 * 1024 * 1024):
    """Largest divisor of H such that one (TH, W, cmax) bf16 tile is <= budget."""
    for th in range(H, 0, -1):
        if H % th == 0 and th * W * cmax * 2 <= budget_bytes:
            return th
    return 1


# ---------------------------------------------------------------------------
# In-kernel helpers
# ---------------------------------------------------------------------------
def _partial_stats(y):
    """(8, C) partial sum / sum-of-squares of a (R, C) f32 tile.

    When R % 8 == 0 this is a pure elementwise (VALU) reduction over vreg rows;
    the final 8-row fold happens in JAX glue.
    """
    R, C = y.shape
    if R % 8 == 0:
        yr = y.reshape(R // 8, 8, C)
        return jnp.sum(yr, axis=0), jnp.sum(yr * yr, axis=0)
    s = jnp.sum(y, axis=0, keepdims=True) * 0.125
    ss = jnp.sum(y * y, axis=0, keepdims=True) * 0.125
    return jnp.broadcast_to(s, (8, C)), jnp.broadcast_to(ss, (8, C))


# ---------------------------------------------------------------------------
# Pallas kernels
# ---------------------------------------------------------------------------
def _conv1x1_stats_kernel(x_ref, w_ref, y_ref, sum_ref, ssum_ref):
    """y = x @ w (bf16 MXU, f32 accumulate) + per-tile channel sum / ssum of y."""
    _, TH, W, Cin = x_ref.shape
    Cout = w_ref.shape[1]
    x = x_ref[0].reshape(TH * W, Cin).astype(jnp.bfloat16)
    y = jnp.dot(x, w_ref[...], preferred_element_type=jnp.float32)
    s, ss = _partial_stats(y)
    sum_ref[...] = s.reshape(1, 1, 8, Cout)
    ssum_ref[...] = ss.reshape(1, 1, 8, Cout)
    y_ref[...] = y.reshape(1, TH, W, Cout).astype(y_ref.dtype)


def _conv1x1_bnrelu_stats_kernel(a_ref, scale_ref, bias_ref, w_ref,
                                 y_ref, sum_ref, ssum_ref):
    """y = relu(a*scale + bias) @ w — previous BN+ReLU fused into the LHS load."""
    _, TH, W, Cin = a_ref.shape
    Cout = w_ref.shape[1]
    a = a_ref[0].reshape(TH * W, Cin).astype(jnp.float32)
    z = jnp.maximum(a * scale_ref[...] + bias_ref[...], 0.0).astype(jnp.bfloat16)
    y = jnp.dot(z, w_ref[...], preferred_element_type=jnp.float32)
    s, ss = _partial_stats(y)
    sum_ref[...] = s.reshape(1, 1, 8, Cout)
    ssum_ref[...] = ss.reshape(1, 1, 8, Cout)
    y_ref[...] = y.reshape(1, TH, W, Cout).astype(y_ref.dtype)


def _conv3x3_bnrelu_stats_kernel(a_ref, scale_ref, bias_ref, w_ref,
                                 y_ref, sum_ref, ssum_ref, zcat_ref, *, dilation):
    """3x3 dilated conv (stride 1, padding=dilation) of relu(a*scale + bias).

    The kw taps of the zero-padded post-activation are concatenated along
    channels in a bf16 VMEM staging buffer zcat of shape (H+2d, W, 3*Cin):
        zcat[r, w, kw*Cin + c] = zpad[r, w + kw*d, c]
    so each kh tap-group is a contiguous outer-dim slice and the whole conv is
    3 MXU matmuls with K = 3*Cin, accumulated in f32.  Only the constant-zero
    halo strips are written besides the data region (no full scratch re-zero;
    strips are rewritten every step so the kernel is megacore-safe).
    """
    _, H, W, Cin = a_ref.shape
    Cout = w_ref.shape[2]
    d = dilation
    scale = scale_ref[...].reshape(1, 1, Cin)
    bias = bias_ref[...].reshape(1, 1, Cin)
    z = jnp.maximum(a_ref[0].astype(jnp.float32) * scale + bias,
                    0.0).astype(jnp.bfloat16)

    # Constant-zero halo strips (thin: O(d) rows / cols).
    zcat_ref[0:d, :, :] = jnp.zeros((d, W, 3 * Cin), jnp.bfloat16)
    zcat_ref[d + H:H + 2 * d, :, :] = jnp.zeros((d, W, 3 * Cin), jnp.bfloat16)
    zcat_ref[d:d + H, 0:d, 0:Cin] = jnp.zeros((H, d, Cin), jnp.bfloat16)
    zcat_ref[d:d + H, W - d:W, 2 * Cin:3 * Cin] = jnp.zeros((H, d, Cin),
                                                            jnp.bfloat16)

    # kw-shifted copies of the activation, concatenated along channels.
    zcat_ref[d:d + H, d:W, 0:Cin] = z[:, 0:W - d, :]          # kw = 0
    zcat_ref[d:d + H, :, Cin:2 * Cin] = z                     # kw = 1
    zcat_ref[d:d + H, 0:W - d, 2 * Cin:3 * Cin] = z[:, d:W, :]  # kw = 2

    # Three K=3*Cin matmuls (one per kh); accumulator seeded by the first dot.
    acc = None
    for kh in range(3):
        lhs = zcat_ref[kh * d:kh * d + H, :, :].reshape(H * W, 3 * Cin)
        part = jnp.dot(lhs, w_ref[kh], preferred_element_type=jnp.float32)
        acc = part if acc is None else acc + part

    s, ss = _partial_stats(acc)
    sum_ref[...] = s.reshape(1, 8, Cout)
    ssum_ref[...] = ss.reshape(1, 8, Cout)
    y_ref[...] = acc.reshape(1, H, W, Cout).astype(y_ref.dtype)


def _bn_add_relu_kernel(y_ref, scale_ref, bias_ref, res_ref, o_ref):
    """out = relu(y*scale + bias + residual)  (bn3 + skip connection + ReLU)."""
    C = y_ref.shape[-1]
    scale = scale_ref[...].reshape(1, 1, 1, C)
    bias = bias_ref[...].reshape(1, 1, 1, C)
    o_ref[...] = jnp.maximum(
        y_ref[...].astype(jnp.float32) * scale + bias
        + res_ref[...].astype(jnp.float32),
        0.0,
    ).astype(o_ref.dtype)


# ---------------------------------------------------------------------------
# Pallas wrappers
# ---------------------------------------------------------------------------
def conv1x1_stats(x, w):
    N, H, W, Cin = x.shape
    Cout = w.shape[1]
    th = _row_tile(H, W, max(Cin, Cout))
    T = H // th
    return pl.pallas_call(
        _conv1x1_stats_kernel,
        out_shape=(jax.ShapeDtypeStruct((N, H, W, Cout), jnp.bfloat16),
                   jax.ShapeDtypeStruct((N, T, 8, Cout), jnp.float32),
                   jax.ShapeDtypeStruct((N, T, 8, Cout), jnp.float32)),
        grid_spec=pltpu.PrefetchScalarGridSpec(
            num_scalar_prefetch=0, grid=(N, T),
            in_specs=[pl.BlockSpec((1, th, W, Cin), lambda n, t: (n, t, 0, 0)),
                      pl.BlockSpec((Cin, Cout), lambda n, t: (0, 0))],
            out_specs=(pl.BlockSpec((1, th, W, Cout), lambda n, t: (n, t, 0, 0)),
                       pl.BlockSpec((1, 1, 8, Cout), lambda n, t: (n, t, 0, 0)),
                       pl.BlockSpec((1, 1, 8, Cout), lambda n, t: (n, t, 0, 0)))),
        compiler_params=_cparams(2),
    )(x, w)


def conv1x1_bnrelu_stats(a, scale, bias, w):
    N, H, W, Cin = a.shape
    Cout = w.shape[1]
    th = _row_tile(H, W, max(Cin, Cout))
    T = H // th
    return pl.pallas_call(
        _conv1x1_bnrelu_stats_kernel,
        out_shape=(jax.ShapeDtypeStruct((N, H, W, Cout), jnp.bfloat16),
                   jax.ShapeDtypeStruct((N, T, 8, Cout), jnp.float32),
                   jax.ShapeDtypeStruct((N, T, 8, Cout), jnp.float32)),
        grid_spec=pltpu.PrefetchScalarGridSpec(
            num_scalar_prefetch=0, grid=(N, T),
            in_specs=[pl.BlockSpec((1, th, W, Cin), lambda n, t: (n, t, 0, 0)),
                      pl.BlockSpec((1, Cin), lambda n, t: (0, 0)),
                      pl.BlockSpec((1, Cin), lambda n, t: (0, 0)),
                      pl.BlockSpec((Cin, Cout), lambda n, t: (0, 0))],
            out_specs=(pl.BlockSpec((1, th, W, Cout), lambda n, t: (n, t, 0, 0)),
                       pl.BlockSpec((1, 1, 8, Cout), lambda n, t: (n, t, 0, 0)),
                       pl.BlockSpec((1, 1, 8, Cout), lambda n, t: (n, t, 0, 0)))),
        compiler_params=_cparams(2),
    )(a, scale, bias, w)


def conv3x3_bnrelu_stats(a, scale, bias, w3k, dilation):
    N, H, W, Cin = a.shape
    Cout = w3k.shape[2]
    d = dilation
    assert 0 < d < W
    kernel = functools.partial(_conv3x3_bnrelu_stats_kernel, dilation=d)
    return pl.pallas_call(
        kernel,
        out_shape=(jax.ShapeDtypeStruct((N, H, W, Cout), jnp.bfloat16),
                   jax.ShapeDtypeStruct((N, 8, Cout), jnp.float32),
                   jax.ShapeDtypeStruct((N, 8, Cout), jnp.float32)),
        grid_spec=pltpu.PrefetchScalarGridSpec(
            num_scalar_prefetch=0, grid=(N,),
            in_specs=[pl.BlockSpec((1, H, W, Cin), lambda n: (n, 0, 0, 0)),
                      pl.BlockSpec((1, Cin), lambda n: (0, 0)),
                      pl.BlockSpec((1, Cin), lambda n: (0, 0)),
                      pl.BlockSpec((3, 3 * Cin, Cout), lambda n: (0, 0, 0))],
            out_specs=(pl.BlockSpec((1, H, W, Cout), lambda n: (n, 0, 0, 0)),
                       pl.BlockSpec((1, 8, Cout), lambda n: (n, 0, 0)),
                       pl.BlockSpec((1, 8, Cout), lambda n: (n, 0, 0))),
            scratch_shapes=[pltpu.VMEM((H + 2 * d, W, 3 * Cin), jnp.bfloat16)]),
        compiler_params=_cparams(1),
    )(a, scale, bias, w3k)


def bn_add_relu(y, scale, bias, res):
    N, H, W, C = y.shape
    th = _row_tile(H, W, C)
    T = H // th
    return pl.pallas_call(
        _bn_add_relu_kernel,
        out_shape=jax.ShapeDtypeStruct((N, H, W, C), jnp.bfloat16),
        grid_spec=pltpu.PrefetchScalarGridSpec(
            num_scalar_prefetch=0, grid=(N, T),
            in_specs=[pl.BlockSpec((1, th, W, C), lambda n, t: (n, t, 0, 0)),
                      pl.BlockSpec((1, C), lambda n, t: (0, 0)),
                      pl.BlockSpec((1, C), lambda n, t: (0, 0)),
                      pl.BlockSpec((1, th, W, C), lambda n, t: (n, t, 0, 0))],
            out_specs=pl.BlockSpec((1, th, W, C), lambda n, t: (n, t, 0, 0))),
        compiler_params=_cparams(2),
    )(y, scale, bias, res)


# ---------------------------------------------------------------------------
# JAX glue
# ---------------------------------------------------------------------------
def bn_fold(sum_p, ssum_p, count, gamma, beta, eps):
    """F.batch_norm (training, biased variance) folded to per-channel scale/bias.

    NOTE: variance is E[x^2] - mean^2 in f32 with a >=0 guard; adequate for
    conv-scale activations (a shifted/Welford form would be more robust for
    very large magnitudes).
    """
    C = sum_p.shape[-1]
    s = jnp.sum(sum_p.reshape(-1, C), axis=0)
    ss = jnp.sum(ssum_p.reshape(-1, C), axis=0)
    mean = s / count
    var = jnp.maximum(ss / count - mean * mean, 0.0)
    inv_std = jax.lax.rsqrt(var + eps)
    scale = gamma * inv_std
    bias = beta - mean * scale
    return (scale.reshape(1, -1).astype(jnp.float32),
            bias.reshape(1, -1).astype(jnp.float32))


def init_params(key, inplanes, planes):
    """Torch-layout parameters: conv weights (Cout, Cin, kh, kw), BN gamma/beta."""
    expansion = 4
    ks = jax.random.split(key, 9)
    return {
        "w1": 0.1 * jax.random.normal(ks[0], (planes, inplanes, 1, 1), jnp.float32),
        "w2": 0.1 * jax.random.normal(ks[1], (planes, planes, 3, 3), jnp.float32),
        "w3": 0.1 * jax.random.normal(ks[2], (planes * expansion, planes, 1, 1),
                                      jnp.float32),
        "g1": 1.0 + 0.1 * jax.random.normal(ks[3], (planes,), jnp.float32),
        "b1": 0.1 * jax.random.normal(ks[4], (planes,), jnp.float32),
        "g2": 1.0 + 0.1 * jax.random.normal(ks[5], (planes,), jnp.float32),
        "b2": 0.1 * jax.random.normal(ks[6], (planes,), jnp.float32),
        "g3": 1.0 + 0.1 * jax.random.normal(ks[7], (planes * expansion,), jnp.float32),
        "b3": 0.1 * jax.random.normal(ks[8], (planes * expansion,), jnp.float32),
    }


def prepare_params(raw):
    """Pad channels to 128-lane multiples and cast matmul weights to bf16.

    gamma/beta are ZERO-padded on purpose: padded channels must stay exactly 0
    through BN+ReLU so they contribute nothing to the next matmul / residual.
    The 3x3 weight is repacked to (kh, kw*Cin_pad + c, Cout_pad) so the kw taps
    can be channel-concatenated (K = 3*Cin matmuls) inside the kernel.
    """
    planes, inplanes = raw["w1"].shape[0], raw["w1"].shape[1]
    cout3 = raw["w3"].shape[0]
    cin_p = _round_up(inplanes, LANE)
    c1_p = _round_up(planes, LANE)
    c3_p = _round_up(cout3, LANE)

    def pad2(m, r, c):
        return jnp.pad(m, ((0, r - m.shape[0]), (0, c - m.shape[1])))

    def padv(v, n):
        return jnp.pad(v, (0, n - v.shape[0]))

    w2 = jnp.transpose(raw["w2"], (2, 3, 1, 0))                       # (kh,kw,Ci,Co)
    w2 = jnp.pad(w2, ((0, 0), (0, 0), (0, c1_p - planes), (0, c1_p - planes)))
    w2k = w2.reshape(3, 3 * c1_p, c1_p)                               # kw folded into K
    return {
        "w1": pad2(raw["w1"][:, :, 0, 0].T, cin_p, c1_p).astype(jnp.bfloat16),
        "w2": w2k.astype(jnp.bfloat16),
        "w3": pad2(raw["w3"][:, :, 0, 0].T, c1_p, c3_p).astype(jnp.bfloat16),
        "g1": padv(raw["g1"], c1_p), "b1": padv(raw["b1"], c1_p),
        "g2": padv(raw["g2"], c1_p), "b2": padv(raw["b2"], c1_p),
        "g3": padv(raw["g3"], c3_p), "b3": padv(raw["b3"], c3_p),
    }


def bottleneck_forward(x_nchw, params, stride=1, dilation=1, eps=1e-5):
    """Bottleneck with downsample=None (requires stride == 1, Cin == 4*planes)."""
    assert stride == 1, "downsample=None requires stride == 1"
    N, Cin, H, W = x_nchw.shape
    cin_p = params["w1"].shape[0]
    c3_p = params["w3"].shape[1]
    assert cin_p == c3_p, "residual add requires inplanes == 4*planes"
    count = N * H * W

    # bf16 NHWC, channel-padded (conv1 consumes bf16 anyway; halves HBM traffic
    # for both the conv1 read and the residual read).
    x_nhwc = jnp.transpose(x_nchw, (0, 2, 3, 1))
    x_p = jnp.pad(x_nhwc, ((0, 0), (0, 0), (0, 0),
                           (0, cin_p - Cin))).astype(jnp.bfloat16)

    # conv1 (1x1) + bn1 batch statistics
    y1, s1, ss1 = conv1x1_stats(x_p, params["w1"])
    scale1, bias1 = bn_fold(s1, ss1, count, params["g1"], params["b1"], eps)

    # bn1+relu fused into conv2 (3x3, dilated, padding=dilation, stride 1)
    y2, s2, ss2 = conv3x3_bnrelu_stats(y1, scale1, bias1, params["w2"], dilation)
    scale2, bias2 = bn_fold(s2, ss2, count, params["g2"], params["b2"], eps)

    # bn2+relu fused into conv3 (1x1)
    y3, s3, ss3 = conv1x1_bnrelu_stats(y2, scale2, bias2, params["w3"])
    scale3, bias3 = bn_fold(s3, ss3, count, params["g3"], params["b3"], eps)

    # bn3 + residual + relu
    out_p = bn_add_relu(y3, scale3, bias3, x_p)
    return jnp.transpose(out_p[..., :Cin].astype(jnp.float32), (0, 3, 1, 2))


# ---------------------------------------------------------------------------
# Pure-JAX reference (f32) for validation
# ---------------------------------------------------------------------------
def reference_forward(x_nchw, raw, dilation=1, eps=1e-5):
    d = dilation
    x = jnp.transpose(x_nchw, (0, 2, 3, 1)).astype(jnp.float32)

    def conv(z, w_torch, pad, dil):
        w = jnp.transpose(w_torch, (2, 3, 1, 0))  # HWIO
        dn = jax.lax.conv_dimension_numbers(z.shape, w.shape,
                                            ("NHWC", "HWIO", "NHWC"))
        return jax.lax.conv_general_dilated(
            z, w, window_strides=(1, 1), padding=[(pad, pad), (pad, pad)],
            rhs_dilation=(dil, dil), dimension_numbers=dn)

    def bn(y, gamma, beta):
        mean = jnp.mean(y, axis=(0, 1, 2))
        var = jnp.mean(y * y, axis=(0, 1, 2)) - mean * mean
        return (y - mean) * jax.lax.rsqrt(var + eps) * gamma + beta

    z1 = jax.nn.relu(bn(conv(x, raw["w1"], 0, 1), raw["g1"], raw["b1"]))
    z2 = jax.nn.relu(bn(conv(z1, raw["w2"], d, d), raw["g2"], raw["b2"]))
    y3 = bn(conv(z2, raw["w3"], 0, 1), raw["g3"], raw["b3"])
    return jnp.transpose(jax.nn.relu(y3 + x), (0, 3, 1, 2))


if __name__ == "__main__":
    # Bottleneck(inplanes=16, planes=4, stride=1, dilation=1, downsample=None)
    N, inplanes, planes, H, W = 2, 16, 4, 16, 16
    key = jax.random.PRNGKey(0)
    kx, kp = jax.random.split(key)
    x = jax.random.normal(kx, (N, inplanes, H, W), jnp.float32)
    raw = init_params(kp, inplanes, planes)
    params = prepare_params(raw)

    out = jax.block_until_ready(jax.jit(bottleneck_forward)(x, params))
    assert out.shape == (N, inplanes, H, W)
    assert bool(jnp.all(jnp.isfinite(out)))

    # Cross-check against the pure-JAX f32 reference (bf16 MXU / bf16 activations
    # => loose tolerance).
    ref = reference_forward(x, raw)
    rel_err = float(jnp.max(jnp.abs(out - ref)) / (jnp.max(jnp.abs(ref)) + 1e-6))
    assert rel_err < 0.08, f"mismatch vs reference: rel_err={rel_err}"

    print("KERNEL_OK")
</pallas_src>

<mosaic_0001>
module attributes {stable_mosaic.version = 11 : i64} {
  func.func @_conv1x1_stats_kernel(%arg0: i32, %arg1: i32, %arg2: memref<1x16x16x128xbf16, #tpu.memory_space<vmem>>, %arg3: memref<128x128xbf16, #tpu.memory_space<vmem>>, %arg4: memref<1x16x16x128xbf16, #tpu.memory_space<vmem>>, %arg5: memref<1x1x8x128xf32, #tpu.memory_space<vmem>>, %arg6: memref<1x1x8x128xf32, #tpu.memory_space<vmem>>) attributes {dimension_semantics = [#tpu.dimension_semantics<parallel>, #tpu.dimension_semantics<parallel>], iteration_bounds = array<i64: 2, 1>, scalar_prefetch = 0 : i64, scratch_operands = 0 : i64, tpu.core_type = #tpu.core_type<tc>, window_params = [{transform_indices = @transform_0, window_bounds = array<i64: 1, 16, 16, 128>}, {pipeline_mode = #tpu.pipeline_mode<synchronous>, transform_indices = @transform_1, window_bounds = array<i64: 128, 128>}, {transform_indices = @transform_2, window_bounds = array<i64: 1, 16, 16, 128>}, {transform_indices = @transform_3, window_bounds = array<i64: 1, 1, 8, 128>}, {transform_indices = @transform_4, window_bounds = array<i64: 1, 1, 8, 128>}]} {
    %c0 = arith.constant 0 : index
    %c0_0 = arith.constant 0 : index
    %c0_1 = arith.constant 0 : index
    %c0_2 = arith.constant 0 : index
    %0 = vector.load %arg2[%c0, %c0_0, %c0_1, %c0_2] : memref<1x16x16x128xbf16, #tpu.memory_space<vmem>>, vector<1x16x16x128xbf16>
    %1 = vector.shape_cast %0 : vector<1x16x16x128xbf16> to vector<16x16x128xbf16>
    %2 = vector.shape_cast %1 : vector<16x16x128xbf16> to vector<256x128xbf16>
    %c0_3 = arith.constant 0 : index
    %c0_4 = arith.constant 0 : index
    %3 = vector.load %arg3[%c0_3, %c0_4] : memref<128x128xbf16, #tpu.memory_space<vmem>>, vector<128x128xbf16>
    %cst = arith.constant dense<0.000000e+00> : vector<256x128xf32>
    %4 = tpu.matmul %2, %3, %cst {dimension_numbers = #tpu.dot_dimension_numbers<[1], [0], [0], [1], [0, 0, 1, 1], [], []>} : vector<256x128xbf16>, vector<128x128xbf16>, vector<256x128xf32> -> vector<256x128xf32>
    %5 = vector.shape_cast %4 : vector<256x128xf32> to vector<32x8x128xf32>
    %cst_5 = arith.constant dense<0.000000e+00> : vector<8x128xf32>
    %6 = vector.multi_reduction <add>, %5, %cst_5 [0] : vector<32x8x128xf32> to vector<8x128xf32>
    %7 = arith.mulf %5, %5 : vector<32x8x128xf32>
    %cst_6 = arith.constant dense<0.000000e+00> : vector<8x128xf32>
    %8 = vector.multi_reduction <add>, %7, %cst_6 [0] : vector<32x8x128xf32> to vector<8x128xf32>
    %9 = vector.shape_cast %6 : vector<8x128xf32> to vector<1x1x8x128xf32>
    %c0_7 = arith.constant 0 : index
    %c0_8 = arith.constant 0 : index
    %c0_9 = arith.constant 0 : index
    %c0_10 = arith.constant 0 : index
    %10 = vector.load %arg5[%c0_7, %c0_8, %c0_9, %c0_10] : memref<1x1x8x128xf32, #tpu.memory_space<vmem>>, vector<1x1x8x128xf32>
    tpu.vector_store %arg5[%c0_7, %c0_8, %c0_9, %c0_10], %9 {strides = array<i32>} : memref<1x1x8x128xf32, #tpu.memory_space<vmem>>, vector<1x1x8x128xf32>,
    %11 = vector.shape_cast %8 : vector<8x128xf32> to vector<1x1x8x128xf32>
    %c0_11 = arith.constant 0 : index
    %c0_12 = arith.constant 0 : index
    %c0_13 = arith.constant 0 : index
    %c0_14 = arith.constant 0 : index
    %12 = vector.load %arg6[%c0_11, %c0_12, %c0_13, %c0_14] : memref<1x1x8x128xf32, #tpu.memory_space<vmem>>, vector<1x1x8x128xf32>
    tpu.vector_store %arg6[%c0_11, %c0_12, %c0_13, %c0_14], %11 {strides = array<i32>} : memref<1x1x8x128xf32, #tpu.memory_space<vmem>>, vector<1x1x8x128xf32>,
    %13 = vector.shape_cast %4 : vector<256x128xf32> to vector<1x16x16x128xf32>
    %14 = arith.truncf %13 : vector<1x16x16x128xf32> to vector<1x16x16x128xbf16>
    %c0_15 = arith.constant 0 : index
    %c0_16 = arith.constant 0 : index
    %c0_17 = arith.constant 0 : index
    %c0_18 = arith.constant 0 : index
    %15 = vector.load %arg4[%c0_15, %c0_16, %c0_17, %c0_18] : memref<1x16x16x128xbf16, #tpu.memory_space<vmem>>, vector<1x16x16x128xbf16>
    tpu.vector_store %arg4[%c0_15, %c0_16, %c0_17, %c0_18], %14 {strides = array<i32>} : memref<1x16x16x128xbf16, #tpu.memory_space<vmem>>, vector<1x16x16x128xbf16>,
    return
  }
  func.func @transform_0(%arg0: i32, %arg1: i32) -> (i32, i32, i32, i32) {
    %c0_i32 = arith.constant 0 : i32
    %c0_i32_0 = arith.constant 0 : i32
    %c0_i32_1 = arith.constant 0 : i32
    return %arg0, %arg1, %c0_i32, %c0_i32_0 : i32, i32, i32, i32
  }
  func.func @transform_1(%arg0: i32, %arg1: i32) -> (i32, i32) {
    %c0_i32 = arith.constant 0 : i32
    %c0_i32_0 = arith.constant 0 : i32
    %c0_i32_1 = arith.constant 0 : i32
    return %c0_i32, %c0_i32_0 : i32, i32
  }
  func.func @transform_2(%arg0: i32, %arg1: i32) -> (i32, i32, i32, i32) {
    %c0_i32 = arith.constant 0 : i32
    %c0_i32_0 = arith.constant 0 : i32
    %c0_i32_1 = arith.constant 0 : i32
    return %arg0, %arg1, %c0_i32, %c0_i32_0 : i32, i32, i32, i32
  }
  func.func @transform_3(%arg0: i32, %arg1: i32) -> (i32, i32, i32, i32) {
    %c0_i32 = arith.constant 0 : i32
    %c0_i32_0 = arith.constant 0 : i32
    %c0_i32_1 = arith.constant 0 : i32
    return %arg0, %arg1, %c0_i32, %c0_i32_0 : i32, i32, i32, i32
  }
  func.func @transform_4(%arg0: i32, %arg1: i32) -> (i32, i32, i32, i32) {
    %c0_i32 = arith.constant 0 : i32
    %c0_i32_0 = arith.constant 0 : i32
    %c0_i32_1 = arith.constant 0 : i32
    return %arg0, %arg1, %c0_i32, %c0_i32_0 : i32, i32, i32, i32
  }
}

module attributes {stable_mosaic.version = 11 : i64} {
  func.func @_conv3x3_bnrelu_stats_kernel(%arg0: i32, %arg1: memref<1x16x16x128xbf16, #tpu.memory_space<vmem>>, %arg2: memref<1x128xf32, #tpu.memory_space<vmem>>, %arg3: memref<1x128xf32, #tpu.memory_space<vmem>>, %arg4: memref<3x384x128xbf16, #tpu.memory_space<vmem>>, %arg5: memref<1x16x16x128xbf16, #tpu.memory_space<vmem>>, %arg6: memref<1x8x128xf32, #tpu.memory_space<vmem>>, %arg7: memref<1x8x128xf32, #tpu.memory_space<vmem>>, %arg8: memref<18x16x384xbf16, #tpu.memory_space<vmem>>) attributes {dimension_semantics = [#tpu.dimension_semantics<parallel>], iteration_bounds = array<i64: 2>, scalar_prefetch = 0 : i64, scratch_operands = 1 : i64, tpu.core_type = #tpu.core_type<tc>, window_params = [{transform_indices = @transform_0, window_bounds = array<i64: 1, 16, 16, 128>}, {pipeline_mode = #tpu.pipeline_mode<synchronous>, transform_indices = @transform_1, window_bounds = array<i64: 1, 128>}, {pipeline_mode = #tpu.pipeline_mode<synchronous>, transform_indices = @transform_2, window_bounds = array<i64: 1, 128>}, {pipeline_mode = #tpu.pipeline_mode<synchronous>, transform_indices = @transform_3, window_bounds = array<i64: 3, 384, 128>}, {transform_indices = @transform_4, window_bounds = array<i64: 1, 16, 16, 128>}, {transform_indices = @transform_5, window_bounds = array<i64: 1, 8, 128>}, {transform_indices = @transform_6, window_bounds = array<i64: 1, 8, 128>}]} {
    %c0 = arith.constant 0 : index
    %c0_0 = arith.constant 0 : index
    %0 = vector.load %arg2[%c0, %c0_0] : memref<1x128xf32, #tpu.memory_space<vmem>>, vector<1x128xf32>
    %1 = vector.shape_cast %0 : vector<1x128xf32> to vector<1x1x128xf32>
    %c0_1 = arith.constant 0 : index
    %c0_2 = arith.constant 0 : index
    %2 = vector.load %arg3[%c0_1, %c0_2] : memref<1x128xf32, #tpu.memory_space<vmem>>, vector<1x128xf32>
    %3 = vector.shape_cast %2 : vector<1x128xf32> to vector<1x1x128xf32>
    %c0_3 = arith.constant 0 : index
    %c0_4 = arith.constant 0 : index
    %c0_5 = arith.constant 0 : index
    %c0_6 = arith.constant 0 : index
    %4 = vector.load %arg1[%c0_3, %c0_4, %c0_5, %c0_6] : memref<1x16x16x128xbf16, #tpu.memory_space<vmem>>, vector<1x16x16x128xbf16>
    %5 = vector.shape_cast %4 : vector<1x16x16x128xbf16> to vector<16x16x128xbf16>
    %6 = arith.extf %5 : vector<16x16x128xbf16> to vector<16x16x128xf32>
    %7 = vector.broadcast %1 : vector<1x1x128xf32> to vector<16x16x128xf32>
    %8 = arith.mulf %6, %7 : vector<16x16x128xf32>
    %9 = vector.broadcast %3 : vector<1x1x128xf32> to vector<16x16x128xf32>
    %10 = arith.addf %8, %9 : vector<16x16x128xf32>
    %cst = arith.constant 0.000000e+00 : f32
    %11 = vector.broadcast %cst : f32 to vector<16x16x128xf32>
    %12 = arith.maximumf %10, %11 : vector<16x16x128xf32>
    %13 = arith.truncf %12 : vector<16x16x128xf32> to vector<16x16x128xbf16>
    %cst_7 = arith.constant 0.000000e+00 : bf16
    %14 = vector.broadcast %cst_7 : bf16 to vector<1x16x384xbf16>
    %c0_8 = arith.constant 0 : index
    %c0_9 = arith.constant 0 : index
    %c0_10 = arith.constant 0 : index
    %15 = vector.load %arg8[%c0_8, %c0_9, %c0_10] : memref<18x16x384xbf16, #tpu.memory_space<vmem>>, vector<1x16x384xbf16>
    tpu.vector_store %arg8[%c0_8, %c0_9, %c0_10], %14 {strides = array<i32>} : memref<18x16x384xbf16, #tpu.memory_space<vmem>>, vector<1x16x384xbf16>,
    %cst_11 = arith.constant 0.000000e+00 : bf16
    %16 = vector.broadcast %cst_11 : bf16 to vector<1x16x384xbf16>
    %c17 = arith.constant 17 : index
    %c0_12 = arith.constant 0 : index
    %c0_13 = arith.constant 0 : index
    %17 = vector.load %arg8[%c17, %c0_12, %c0_13] : memref<18x16x384xbf16, #tpu.memory_space<vmem>>, vector<1x16x384xbf16>
    tpu.vector_store %arg8[%c17, %c0_12, %c0_13], %16 {strides = array<i32>} : memref<18x16x384xbf16, #tpu.memory_space<vmem>>, vector<1x16x384xbf16>,
    %cst_14 = arith.constant 0.000000e+00 : bf16
    %18 = vector.broadcast %cst_14 : bf16 to vector<16x1x128xbf16>
    %c1 = arith.constant 1 : index
    %c0_15 = arith.constant 0 : index
    %c0_16 = arith.constant 0 : index
    %19 = vector.load %arg8[%c1, %c0_15, %c0_16] : memref<18x16x384xbf16, #tpu.memory_space<vmem>>, vector<16x1x128xbf16>
    tpu.vector_store %arg8[%c1, %c0_15, %c0_16], %18 {strides = array<i32>} : memref<18x16x384xbf16, #tpu.memory_space<vmem>>, vector<16x1x128xbf16>,
    %cst_17 = arith.constant 0.000000e+00 : bf16
    %20 = vector.broadcast %cst_17 : bf16 to vector<16x1x128xbf16>
    %c1_18 = arith.constant 1 : index
    %c15 = arith.constant 15 : index
    %c256 = arith.constant 256 : index
    %21 = vector.load %arg8[%c1_18, %c15, %c256] : memref<18x16x384xbf16, #tpu.memory_space<vmem>>, vector<16x1x128xbf16>
    tpu.vector_store %arg8[%c1_18, %c15, %c256], %20 {strides = array<i32>} : memref<18x16x384xbf16, #tpu.memory_space<vmem>>, vector<16x1x128xbf16>,
    %22 = vector.extract_strided_slice %13 {offsets = [0, 0, 0], sizes = [16, 15, 128], strides = [1, 1, 1]} : vector<16x16x128xbf16> to vector<16x15x128xbf16>
    %c1_19 = arith.constant 1 : index
    %c1_20 = arith.constant 1 : index
    %c0_21 = arith.constant 0 : index
    %23 = vector.load %arg8[%c1_19, %c1_20, %c0_21] : memref<18x16x384xbf16, #tpu.memory_space<vmem>>, vector<16x15x128xbf16>
    tpu.vector_store %arg8[%c1_19, %c1_20, %c0_21], %22 {strides = array<i32>} : memref<18x16x384xbf16, #tpu.memory_space<vmem>>, vector<16x15x128xbf16>,
    %c1_22 = arith.constant 1 : index
    %c0_23 = arith.constant 0 : index
    %c128 = arith.constant 128 : index
    %24 = vector.load %arg8[%c1_22, %c0_23, %c128] : memref<18x16x384xbf16, #tpu.memory_space<vmem>>, vector<16x16x128xbf16>
    tpu.vector_store %arg8[%c1_22, %c0_23, %c128], %13 {strides = array<i32>} : memref<18x16x384xbf16, #tpu.memory_space<vmem>>, vector<16x16x128xbf16>,
    %25 = vector.extract_strided_slice %13 {offsets = [0, 1, 0], sizes = [16, 15, 128], strides = [1, 1, 1]} : vector<16x16x128xbf16> to vector<16x15x128xbf16>
    %c1_24 = arith.constant 1 : index
    %c0_25 = arith.constant 0 : index
    %c256_26 = arith.constant 256 : index
    %26 = vector.load %arg8[%c1_24, %c0_25, %c256_26] : memref<18x16x384xbf16, #tpu.memory_space<vmem>>, vector<16x15x128xbf16>
    tpu.vector_store %arg8[%c1_24, %c0_25, %c256_26], %25 {strides = array<i32>} : memref<18x16x384xbf16, #tpu.memory_space<vmem>>, vector<16x15x128xbf16>,
    %c0_27 = arith.constant 0 : index
    %c0_28 = arith.constant 0 : index
    %c0_29 = arith.constant 0 : index
    %27 = vector.load %arg8[%c0_27, %c0_28, %c0_29] : memref<18x16x384xbf16, #tpu.memory_space<vmem>>, vector<16x16x384xbf16>
    %28 = vector.shape_cast %27 : vector<16x16x384xbf16> to vector<256x384xbf16>
    %c0_30 = arith.constant 0 : index
    %c0_31 = arith.constant 0 : index
    %c0_32 = arith.constant 0 : index
    %29 = vector.load %arg4[%c0_30, %c0_31, %c0_32] : memref<3x384x128xbf16, #tpu.memory_space<vmem>>, vector<1x384x128xbf16>
    %30 = vector.shape_cast %29 : vector<1x384x128xbf16> to vector<384x128xbf16>
    %cst_33 = arith.constant dense<0.000000e+00> : vector<256x128xf32>
    %31 = tpu.matmul %28, %30, %cst_33 {dimension_numbers = #tpu.dot_dimension_numbers<[1], [0], [0], [1], [0, 0, 1, 1], [], []>} : vector<256x384xbf16>, vector<384x128xbf16>, vector<256x128xf32> -> vector<256x128xf32>
    %c1_34 = arith.constant 1 : index
    %c0_35 = arith.constant 0 : index
    %c0_36 = arith.constant 0 : index
    %32 = vector.load %arg8[%c1_34, %c0_35, %c0_36] : memref<18x16x384xbf16, #tpu.memory_space<vmem>>, vector<16x16x384xbf16>
    %33 = vector.shape_cast %32 : vector<16x16x384xbf16> to vector<256x384xbf16>
    %c1_37 = arith.constant 1 : index
    %c0_38 = arith.constant 0 : index
    %c0_39 = arith.constant 0 : index
    %34 = vector.load %arg4[%c1_37, %c0_38, %c0_39] : memref<3x384x128xbf16, #tpu.memory_space<vmem>>, vector<1x384x128xbf16>
    %35 = vector.shape_cast %34 : vector<1x384x128xbf16> to vector<384x128xbf16>
    %cst_40 = arith.constant dense<0.000000e+00> : vector<256x128xf32>
    %36 = tpu.matmul %33, %35, %cst_40 {dimension_numbers = #tpu.dot_dimension_numbers<[1], [0], [0], [1], [0, 0, 1, 1], [], []>} : vector<256x384xbf16>, vector<384x128xbf16>, vector<256x128xf32> -> vector<256x128xf32>
    %37 = arith.addf %31, %36 : vector<256x128xf32>
    %c2 = arith.constant 2 : index
    %c0_41 = arith.constant 0 : index
    %c0_42 = arith.constant 0 : index
    %38 = vector.load %arg8[%c2, %c0_41, %c0_42] : memref<18x16x384xbf16, #tpu.memory_space<vmem>>, vector<16x16x384xbf16>
    %39 = vector.shape_cast %38 : vector<16x16x384xbf16> to vector<256x384xbf16>
    %c2_43 = arith.constant 2 : index
    %c0_44 = arith.constant 0 : index
    %c0_45 = arith.constant 0 : index
    %40 = vector.load %arg4[%c2_43, %c0_44, %c0_45] : memref<3x384x128xbf16, #tpu.memory_space<vmem>>, vector<1x384x128xbf16>
    %41 = vector.shape_cast %40 : vector<1x384x128xbf16> to vector<384x128xbf16>
    %cst_46 = arith.constant dense<0.000000e+00> : vector<256x128xf32>
    %42 = tpu.matmul %39, %41, %cst_46 {dimension_numbers = #tpu.dot_dimension_numbers<[1], [0], [0], [1], [0, 0, 1, 1], [], []>} : vector<256x384xbf16>, vector<384x128xbf16>, vector<256x128xf32> -> vector<256x128xf32>
    %43 = arith.addf %37, %42 : vector<256x128xf32>
    %44 = vector.shape_cast %43 : vector<256x128xf32> to vector<32x8x128xf32>
    %cst_47 = arith.constant dense<0.000000e+00> : vector<8x128xf32>
    %45 = vector.multi_reduction <add>, %44, %cst_47 [0] : vector<32x8x128xf32> to vector<8x128xf32>
    %46 = arith.mulf %44, %44 : vector<32x8x128xf32>
    %cst_48 = arith.constant dense<0.000000e+00> : vector<8x128xf32>
    %47 = vector.multi_reduction <add>, %46, %cst_48 [0] : vector<32x8x128xf32> to vector<8x128xf32>
    %48 = vector.shape_cast %45 : vector<8x128xf32> to vector<1x8x128xf32>
    %c0_49 = arith.constant 0 : index
    %c0_50 = arith.constant 0 : index
    %c0_51 = arith.constant 0 : index
    %49 = vector.load %arg6[%c0_49, %c0_50, %c0_51] : memref<1x8x128xf32, #tpu.memory_space<vmem>>, vector<1x8x128xf32>
    tpu.vector_store %arg6[%c0_49, %c0_50, %c0_51], %48 {strides = array<i32>} : memref<1x8x128xf32, #tpu.memory_space<vmem>>, vector<1x8x128xf32>,
    %50 = vector.shape_cast %47 : vector<8x128xf32> to vector<1x8x128xf32>
    %c0_52 = arith.constant 0 : index
    %c0_53 = arith.constant 0 : index
    %c0_54 = arith.constant 0 : index
    %51 = vector.load %arg7[%c0_52, %c0_53, %c0_54] : memref<1x8x128xf32, #tpu.memory_space<vmem>>, vector<1x8x128xf32>
    tpu.vector_store %arg7[%c0_52, %c0_53, %c0_54], %50 {strides = array<i32>} : memref<1x8x128xf32, #tpu.memory_space<vmem>>, vector<1x8x128xf32>,
    %52 = vector.shape_cast %43 : vector<256x128xf32> to vector<1x16x16x128xf32>
    %53 = arith.truncf %52 : vector<1x16x16x128xf32> to vector<1x16x16x128xbf16>
    %c0_55 = arith.constant 0 : index
    %c0_56 = arith.constant 0 : index
    %c0_57 = arith.constant 0 : index
    %c0_58 = arith.constant 0 : index
    %54 = vector.load %arg5[%c0_55, %c0_56, %c0_57, %c0_58] : memref<1x16x16x128xbf16, #tpu.memory_space<vmem>>, vector<1x16x16x128xbf16>
    tpu.vector_store %arg5[%c0_55, %c0_56, %c0_57, %c0_58], %53 {strides = array<i32>} : memref<1x16x16x128xbf16, #tpu.memory_space<vmem>>, vector<1x16x16x128xbf16>,
    return
  }
  func.func @transform_0(%arg0: i32) -> (i32, i32, i32, i32) {
    %c0_i32 = arith.constant 0 : i32
    %c0_i32_0 = arith.constant 0 : i32
    %c0_i32_1 = arith.constant 0 : i32
    %c0_i32_2 = arith.constant 0 : i32
    return %arg0, %c0_i32, %c0_i32_0, %c0_i32_1 : i32, i32, i32, i32
  }
  func.func @transform_1(%arg0: i32) -> (i32, i32) {
    %c0_i32 = arith.constant 0 : i32
    %c0_i32_0 = arith.constant 0 : i32
    %c0_i32_1 = arith.constant 0 : i32
    return %c0_i32, %c0_i32_0 : i32, i32
  }
  func.func @transform_2(%arg0: i32) -> (i32, i32) {
    %c0_i32 = arith.constant 0 : i32
    %c0_i32_0 = arith.constant 0 : i32
    %c0_i32_1 = arith.constant 0 : i32
    return %c0_i32, %c0_i32_0 : i32, i32
  }
  func.func @transform_3(%arg0: i32) -> (i32, i32, i32) {
    %c0_i32 = arith.constant 0 : i32
    %c0_i32_0 = arith.constant 0 : i32
    %c0_i32_1 = arith.constant 0 : i32
    %c0_i32_2 = arith.constant 0 : i32
    return %c0_i32, %c0_i32_0, %c0_i32_1 : i32, i32, i32
  }
  func.func @transform_4(%arg0: i32) -> (i32, i32, i32, i32) {
    %c0_i32 = arith.constant 0 : i32
    %c0_i32_0 = arith.constant 0 : i32
    %c0_i32_1 = arith.constant 0 : i32
    %c0_i32_2 = arith.constant 0 : i32
    return %arg0, %c0_i32, %c0_i32_0, %c0_i32_1 : i32, i32, i32, i32
  }
  func.func @transform_5(%arg0: i32) -> (i32, i32, i32) {
    %c0_i32 = arith.constant 0 : i32
    %c0_i32_0 = arith.constant 0 : i32
    %c0_i32_1 = arith.constant 0 : i32
    return %arg0, %c0_i32, %c0_i32_0 : i32, i32, i32
  }
  func.func @transform_6(%arg0: i32) -> (i32, i32, i32) {
    %c0_i32 = arith.constant 0 : i32
    %c0_i32_0 = arith.constant 0 : i32
    %c0_i32_1 = arith.constant 0 : i32
    return %arg0, %c0_i32, %c0_i32_0 : i32, i32, i32
  }
}

module attributes {stable_mosaic.version = 11 : i64} {
  func.func @_conv1x1_bnrelu_stats_kernel(%arg0: i32, %arg1: i32, %arg2: memref<1x16x16x128xbf16, #tpu.memory_space<vmem>>, %arg3: memref<1x128xf32, #tpu.memory_space<vmem>>, %arg4: memref<1x128xf32, #tpu.memory_space<vmem>>, %arg5: memref<128x128xbf16, #tpu.memory_space<vmem>>, %arg6: memref<1x16x16x128xbf16, #tpu.memory_space<vmem>>, %arg7: memref<1x1x8x128xf32, #tpu.memory_space<vmem>>, %arg8: memref<1x1x8x128xf32, #tpu.memory_space<vmem>>) attributes {dimension_semantics = [#tpu.dimension_semantics<parallel>, #tpu.dimension_semantics<parallel>], iteration_bounds = array<i64: 2, 1>, scalar_prefetch = 0 : i64, scratch_operands = 0 : i64, tpu.core_type = #tpu.core_type<tc>, window_params = [{transform_indices = @transform_0, window_bounds = array<i64: 1, 16, 16, 128>}, {pipeline_mode = #tpu.pipeline_mode<synchronous>, transform_indices = @transform_1, window_bounds = array<i64: 1, 128>}, {pipeline_mode = #tpu.pipeline_mode<synchronous>, transform_indices = @transform_2, window_bounds = array<i64: 1, 128>}, {pipeline_mode = #tpu.pipeline_mode<synchronous>, transform_indices = @transform_3, window_bounds = array<i64: 128, 128>}, {transform_indices = @transform_4, window_bounds = array<i64: 1, 16, 16, 128>}, {transform_indices = @transform_5, window_bounds = array<i64: 1, 1, 8, 128>}, {transform_indices = @transform_6, window_bounds = array<i64: 1, 1, 8, 128>}]} {
    %c0 = arith.constant 0 : index
    %c0_0 = arith.constant 0 : index
    %c0_1 = arith.constant 0 : index
    %c0_2 = arith.constant 0 : index
    %0 = vector.load %arg2[%c0, %c0_0, %c0_1, %c0_2] : memref<1x16x16x128xbf16, #tpu.memory_space<vmem>>, vector<1x16x16x128xbf16>
    %1 = vector.shape_cast %0 : vector<1x16x16x128xbf16> to vector<16x16x128xbf16>
    %2 = vector.shape_cast %1 : vector<16x16x128xbf16> to vector<256x128xbf16>
    %3 = arith.extf %2 : vector<256x128xbf16> to vector<256x128xf32>
    %c0_3 = arith.constant 0 : index
    %c0_4 = arith.constant 0 : index
    %4 = vector.load %arg3[%c0_3, %c0_4] : memref<1x128xf32, #tpu.memory_space<vmem>>, vector<1x128xf32>
    %5 = vector.broadcast %4 : vector<1x128xf32> to vector<256x128xf32>
    %6 = arith.mulf %3, %5 : vector<256x128xf32>
    %c0_5 = arith.constant 0 : index
    %c0_6 = arith.constant 0 : index
    %7 = vector.load %arg4[%c0_5, %c0_6] : memref<1x128xf32, #tpu.memory_space<vmem>>, vector<1x128xf32>
    %8 = vector.broadcast %7 : vector<1x128xf32> to vector<256x128xf32>
    %9 = arith.addf %6, %8 : vector<256x128xf32>
    %cst = arith.constant 0.000000e+00 : f32
    %10 = vector.broadcast %cst : f32 to vector<256x128xf32>
    %11 = arith.maximumf %9, %10 : vector<256x128xf32>
    %12 = arith.truncf %11 : vector<256x128xf32> to vector<256x128xbf16>
    %c0_7 = arith.constant 0 : index
    %c0_8 = arith.constant 0 : index
    %13 = vector.load %arg5[%c0_7, %c0_8] : memref<128x128xbf16, #tpu.memory_space<vmem>>, vector<128x128xbf16>
    %cst_9 = arith.constant dense<0.000000e+00> : vector<256x128xf32>
    %14 = tpu.matmul %12, %13, %cst_9 {dimension_numbers = #tpu.dot_dimension_numbers<[1], [0], [0], [1], [0, 0, 1, 1], [], []>} : vector<256x128xbf16>, vector<128x128xbf16>, vector<256x128xf32> -> vector<256x128xf32>
    %15 = vector.shape_cast %14 : vector<256x128xf32> to vector<32x8x128xf32>
    %cst_10 = arith.constant dense<0.000000e+00> : vector<8x128xf32>
    %16 = vector.multi_reduction <add>, %15, %cst_10 [0] : vector<32x8x128xf32> to vector<8x128xf32>
    %17 = arith.mulf %15, %15 : vector<32x8x128xf32>
    %cst_11 = arith.constant dense<0.000000e+00> : vector<8x128xf32>
    %18 = vector.multi_reduction <add>, %17, %cst_11 [0] : vector<32x8x128xf32> to vector<8x128xf32>
    %19 = vector.shape_cast %16 : vector<8x128xf32> to vector<1x1x8x128xf32>
    %c0_12 = arith.constant 0 : index
    %c0_13 = arith.constant 0 : index
    %c0_14 = arith.constant 0 : index
    %c0_15 = arith.constant 0 : index
    %20 = vector.load %arg7[%c0_12, %c0_13, %c0_14, %c0_15] : memref<1x1x8x128xf32, #tpu.memory_space<vmem>>, vector<1x1x8x128xf32>
    tpu.vector_store %arg7[%c0_12, %c0_13, %c0_14, %c0_15], %19 {strides = array<i32>} : memref<1x1x8x128xf32, #tpu.memory_space<vmem>>, vector<1x1x8x128xf32>,
    %21 = vector.shape_cast %18 : vector<8x128xf32> to vector<1x1x8x128xf32>
    %c0_16 = arith.constant 0 : index
    %c0_17 = arith.constant 0 : index
    %c0_18 = arith.constant 0 : index
    %c0_19 = arith.constant 0 : index
    %22 = vector.load %arg8[%c0_16, %c0_17, %c0_18, %c0_19] : memref<1x1x8x128xf32, #tpu.memory_space<vmem>>, vector<1x1x8x128xf32>
    tpu.vector_store %arg8[%c0_16, %c0_17, %c0_18, %c0_19], %21 {strides = array<i32>} : memref<1x1x8x128xf32, #tpu.memory_space<vmem>>, vector<1x1x8x128xf32>,
    %23 = vector.shape_cast %14 : vector<256x128xf32> to vector<1x16x16x128xf32>
    %24 = arith.truncf %23 : vector<1x16x16x128xf32> to vector<1x16x16x128xbf16>
    %c0_20 = arith.constant 0 : index
    %c0_21 = arith.constant 0 : index
    %c0_22 = arith.constant 0 : index
    %c0_23 = arith.constant 0 : index
    %25 = vector.load %arg6[%c0_20, %c0_21, %c0_22, %c0_23] : memref<1x16x16x128xbf16, #tpu.memory_space<vmem>>, vector<1x16x16x128xbf16>
    tpu.vector_store %arg6[%c0_20, %c0_21, %c0_22, %c0_23], %24 {strides = array<i32>} : memref<1x16x16x128xbf16, #tpu.memory_space<vmem>>, vector<1x16x16x128xbf16>,
    return
  }
  func.func @transform_0(%arg0: i32, %arg1: i32) -> (i32, i32, i32, i32) {
    %c0_i32 = arith.constant 0 : i32
    %c0_i32_0 = arith.constant 0 : i32
    %c0_i32_1 = arith.constant 0 : i32
    return %arg0, %arg1, %c0_i32, %c0_i32_0 : i32, i32, i32, i32
  }
  func.func @transform_1(%arg0: i32, %arg1: i32) -> (i32, i32) {
    %c0_i32 = arith.constant 0 : i32
    %c0_i32_0 = arith.constant 0 : i32
    %c0_i32_1 = arith.constant 0 : i32
    return %c0_i32, %c0_i32_0 : i32, i32
  }
  func.func @transform_2(%arg0: i32, %arg1: i32) -> (i32, i32) {
    %c0_i32 = arith.constant 0 : i32
    %c0_i32_0 = arith.constant 0 : i32
    %c0_i32_1 = arith.constant 0 : i32
    return %c0_i32, %c0_i32_0 : i32, i32
  }
  func.func @transform_3(%arg0: i32, %arg1: i32) -> (i32, i32) {
    %c0_i32 = arith.constant 0 : i32
    %c0_i32_0 = arith.constant 0 : i32
    %c0_i32_1 = arith.constant 0 : i32
    return %c0_i32, %c0_i32_0 : i32, i32
  }
  func.func @transform_4(%arg0: i32, %arg1: i32) -> (i32, i32, i32, i32) {
    %c0_i32 = arith.constant 0 : i32
    %c0_i32_0 = arith.constant 0 : i32
    %c0_i32_1 = arith.constant 0 : i32
    return %arg0, %arg1, %c0_i32, %c0_i32_0 : i32, i32, i32, i32
  }
  func.func @transform_5(%arg0: i32, %arg1: i32) -> (i32, i32, i32, i32) {
    %c0_i32 = arith.constant 0 : i32
    %c0_i32_0 = arith.constant 0 : i32
    %c0_i32_1 = arith.constant 0 : i32
    return %arg0, %arg1, %c0_i32, %c0_i32_0 : i32, i32, i32, i32
  }
  func.func @transform_6(%arg0: i32, %arg1: i32) -> (i32, i32, i32, i32) {
    %c0_i32 = arith.constant 0 : i32
    %c0_i32_0 = arith.constant 0 : i32
    %c0_i32_1 = arith.constant 0 : i32
    return %arg0, %arg1, %c0_i32, %c0_i32_0 : i32, i32, i32, i32
  }
}

module attributes {stable_mosaic.version = 11 : i64} {
  func.func @_bn_add_relu_kernel(%arg0: i32, %arg1: i32, %arg2: memref<1x16x16x128xbf16, #tpu.memory_space<vmem>>, %arg3: memref<1x128xf32, #tpu.memory_space<vmem>>, %arg4: memref<1x128xf32, #tpu.memory_space<vmem>>, %arg5: memref<1x16x16x128xbf16, #tpu.memory_space<vmem>>, %arg6: memref<1x16x16x128xbf16, #tpu.memory_space<vmem>>) attributes {dimension_semantics = [#tpu.dimension_semantics<parallel>, #tpu.dimension_semantics<parallel>], iteration_bounds = array<i64: 2, 1>, scalar_prefetch = 0 : i64, scratch_operands = 0 : i64, tpu.core_type = #tpu.core_type<tc>, window_params = [{transform_indices = @transform_0, window_bounds = array<i64: 1, 16, 16, 128>}, {pipeline_mode = #tpu.pipeline_mode<synchronous>, transform_indices = @transform_1, window_bounds = array<i64: 1, 128>}, {pipeline_mode = #tpu.pipeline_mode<synchronous>, transform_indices = @transform_2, window_bounds = array<i64: 1, 128>}, {transform_indices = @transform_3, window_bounds = array<i64: 1, 16, 16, 128>}, {transform_indices = @transform_4, window_bounds = array<i64: 1, 16, 16, 128>}]} {
    %c0 = arith.constant 0 : index
    %c0_0 = arith.constant 0 : index
    %0 = vector.load %arg3[%c0, %c0_0] : memref<1x128xf32, #tpu.memory_space<vmem>>, vector<1x128xf32>
    %1 = vector.shape_cast %0 : vector<1x128xf32> to vector<1x1x1x128xf32>
    %c0_1 = arith.constant 0 : index
    %c0_2 = arith.constant 0 : index
    %2 = vector.load %arg4[%c0_1, %c0_2] : memref<1x128xf32, #tpu.memory_space<vmem>>, vector<1x128xf32>
    %3 = vector.shape_cast %2 : vector<1x128xf32> to vector<1x1x1x128xf32>
    %c0_3 = arith.constant 0 : index
    %c0_4 = arith.constant 0 : index
    %c0_5 = arith.constant 0 : index
    %c0_6 = arith.constant 0 : index
    %4 = vector.load %arg2[%c0_3, %c0_4, %c0_5, %c0_6] : memref<1x16x16x128xbf16, #tpu.memory_space<vmem>>, vector<1x16x16x128xbf16>
    %5 = arith.extf %4 : vector<1x16x16x128xbf16> to vector<1x16x16x128xf32>
    %6 = vector.broadcast %1 : vector<1x1x1x128xf32> to vector<1x16x16x128xf32>
    %7 = arith.mulf %5, %6 : vector<1x16x16x128xf32>
    %8 = vector.broadcast %3 : vector<1x1x1x128xf32> to vector<1x16x16x128xf32>
    %9 = arith.addf %7, %8 : vector<1x16x16x128xf32>
    %c0_7 = arith.constant 0 : index
    %c0_8 = arith.constant 0 : index
    %c0_9 = arith.constant 0 : index
    %c0_10 = arith.constant 0 : index
    %10 = vector.load %arg5[%c0_7, %c0_8, %c0_9, %c0_10] : memref<1x16x16x128xbf16, #tpu.memory_space<vmem>>, vector<1x16x16x128xbf16>
    %11 = arith.extf %10 : vector<1x16x16x128xbf16> to vector<1x16x16x128xf32>
    %12 = arith.addf %9, %11 : vector<1x16x16x128xf32>
    %cst = arith.constant 0.000000e+00 : f32
    %13 = vector.broadcast %cst : f32 to vector<1x16x16x128xf32>
    %14 = arith.maximumf %12, %13 : vector<1x16x16x128xf32>
    %15 = arith.truncf %14 : vector<1x16x16x128xf32> to vector<1x16x16x128xbf16>
    %c0_11 = arith.constant 0 : index
    %c0_12 = arith.constant 0 : index
    %c0_13 = arith.constant 0 : index
    %c0_14 = arith.constant 0 : index
    %16 = vector.load %arg6[%c0_11, %c0_12, %c0_13, %c0_14] : memref<1x16x16x128xbf16, #tpu.memory_space<vmem>>, vector<1x16x16x128xbf16>
    tpu.vector_store %arg6[%c0_11, %c0_12, %c0_13, %c0_14], %15 {strides = array<i32>} : memref<1x16x16x128xbf16, #tpu.memory_space<vmem>>, vector<1x16x16x128xbf16>,
    return
  }
  func.func @transform_0(%arg0: i32, %arg1: i32) -> (i32, i32, i32, i32) {
    %c0_i32 = arith.constant 0 : i32
    %c0_i32_0 = arith.constant 0 : i32
    %c0_i32_1 = arith.constant 0 : i32
    return %arg0, %arg1, %c0_i32, %c0_i32_0 : i32, i32, i32, i32
  }
  func.func @transform_1(%arg0: i32, %arg1: i32) -> (i32, i32) {
    %c0_i32 = arith.constant 0 : i32
    %c0_i32_0 = arith.constant 0 : i32
    %c0_i32_1 = arith.constant 0 : i32
    return %c0_i32, %c0_i32_0 : i32, i32
  }
  func.func @transform_2(%arg0: i32, %arg1: i32) -> (i32, i32) {
    %c0_i32 = arith.constant 0 : i32
    %c0_i32_0 = arith.constant 0 : i32
    %c0_i32_1 = arith.constant 0 : i32
    return %c0_i32, %c0_i32_0 : i32, i32
  }
  func.func @transform_3(%arg0: i32, %arg1: i32) -> (i32, i32, i32, i32) {
    %c0_i32 = arith.constant 0 : i32
    %c0_i32_0 = arith.constant 0 : i32
    %c0_i32_1 = arith.constant 0 : i32
    return %arg0, %arg1, %c0_i32, %c0_i32_0 : i32, i32, i32, i32
  }
  func.func @transform_4(%arg0: i32, %arg1: i32) -> (i32, i32, i32, i32) {
    %c0_i32 = arith.constant 0 : i32
    %c0_i32_0 = arith.constant 0 : i32
    %c0_i32_1 = arith.constant 0 : i32
    return %arg0, %arg1, %c0_i32, %c0_i32_0 : i32, i32, i32, i32
  }
}

</mosaic_0001>

<bundles_post_ra>
// kernel: bottleneck_forward.4
= control target key start
LH: loop header
LB: loop body
LE: loop exit
PB: predicated region body
PF: predicated region fallthrough
CT: control target
= control target key end

     0   :  { %s1450_s15 = smov 0   ;;  %s1452_s16 = smov 0   ;;  %s1641_s0 = inlined_call_operand.vmem [shape: bf16[2,16,16,128], index: 0, kind: input, shape index: {}]   ;;  %s1642_s1 = inlined_call_operand.vmem [shape: bf16[128,128], index: 1, kind: input, shape index: {}]   ;;  %s1643_s2 = inlined_call_operand.vmem [shape: bf16[2,16,16,128], index: 2, kind: output, shape index: {0}]   ;;  %s1644_s3 = inlined_call_operand.vmem [shape: f32[2,1,8,128], index: 3, kind: output, shape index: {1}]   ;;  %s1645_s4 = inlined_call_operand.vmem [shape: f32[2,1,8,128], index: 4, kind: output, shape index: {2}]  }
   0x1   :  { %s1454_s17 = smov 0  }
   0x2 LB: > { %s27_s18 = sadd.s32 1, %s1419_s16  ;;  %p1071_p0 = scmp.ge.s32.totalorder %s1423_s17, 1  ;;  %s1423_s17 = sphi %s1454_s17, %s15_s17   ;;  %s1419_s16 = sphi %s1452_s16, %s1647_s16   ;;  %s1415_s15 = sphi %s1450_s15, %s1646_s15  }
   0x3   : > { %p29_p1 = scmp.ge.s32.totalorder %s27_s18, 2  ;;  %p193_p2 = scmp.lt.s32.totalorder %s1423_s17, 3 }
   0x5   : > { %s1649_s18 = smov (%p29_p1, %s27_s18), 0  ;;  %p194_p3 = pnand %p1071_p0, %p193_p2 }
   0x6   : > { %v1377_v0 = vld [vmem:[%s1642_s1] sm:$0xff] (!%p194_p3)   ;;  %p244_p4 = scmp.lt.s32.totalorder (!%p194_p3), %s1415_s15, 1  ;;  %v1378_v1 = vld [vmem:[%s1642_s1 + $0x8] sm:$0xff] (!%p194_p3)   ;;  %v1379_v2 = vld [vmem:[%s1642_s1 + $0x10] sm:$0xff] (!%p194_p3)  }
   0x7   : > { %197 = sbr.rel (%p194_p3) target bundleno = 319 (0x13f), region = 28  ;;  %1289 = vmatprep.subr.bf16.mxu0 (!%p194_p3), %v1377_v0  ;;  %1337 = vmatprep.subr.bf16.mxu1 (!%p194_p3), %v1377_v0  ;;  %v1380_v3 = vld [vmem:[%s1642_s1 + $0x18] sm:$0xff] (!%p194_p3)   ;;  %v1381_v5 = vld [vmem:[%s1642_s1 + $0x20] sm:$0xff] (!%p194_p3)   ;;  %v1382_v6 = vld [vmem:[%s1642_s1 + $0x28] sm:$0xff] (!%p194_p3)  }
   0x8   : > { %1290 = vmatpush3.bf16.msra.mxu0 (!%p194_p3), %v1377_v0  ;;  %1345 = vmatpush3.bf16.msra.mxu1 (!%p194_p3), %v1377_v0  ;;  %v1383_v8 = vld [vmem:[%s1642_s1 + $0x30] sm:$0xff] (!%p194_p3)   ;;  %v1384_v9 = vld [vmem:[%s1642_s1 + $0x38] sm:$0xff] (!%p194_p3)  }
   0x9   : > { %1291 = vmatprep.subr.bf16.mxu0 (!%p194_p3), %v1378_v1  ;;  %1338 = vmatprep.subr.bf16.mxu1 (!%p194_p3), %v1378_v1 }
   0xc   : > { %1292 = vmatpush3.bf16.msra.mxu0 (!%p194_p3), %v1378_v1  ;;  %1346 = vmatpush3.bf16.msra.mxu1 (!%p194_p3), %v1378_v1 }
   0xd   : > { %1293 = vmatprep.subr.bf16.mxu0 (!%p194_p3), %v1379_v2  ;;  %1339 = vmatprep.subr.bf16.mxu1 (!%p194_p3), %v1379_v2 }
   0xe   : > { %s1651_s15 = smov (!%p244_p4, %s1415_s15), 1 }
   0xf   : > { %s1136_s25 = sshll.u32 %s1651_s15, 7  ;;  %s1076_s20 = sshll.u32 %s1651_s15, 3 }
  0x10   : > { %s1485_s28 = scalar_lea.vmem %s1641_s0, %s1136_s25  ;;  %1294 = vmatpush3.bf16.msra.mxu0 %v1379_v2  ;;  %1347 = vmatpush3.bf16.msra.mxu1 %v1379_v2  ;;  %s1527_s19 = scalar_lea.vmem %s1643_s2, %s1136_s25 }
  0x11   : > { %v1385_v4 = vld [vmem:[%s1485_s28] sm:$0xff]   ;;  %1295 = vmatprep.subr.bf16.mxu0 %v1380_v3  ;;  %1340 = vmatprep.subr.bf16.mxu1 %v1380_v3  ;;  %v1386_v10 = vld [vmem:[%s1485_s28 + $0x8] sm:$0xff]   ;;  %v1387_v12 = vld [vmem:[%s1485_s28 + $0x10] sm:$0xff]   ;;  %s271_s23 = scalar_lea.vmem %s1644_s3, %s1076_s20  ;;  %s278_s25 = scalar_lea.vmem %s1645_s4, %s1076_s20 }
  0x12   : > { %1305 = vmatprep.mubr.bf16.mxu0 %v1385_v4  ;;  %v1393_v7 = vld [vmem:[%s1485_s28 + $0x40] sm:$0xff]   ;;  %v1394_v11 = vld [vmem:[%s1485_s28 + $0x48] sm:$0xff]   ;;  %v1395_v13 = vld [vmem:[%s1485_s28 + $0x50] sm:$0xff]  }
  0x13   : > { %1321 = vmatprep.mubr.bf16.mxu1 %v1393_v7  ;;  %v1388_v14 = vld [vmem:[%s1485_s28 + $0x18] sm:$0xff]   ;;  %v1389_v16 = vld [vmem:[%s1485_s28 + $0x20] sm:$0xff]   ;;  %v1390_v18 = vld [vmem:[%s1485_s28 + $0x28] sm:$0xff]  }
  0x14   : > { %1296 = vmatpush3.bf16.msra.mxu0 %v1380_v3  ;;  %1348 = vmatpush3.bf16.msra.mxu1 %v1380_v3  ;;  %v1396_v15 = vld [vmem:[%s1485_s28 + $0x58] sm:$0xff]   ;;  %v1397_v17 = vld [vmem:[%s1485_s28 + $0x60] sm:$0xff]   ;;  %v1398_v19 = vld [vmem:[%s1485_s28 + $0x68] sm:$0xff]  }
  0x15   : > { %1297 = vmatprep.subr.bf16.mxu0 %v1381_v5  ;;  %1341 = vmatprep.subr.bf16.mxu1 %v1381_v5  ;;  %v1391_v20 = vld [vmem:[%s1485_s28 + $0x30] sm:$0xff]   ;;  %v1392_v22 = vld [vmem:[%s1485_s28 + $0x38] sm:$0xff]  }
  0x16   : > { %v1399_v21 = vld [vmem:[%s1485_s28 + $0x70] sm:$0xff]   ;;  %v1400_v23 = vld [vmem:[%s1485_s28 + $0x78] sm:$0xff]  }
  0x18   : > { %1298 = vmatpush3.bf16.msra.mxu0 %v1381_v5  ;;  %1349 = vmatpush3.bf16.msra.mxu1 %v1381_v5 }
  0x19   : > { %1299 = vmatprep.subr.bf16.mxu0 %v1382_v6  ;;  %1342 = vmatprep.subr.bf16.mxu1 %v1382_v6 }
  0x1c   : > { %1300 = vmatpush3.bf16.msra.mxu0 %v1382_v6  ;;  %1350 = vmatpush3.bf16.msra.mxu1 %v1382_v6 }
  0x1d   : > { %1301 = vmatprep.subr.bf16.mxu0 %v1383_v8  ;;  %1343 = vmatprep.subr.bf16.mxu1 %v1383_v8 }
  0x20   : > { %1302 = vmatpush3.bf16.msra.mxu0 %v1383_v8  ;;  %1351 = vmatpush3.bf16.msra.mxu1 %v1383_v8 }
  0x21   : > { %1303 = vmatprep.subr.bf16.mxu0 %v1384_v9  ;;  %1344 = vmatprep.subr.bf16.mxu1 %v1384_v9 }
  0x24   : > { %1304 = vmatpush3.bf16.msra.mxu0 %v1384_v9  ;;  %1352 = vmatpush3.bf16.msra.mxu1 %v1384_v9 }
  0x27   : > { %1306 = vmatmul.mubr.bf16.vlgmr.msra.gmra.mrb[0].mxu0 %v1386_v10  ;;  %1322 = vmatmul.mubr.bf16.vlgmr.msra.gmra.mrb[0].mxu1 %v1394_v11 }
  0x28   : > { %1309 = vmatprep.mubr.bf16.mxu0 %v1387_v12  ;;  %1325 = vmatprep.mubr.bf16.mxu1 %v1395_v13 }
  0x2f   : > { %1310 = vmatmul.mubr.bf16.gmra.mrb[4].mxu0 %v1388_v14  ;;  %1326 = vmatmul.mubr.bf16.gmra.mrb[4].mxu1 %v1396_v15 }
  0x30   : > { %1313 = vmatprep.mubr.bf16.mxu0 %v1389_v16  ;;  %1329 = vmatprep.mubr.bf16.mxu1 %v1397_v17 }
  0x37   : > { %1314 = vmatmul.mubr.bf16.gmra.mrb[8].mxu0 %v1390_v18  ;;  %1330 = vmatmul.mubr.bf16.gmra.mrb[8].mxu1 %v1398_v19 }
  0x38   : > { %1317 = vmatprep.mubr.bf16.mxu0 %v1391_v20  ;;  %1333 = vmatprep.mubr.bf16.mxu1 %v1399_v21 }
  0x3f   : > { %1318 = vmatmul.mubr.bf16.gmra.mrb[12].mxu0 %v1392_v22  ;;  %1334 = vmatmul.mubr.bf16.gmra.mrb[12].mxu1 %v1400_v23 }
  0xfa   : > { %v1307_v24 = vpop.f32.mrb[0].mxu0  ;;  %v1518_v25 = vpop.f32.mrb[0].mxu1 }
  0xfb   : > { %v506_v26 = vpop.f32.mrb[1].mxu0  ;;  %v1520_v27 = vpop.f32.mrb[1].mxu1  ;;  %v666_v39 = vmul.f32 %v1307_v24, %v1307_v24 }
  0xfc   : > { %v1308_v28 = vpop.f32.mrb[2].mxu0  ;;  %v1529_v29 = vpop.f32.mrb[2].mxu1  ;;  %v664_v34 = vmul.f32 %v506_v26, %v506_v26 }
  0xfd   : > { %v1178_v30 = vpack.c.bf16 %v1308_v28, %v1307_v24  ;;  %v509_v31 = vpop.f32.mrb[3].mxu0  ;;  %v1218_v32 = vpack.c.bf16 %v1529_v29, %v1518_v25  ;;  %v1533_v33 = vpop.f32.mrb[3].mxu1  ;;  %v667_v42 = vmul.f32 %v1308_v28, %v1308_v28 }
  0xfe   : > { %v633_v35 = vadd.f32 %v509_v31, %v506_v26  ;;  %v665_v36 = vmul.f32 %v509_v31, %v509_v31  ;;  %v1173_v37 = vpack.c.bf16 %v509_v31, %v506_v26  ;;  %v1213_v38 = vpack.c.bf16 %v1533_v33, %v1520_v27 }
  0xff   : > { %1250 = vst [vmem:[%s1527_s19 + $0x8] sm:$0xff] %v1178_v30   ;;  %1258 = vst [vmem:[%s1527_s19 + $0x48] sm:$0xff] %v1218_v32  }
 0x100   : > { %v634_v40 = vadd.f32 %v1307_v24, %v633_v35  ;;  %v696_v41 = vadd.f32 %v665_v36, %v664_v34  ;;  %1174 = vst [vmem:[%s1527_s19] sm:$0xff] %v1173_v37   ;;  %1257 = vst [vmem:[%s1527_s19 + $0x40] sm:$0xff] %v1213_v38  }
 0x102   : > { %v697_v43 = vadd.f32 %v696_v41, %v666_v39  ;;  %v1311_v44 = vpop.f32.mrb[4].mxu0  ;;  %v635_v45 = vadd.f32 %v1308_v28, %v634_v40  ;;  %v1541_v46 = vpop.f32.mrb[4].mxu1 }
 0x103   : > { %v522_v47 = vpop.f32.mrb[5].mxu0  ;;  %v1543_v48 = vpop.f32.mrb[5].mxu1  ;;  %v670_v63 = vmul.f32 %v1311_v44, %v1311_v44 }
 0x104   : > { %v636_v49 = vadd.f32 %v635_v45, %v522_v47  ;;  %v668_v50 = vmul.f32 %v522_v47, %v522_v47  ;;  %v698_v51 = vadd.f32 %v697_v43, %v667_v42  ;;  %v1312_v52 = vpop.f32.mrb[6].mxu0  ;;  %v1545_v53 = vpop.f32.mrb[6].mxu1 }
 0x105   : > { %v1188_v54 = vpack.c.bf16 %v1312_v52, %v1311_v44  ;;  %v525_v55 = vpop.f32.mrb[7].mxu0  ;;  %v1228_v56 = vpack.c.bf16 %v1545_v53, %v1541_v46  ;;  %v1549_v57 = vpop.f32.mrb[7].mxu1  ;;  %v671_v2 = vmul.f32 %v1312_v52, %v1312_v52 }
 0x106   : > { %v699_v58 = vadd.f32 %v698_v51, %v668_v50  ;;  %v637_v59 = vadd.f32 %v636_v49, %v525_v55  ;;  %v669_v60 = vmul.f32 %v525_v55, %v525_v55  ;;  %v1183_v61 = vpack.c.bf16 %v525_v55, %v522_v47 }
 0x107   : > { %1252 = vst [vmem:[%s1527_s19 + $0x18] sm:$0xff] %v1188_v54   ;;  %1260 = vst [vmem:[%s1527_s19 + $0x58] sm:$0xff] %v1228_v56   ;;  %v1223_v62 = vpack.c.bf16 %v1549_v57, %v1543_v48 }
 0x108   : > { %v638_v0 = vadd.f32 %v1311_v44, %v637_v59  ;;  %v700_v1 = vadd.f32 %v699_v58, %v669_v60  ;;  %1251 = vst [vmem:[%s1527_s19 + $0x10] sm:$0xff] %v1183_v61   ;;  %v680_v61 = vmul.f32 %v1520_v27, %v1520_v27 }
 0x109   : > { %1259 = vst [vmem:[%s1527_s19 + $0x50] sm:$0xff] %v1223_v62  }
 0x10a   : > { %v701_v3 = vadd.f32 %v700_v1, %v670_v63  ;;  %v1315_v4 = vpop.f32.mrb[8].mxu0  ;;  %v639_v5 = vadd.f32 %v1312_v52, %v638_v0  ;;  %v1557_v6 = vpop.f32.mrb[8].mxu1 }
 0x10b   : > { %v538_v7 = vpop.f32.mrb[9].mxu0  ;;  %v1559_v8 = vpop.f32.mrb[9].mxu1  ;;  %v674_v23 = vmul.f32 %v1315_v4, %v1315_v4 }
 0x10c   : > { %v640_v9 = vadd.f32 %v639_v5, %v538_v7  ;;  %v672_v10 = vmul.f32 %v538_v7, %v538_v7  ;;  %v702_v11 = vadd.f32 %v701_v3, %v671_v2  ;;  %v1316_v12 = vpop.f32.mrb[10].mxu0  ;;  %v1561_v13 = vpop.f32.mrb[10].mxu1  ;;  %v681_v2 = vmul.f32 %v1533_v33, %v1533_v33 }
 0x10d   : > { %v1198_v14 = vpack.c.bf16 %v1316_v12, %v1315_v4  ;;  %v541_v15 = vpop.f32.mrb[11].mxu0  ;;  %v1238_v16 = vpack.c.bf16 %v1561_v13, %v1557_v6  ;;  %v1565_v17 = vpop.f32.mrb[11].mxu1  ;;  %v675_v28 = vmul.f32 %v1316_v12, %v1316_v12  ;;  %v682_v3 = vmul.f32 %v1518_v25, %v1518_v25 }
 0x10e   : > { %v703_v18 = vadd.f32 %v702_v11, %v672_v10  ;;  %v641_v19 = vadd.f32 %v640_v9, %v541_v15  ;;  %v673_v20 = vmul.f32 %v541_v15, %v541_v15  ;;  %v1193_v21 = vpack.c.bf16 %v541_v15, %v538_v7 }
 0x10f   : > { %1254 = vst [vmem:[%s1527_s19 + $0x28] sm:$0xff] %v1198_v14   ;;  %1262 = vst [vmem:[%s1527_s19 + $0x68] sm:$0xff] %v1238_v16   ;;  %v1233_v22 = vpack.c.bf16 %v1565_v17, %v1559_v8  ;;  %v683_v7 = vmul.f32 %v1529_v29, %v1529_v29  ;;  %v685_v15 = vmul.f32 %v1549_v57, %v1549_v57 }
 0x110   : > { %v642_v24 = vadd.f32 %v1315_v4, %v641_v19  ;;  %v704_v26 = vadd.f32 %v703_v18, %v673_v20  ;;  %1253 = vst [vmem:[%s1527_s19 + $0x20] sm:$0xff] %v1193_v21  }
 0x111   : > { %1261 = vst [vmem:[%s1527_s19 + $0x60] sm:$0xff] %v1233_v22  }
 0x112   : > { %v705_v30 = vadd.f32 %v704_v26, %v674_v23  ;;  %v1319_v31 = vpop.f32.mrb[12].mxu0  ;;  %v643_v32 = vadd.f32 %v1316_v12, %v642_v24  ;;  %v1573_v34 = vpop.f32.mrb[12].mxu1  ;;  %v690_v24 = vmul.f32 %v1557_v6, %v1557_v6 }
 0x113   : > { %v554_v35 = vpop.f32.mrb[13].mxu0  ;;  %v618_v36 = vpop.f32.mrb[13].mxu1  ;;  %v678_v54 = vmul.f32 %v1319_v31, %v1319_v31 }
 0x114   : > { %v644_v37 = vadd.f32 %v643_v32, %v554_v35  ;;  %v676_v38 = vmul.f32 %v554_v35, %v554_v35  ;;  %v706_v39 = vadd.f32 %v705_v30, %v675_v28  ;;  %v1320_v40 = vpop.f32.mrb[14].mxu0  ;;  %v1575_v41 = vpop.f32.mrb[14].mxu1 }
 0x115   : > { %v1208_v42 = vpack.c.bf16 %v1320_v40, %v1319_v31  ;;  %v557_v43 = vpop.f32.mrb[15].mxu0  ;;  %v1248_v44 = vpack.c.bf16 %v1575_v41, %v1573_v34  ;;  %v621_v45 = vpop.f32.mrb[15].mxu1  ;;  %v679_v58 = vmul.f32 %v1320_v40, %v1320_v40 }
 0x116   : > { %v707_v47 = vadd.f32 %v706_v39, %v676_v38  ;;  %v645_v49 = vadd.f32 %v644_v37, %v557_v43  ;;  %v677_v50 = vmul.f32 %v557_v43, %v557_v43  ;;  %v1203_v51 = vpack.c.bf16 %v557_v43, %v554_v35 }
 0x117   : > { %1256 = vst [vmem:[%s1527_s19 + $0x38] sm:$0xff] %v1208_v42   ;;  %1264 = vst [vmem:[%s1527_s19 + $0x78] sm:$0xff] %v1248_v44   ;;  %v1243_v52 = vpack.c.bf16 %v621_v45, %v618_v36  ;;  %v693_v39 = vmul.f32 %v621_v45, %v621_v45 }
 0x118   : > { %v646_v55 = vadd.f32 %v1319_v31, %v645_v49  ;;  %v708_v56 = vadd.f32 %v707_v47, %v677_v50  ;;  %1255 = vst [vmem:[%s1527_s19 + $0x30] sm:$0xff] %v1203_v51  }
 0x119   : > { %1263 = vst [vmem:[%s1527_s19 + $0x70] sm:$0xff] %v1243_v52  }
 0x11a   : > { %v709_v59 = vadd.f32 %v708_v56, %v678_v54  ;;  %v647_v60 = vadd.f32 %v1320_v40, %v646_v55 }
 0x11c   : > { %v648_v62 = vadd.f32 %v647_v60, %v1520_v27  ;;  %v710_v63 = vadd.f32 %v709_v59, %v679_v58  ;;  %v684_v27 = vmul.f32 %v1543_v48, %v1543_v48 }
 0x11e   : > { %v711_v0 = vadd.f32 %v710_v63, %v680_v61  ;;  %v649_v1 = vadd.f32 %v648_v62, %v1533_v33 }
 0x120   : > { %v650_v4 = vadd.f32 %v1518_v25, %v649_v1  ;;  %v712_v5 = vadd.f32 %v711_v0, %v681_v2  ;;  %v686_v25 = vmul.f32 %v1541_v46, %v1541_v46 }
 0x122   : > { %v713_v9 = vadd.f32 %v712_v5, %v682_v3  ;;  %v651_v10 = vadd.f32 %v1529_v29, %v650_v4  ;;  %v687_v29 = vmul.f32 %v1545_v53, %v1545_v53 }
 0x124   : > { %v652_v11 = vadd.f32 %v651_v10, %v1543_v48  ;;  %v714_v12 = vadd.f32 %v713_v9, %v683_v7  ;;  %v688_v48 = vmul.f32 %v1559_v8, %v1559_v8 }
 0x126   : > { %v715_v14 = vadd.f32 %v714_v12, %v684_v27  ;;  %v653_v33 = vadd.f32 %v652_v11, %v1549_v57 }
 0x128   : > { %v654_v16 = vadd.f32 %v1541_v46, %v653_v33  ;;  %v716_v18 = vadd.f32 %v715_v14, %v685_v15  ;;  %v689_v46 = vmul.f32 %v1565_v17, %v1565_v17 }
 0x12a   : > { %v717_v19 = vadd.f32 %v716_v18, %v686_v25  ;;  %v655_v20 = vadd.f32 %v1545_v53, %v654_v16  ;;  %v691_v53 = vmul.f32 %v1561_v13, %v1561_v13 }
 0x12c   : > { %v656_v21 = vadd.f32 %v655_v20, %v1559_v8  ;;  %v718_v22 = vadd.f32 %v717_v19, %v687_v29  ;;  %v692_v8 = vmul.f32 %v618_v36, %v618_v36 }
 0x12e   : > { %v719_v57 = vadd.f32 %v718_v22, %v688_v48  ;;  %v657_v23 = vadd.f32 %v656_v21, %v1565_v17  ;;  %v694_v17 = vmul.f32 %v1573_v34, %v1573_v34 }
 0x130   : > { %v658_v26 = vadd.f32 %v1557_v6, %v657_v23  ;;  %v720_v28 = vadd.f32 %v719_v57, %v689_v46 }
 0x132   : > { %v721_v30 = vadd.f32 %v720_v28, %v690_v24  ;;  %v659_v31 = vadd.f32 %v1561_v13, %v658_v26  ;;  %v695_v13 = vmul.f32 %v1575_v41, %v1575_v41 }
 0x134   : > { %v660_v32 = vadd.f32 %v659_v31, %v618_v36  ;;  %v722_v35 = vadd.f32 %v721_v30, %v691_v53 }
 0x136   : > { %v723_v37 = vadd.f32 %v722_v35, %v692_v8  ;;  %v661_v38 = vadd.f32 %v660_v32, %v621_v45 }
 0x138   : > { %v662_v40 = vadd.f32 %v1573_v34, %v661_v38  ;;  %v724_v6 = vadd.f32 %v723_v37, %v693_v39 }
 0x13a   : > { %v663_v36 = vadd.f32 %v1575_v41, %v662_v40  ;;  %v725_v42 = vadd.f32 %v724_v6, %v694_v17 }
 0x13c   : > { %v726_v43 = vadd.f32 %v725_v42, %v695_v13  ;;  %727 = vst [vmem:[%s271_s23] sm:$0xff] %v663_v36 }
 0x13e   : > { %728 = vst [vmem:[%s278_s25] sm:$0xff] %v726_v43 }
 0x13f PF: > { %s15_s17 = sadd.s32 1, %s1423_s17   ;;  %s1646_s15 = smov %s1419_s16 }
 0x140   : > { %p12_p5 = scmp.ge.s32.totalorder %s15_s17, 4   ;;  %s1647_s16 = smov %s1649_s18 }
 0x142   :  { %14 = sbr.rel (!%p12_p5) target bundleno = 2 (0x2), region = 82 }

// kernel: bottleneck_forward.6
= control target key start
LH: loop header
LB: loop body
LE: loop exit
PB: predicated region body
PF: predicated region fallthrough
CT: control target
= control target key end

     0   :  { %s1625_s21 = smov 0   ;;  %s1627_s22 = smov 0   ;;  %s1908_s0 = inlined_call_operand.vmem [shape: bf16[2,16,16,128], index: 0, kind: input, shape index: {}]   ;;  %s1909_s1 = inlined_call_operand.vmem [shape: f32[1,128], index: 1, kind: input, shape index: {}]   ;;  %s1910_s2 = inlined_call_operand.vmem [shape: f32[1,128], index: 2, kind: input, shape index: {}]   ;;  %s1911_s3 = inlined_call_operand.vmem [shape: bf16[128,128], index: 3, kind: input, shape index: {}]   ;;  %s1912_s4 = inlined_call_operand.vmem [shape: bf16[2,16,16,128], index: 4, kind: output, shape index: {0}]   ;;  %s1913_s5 = inlined_call_operand.vmem [shape: f32[2,1,8,128], index: 5, kind: output, shape index: {1}]   ;;  %s1914_s6 = inlined_call_operand.vmem [shape: f32[2,1,8,128], index: 6, kind: output, shape index: {2}]  }
   0x1   :  { %s1629_s23 = smov 0  }
   0x2 LB: > { %s29_s24 = sadd.s32 1, %s1584_s22  ;;  %p1187_p0 = scmp.ge.s32.totalorder %s1588_s23, 1  ;;  %s1588_s23 = sphi %s1629_s23, %s17_s23   ;;  %s1584_s22 = sphi %s1627_s22, %s1916_s22   ;;  %s1580_s21 = sphi %s1625_s21, %s1915_s21  }
   0x3   : > { %p31_p1 = scmp.ge.s32.totalorder %s29_s24, 2  ;;  %p243_p2 = scmp.lt.s32.totalorder %s1588_s23, 3 }
   0x5   : > { %s1918_s24 = smov (%p31_p1, %s29_s24), 0  ;;  %p244_p3 = pnand %p1187_p0, %p243_p2 }
   0x6   : > { %v1558_v0 = vld [vmem:[%s1911_s3] sm:$0xff] (!%p244_p3)   ;;  %p298_p4 = scmp.lt.s32.totalorder (!%p244_p3), %s1580_s21, 1  ;;  %v1559_v1 = vld [vmem:[%s1911_s3 + $0x8] sm:$0xff] (!%p244_p3)   ;;  %v1560_v2 = vld [vmem:[%s1911_s3 + $0x10] sm:$0xff] (!%p244_p3)  }
   0x7   : > { %247 = sbr.rel (%p244_p3) target bundleno = 319 (0x13f), region = 36  ;;  %1470 = vmatprep.subr.bf16.mxu0 (!%p244_p3), %v1558_v0  ;;  %1518 = vmatprep.subr.bf16.mxu1 (!%p244_p3), %v1558_v0  ;;  %v1561_v3 = vld [vmem:[%s1911_s3 + $0x18] sm:$0xff] (!%p244_p3)   ;;  %v1669_v5 = vld [vmem:[%s1909_s1] ss:$0 sm:$0xff] (!%p244_p3)  ;;  %v1563_v34 = vld [vmem:[%s1911_s3 + $0x28] sm:$0xff] (!%p244_p3)  }
   0x8   : > { %1471 = vmatpush3.bf16.msra.mxu0 (!%p244_p3), %v1558_v0  ;;  %1526 = vmatpush3.bf16.msra.mxu1 (!%p244_p3), %v1558_v0  ;;  %v1677_v11 = vld [vmem:[%s1910_s2] ss:$0 sm:$0xff] (!%p244_p3)  ;;  %v1564_v49 = vld [vmem:[%s1911_s3 + $0x30] sm:$0xff] (!%p244_p3)   ;;  %v1565_v63 = vld [vmem:[%s1911_s3 + $0x38] sm:$0xff] (!%p244_p3)  }
   0x9   : > { %1472 = vmatprep.subr.bf16.mxu0 (!%p244_p3), %v1559_v1  ;;  %1519 = vmatprep.subr.bf16.mxu1 (!%p244_p3), %v1559_v1  ;;  %v1562_v20 = vld [vmem:[%s1911_s3 + $0x20] sm:$0xff] (!%p244_p3)  }
   0xc   : > { %1473 = vmatpush3.bf16.msra.mxu0 (!%p244_p3), %v1559_v1  ;;  %1527 = vmatpush3.bf16.msra.mxu1 (!%p244_p3), %v1559_v1 }
   0xd   : > { %1474 = vmatprep.subr.bf16.mxu0 (!%p244_p3), %v1560_v2  ;;  %1520 = vmatprep.subr.bf16.mxu1 (!%p244_p3), %v1560_v2 }
   0xe   : > { %s1920_s21 = smov (!%p298_p4, %s1580_s21), 1 }
   0xf   : > { %s1238_s7 = sshll.u32 %s1920_s21, 7 }
  0x10   : > { %s1660_s10 = scalar_lea.vmem %s1908_s0, %s1238_s7  ;;  %1475 = vmatpush3.bf16.msra.mxu0 %v1560_v2  ;;  %1528 = vmatpush3.bf16.msra.mxu1 %v1560_v2  ;;  %s1802_s8 = scalar_lea.vmem %s1912_s4, %s1238_s7 }
  0x11   : > { %v1273_v4 = vld [vmem:[%s1660_s10] sm:$0xff]   ;;  %v1416_v8 = vld [vmem:[%s1660_s10 + $0x8] sm:$0xff]   ;;  %v1417_v9 = vld [vmem:[%s1660_s10 + $0x10] sm:$0xff]   ;;  %1476 = vmatprep.subr.bf16.mxu0 %v1561_v3  ;;  %1521 = vmatprep.subr.bf16.mxu1 %v1561_v3  ;;  %s1192_s7 = sshll.u32 %s1920_s21, 3 }
  0x12   : > { %v1274_v6 = vunpack.c.l.bf16 %v1273_v4  ;;  %v1275_v7 = vunpack.c.h.bf16 %v1273_v4  ;;  %v1418_v10 = vld [vmem:[%s1660_s10 + $0x18] sm:$0xff]   ;;  %v1278_v12 = vunpack.c.l.bf16 %v1416_v8  ;;  %v1279_v13 = vunpack.c.h.bf16 %v1416_v8  ;;  %v1419_v29 = vld [vmem:[%s1660_s10 + $0x20] sm:$0xff]   ;;  %v1420_v33 = vld [vmem:[%s1660_s10 + $0x28] sm:$0xff]   ;;  %s325_s11 = scalar_lea.vmem %s1913_s5, %s1192_s7  ;;  %s332_s14 = scalar_lea.vmem %s1914_s6, %s1192_s7 }
  0x13   : > { %v1282_v14 = vunpack.c.l.bf16 %v1417_v9  ;;  %v1283_v15 = vunpack.c.h.bf16 %v1417_v9  ;;  %v1286_v18 = vunpack.c.l.bf16 %v1418_v10  ;;  %v1287_v19 = vunpack.c.h.bf16 %v1418_v10  ;;  %v1421_v42 = vld [vmem:[%s1660_s10 + $0x30] sm:$0xff]   ;;  %v1706_v48 = vld [vmem:[%s1660_s10 + $0x38] sm:$0xff]   ;;  %v1423_v60 = vld [vmem:[%s1660_s10 + $0x40] sm:$0xff]  }
  0x14   : > { %v405_v16 = vmul.f32 %v1274_v6, %v1669_v5  ;;  %v406_v17 = vmul.f32 %v1275_v7, %v1669_v5  ;;  %v407_v21 = vmul.f32 %v1278_v12, %v1669_v5  ;;  %v408_v22 = vmul.f32 %v1279_v13, %v1669_v5  ;;  %1477 = vmatpush3.bf16.msra.mxu0 %v1561_v3  ;;  %v1425_v9 = vld [vmem:[%s1660_s10 + $0x50] sm:$0xff]  }
  0x15   : > { %v409_v23 = vmul.f32 %v1282_v14, %v1669_v5  ;;  %v410_v24 = vmul.f32 %v1283_v15, %v1669_v5  ;;  %v411_v27 = vmul.f32 %v1286_v18, %v1669_v5  ;;  %v412_v28 = vmul.f32 %v1287_v19, %v1669_v5  ;;  %1529 = vmatpush3.bf16.msra.mxu1 %v1561_v3  ;;  %v1424_v3 = vld [vmem:[%s1660_s10 + $0x48] sm:$0xff]   ;;  %v1426_v19 = vld [vmem:[%s1660_s10 + $0x58] sm:$0xff]  }
  0x16   : > { %v444_v25 = vadd.f32 %v1677_v11, %v405_v16  ;;  %v445_v26 = vadd.f32 %v1677_v11, %v406_v17  ;;  %v446_v32 = vadd.f32 %v1677_v11, %v407_v21  ;;  %1478 = vmatprep.subr.bf16.mxu0 %v1562_v20  ;;  %v447_v35 = vadd.f32 %v1677_v11, %v408_v22 }
  0x17   : > { %v448_v36 = vadd.f32 %v1677_v11, %v409_v23  ;;  %v449_v37 = vadd.f32 %v1677_v11, %v410_v24  ;;  %1522 = vmatprep.subr.bf16.mxu1 %v1562_v20  ;;  %v450_v39 = vadd.f32 %v1677_v11, %v411_v27  ;;  %v451_v40 = vadd.f32 %v1677_v11, %v412_v28 }
  0x18   : > { %v476_v30 = vmax.f32 %v444_v25, 0.0  ;;  %v477_v31 = vmax.f32 %v445_v26, 0.0  ;;  %v1290_v41 = vunpack.c.l.bf16 %v1419_v29  ;;  %v1291_v43 = vunpack.c.h.bf16 %v1419_v29  ;;  %1479 = vmatpush3.bf16.msra.mxu0 %v1562_v20 }
  0x19   : > { %v1294_v44 = vunpack.c.l.bf16 %v1420_v33  ;;  %v478_v45 = vmax.f32 %v446_v32, 0.0  ;;  %v1295_v47 = vunpack.c.h.bf16 %v1420_v33  ;;  %1480 = vmatprep.subr.bf16.mxu0 %v1563_v34  ;;  %v479_v50 = vmax.f32 %v447_v35, 0.0  ;;  %1530 = vmatpush3.bf16.msra.mxu1 %v1562_v20  ;;  %v1427_v32 = vld [vmem:[%s1660_s10 + $0x60] sm:$0xff]  }
  0x1a   : > { %v508_v38 = vpack.c.bf16 %v477_v31, %v476_v30  ;;  %v413_v46 = vmul.f32 %v1290_v41, %v1669_v5  ;;  %v480_v51 = vmax.f32 %v448_v36, 0.0  ;;  %v481_v52 = vmax.f32 %v449_v37, 0.0  ;;  %1523 = vmatprep.subr.bf16.mxu1 %v1563_v34 }
  0x1b   : > { %v1298_v53 = vunpack.c.l.bf16 %v1421_v42  ;;  %v482_v54 = vmax.f32 %v450_v39, 0.0  ;;  %v483_v55 = vmax.f32 %v451_v40, 0.0  ;;  %v414_v56 = vmul.f32 %v1291_v43, %v1669_v5 }
  0x1c   : > { %1486 = vmatprep.mubr.bf16.mxu0 %v508_v38  ;;  %v415_v57 = vmul.f32 %v1294_v44, %v1669_v5  ;;  %v1299_v58 = vunpack.c.h.bf16 %v1421_v42  ;;  %v1302_v59 = vunpack.c.l.bf16 %v1706_v48  ;;  %1481 = vmatpush3.bf16.msra.mxu0 %v1563_v34  ;;  %v1716_v61 = vadd.f32 %v1677_v11, %v413_v46 }
  0x1d   : > { %v416_v62 = vmul.f32 %v1295_v47, %v1669_v5  ;;  %1482 = vmatprep.subr.bf16.mxu0 %v1564_v49  ;;  %v509_v0 = vpack.c.bf16 %v479_v50, %v478_v45  ;;  %v510_v1 = vpack.c.bf16 %v481_v52, %v480_v51  ;;  %1531 = vmatpush3.bf16.msra.mxu1 %v1563_v34  ;;  %v1303_v7 = vunpack.c.h.bf16 %v1706_v48  ;;  %v1428_v45 = vld [vmem:[%s1660_s10 + $0x68] sm:$0xff]  }
  0x1e   : > { %v417_v2 = vmul.f32 %v1298_v53, %v1669_v5  ;;  %v1724_v4 = vpack.c.bf16 %v483_v55, %v482_v54  ;;  %v1727_v6 = vadd.f32 %v1677_v11, %v414_v56  ;;  %1524 = vmatprep.subr.bf16.mxu1 %v1564_v49  ;;  %v1306_v8 = vunpack.c.l.bf16 %v1423_v60  ;;  %v1429_v55 = vld [vmem:[%s1660_s10 + $0x70] sm:$0xff]  }
  0x1f   : > { %v1732_v10 = vadd.f32 %v1677_v11, %v415_v57  ;;  %v1735_v12 = vmul.f32 %v1299_v58, %v1669_v5  ;;  %v1738_v13 = vmul.f32 %v1302_v59, %v1669_v5  ;;  %v1307_v14 = vunpack.c.h.bf16 %v1423_v60 }
  0x20   : > { %1483 = vmatpush3.bf16.msra.mxu0 %v1564_v49  ;;  %v484_v15 = vmax.f32 %v1716_v61, 0.0  ;;  %v1742_v16 = vadd.f32 %v1677_v11, %v416_v62  ;;  %v421_v17 = vmul.f32 %v1306_v8, %v1669_v5  ;;  %v1310_v18 = vunpack.c.l.bf16 %v1424_v3 }
  0x21   : > { %1484 = vmatprep.subr.bf16.mxu0 %v1565_v63  ;;  %1532 = vmatpush3.bf16.msra.mxu1 %v1564_v49  ;;  %v1747_v20 = vadd.f32 %v1677_v11, %v417_v2  ;;  %v422_v21 = vmul.f32 %v1307_v14, %v1669_v5  ;;  %v1311_v22 = vunpack.c.h.bf16 %v1424_v3  ;;  %v1314_v23 = vunpack.c.l.bf16 %v1425_v9 }
  0x22   : > { %v485_v24 = vmax.f32 %v1727_v6, 0.0  ;;  %1525 = vmatprep.subr.bf16.mxu1 %v1565_v63  ;;  %v460_v25 = vadd.f32 %v1677_v11, %v421_v17  ;;  %v423_v26 = vmul.f32 %v1310_v18, %v1669_v5  ;;  %v1315_v27 = vunpack.c.h.bf16 %v1425_v9  ;;  %v1430_v17 = vld [vmem:[%s1660_s10 + $0x78] sm:$0xff]  }
  0x23   : > { %v461_v28 = vadd.f32 %v1677_v11, %v422_v21  ;;  %v424_v29 = vmul.f32 %v1311_v22, %v1669_v5  ;;  %v425_v30 = vmul.f32 %v1314_v23, %v1669_v5  ;;  %v1318_v31 = vunpack.c.l.bf16 %v1426_v19 }
  0x24   : > { %1485 = vmatpush3.bf16.msra.mxu0 %v1565_v63  ;;  %v492_v33 = vmax.f32 %v460_v25, 0.0  ;;  %v462_v34 = vadd.f32 %v1677_v11, %v423_v26  ;;  %v426_v35 = vmul.f32 %v1315_v27, %v1669_v5  ;;  %v1319_v36 = vunpack.c.h.bf16 %v1426_v19 }
  0x25   : > { %1533 = vmatpush3.bf16.msra.mxu1 %v1565_v63  ;;  %v493_v37 = vmax.f32 %v461_v28, 0.0  ;;  %v463_v38 = vadd.f32 %v1677_v11, %v424_v29  ;;  %v464_v39 = vadd.f32 %v1677_v11, %v425_v30  ;;  %v427_v40 = vmul.f32 %v1318_v31, %v1669_v5 }
  0x26   : > { %v494_v41 = vmax.f32 %v462_v34, 0.0  ;;  %v465_v42 = vadd.f32 %v1677_v11, %v426_v35  ;;  %v428_v43 = vmul.f32 %v1319_v36, %v1669_v5  ;;  %v1322_v44 = vunpack.c.l.bf16 %v1427_v32 }
  0x27   : > { %1487 = vmatmul.mubr.bf16.vlgmr.msra.gmra.mrb[0].mxu0 %v509_v0  ;;  %v516_v46 = vpack.c.bf16 %v493_v37, %v492_v33  ;;  %v495_v47 = vmax.f32 %v463_v38, 0.0  ;;  %v496_v49 = vmax.f32 %v464_v39, 0.0  ;;  %v466_v50 = vadd.f32 %v1677_v11, %v427_v40 }
  0x28   : > { %1490 = vmatprep.mubr.bf16.mxu0 %v510_v1  ;;  %v497_v51 = vmax.f32 %v465_v42, 0.0  ;;  %v467_v52 = vadd.f32 %v1677_v11, %v428_v43  ;;  %v1323_v53 = vunpack.c.h.bf16 %v1427_v32  ;;  %v429_v54 = vmul.f32 %v1322_v44, %v1669_v5 }
  0x29   : > { %1502 = vmatprep.mubr.bf16.mxu1 %v516_v46  ;;  %v517_v56 = vpack.c.bf16 %v495_v47, %v494_v41  ;;  %v498_v57 = vmax.f32 %v466_v50, 0.0  ;;  %v1326_v58 = vunpack.c.l.bf16 %v1428_v45  ;;  %v1327_v59 = vunpack.c.h.bf16 %v1428_v45 }
  0x2a   : > { %v518_v60 = vpack.c.bf16 %v497_v51, %v496_v49  ;;  %v499_v61 = vmax.f32 %v467_v52, 0.0  ;;  %v430_v62 = vmul.f32 %v1323_v53, %v1669_v5  ;;  %v468_v63 = vadd.f32 %v1677_v11, %v429_v54 }
  0x2b   : > { %1503 = vmatmul.mubr.bf16.vlgmr.msra.gmra.mrb[0].mxu1 %v517_v56  ;;  %v431_v0 = vmul.f32 %v1326_v58, %v1669_v5  ;;  %v432_v1 = vmul.f32 %v1327_v59, %v1669_v5  ;;  %v1330_v2 = vunpack.c.l.bf16 %v1429_v55  ;;  %v1331_v3 = vunpack.c.h.bf16 %v1429_v55 }
  0x2c   : > { %v512_v6 = vpack.c.bf16 %v485_v24, %v484_v15  ;;  %v457_v8 = vadd.f32 %v1677_v11, %v1735_v12  ;;  %1506 = vmatprep.mubr.bf16.mxu1 %v518_v60  ;;  %v469_v9 = vadd.f32 %v1677_v11, %v430_v62  ;;  %v500_v14 = vmax.f32 %v468_v63, 0.0 }
  0x2d   : > { %v486_v18 = vmax.f32 %v1732_v10, 0.0  ;;  %v420_v19 = vmul.f32 %v1303_v7, %v1669_v5  ;;  %v433_v21 = vmul.f32 %v1330_v2, %v1669_v5  ;;  %v434_v22 = vmul.f32 %v1331_v3, %v1669_v5 }
  0x2e   : > { %v487_v15 = vmax.f32 %v1742_v16, 0.0  ;;  %v488_v23 = vmax.f32 %v1747_v20, 0.0  ;;  %v519_v12 = vpack.c.bf16 %v499_v61, %v498_v57  ;;  %v501_v24 = vmax.f32 %v469_v9, 0.0 }
  0x2f   : > { %1491 = vmatmul.mubr.bf16.gmra.mrb[4].mxu0 %v1724_v4  ;;  %v470_v25 = vadd.f32 %v1677_v11, %v431_v0  ;;  %v471_v10 = vadd.f32 %v1677_v11, %v432_v1  ;;  %v1334_v26 = vunpack.c.l.bf16 %v1430_v17  ;;  %v1335_v27 = vunpack.c.h.bf16 %v1430_v17 }
  0x30   : > { %1494 = vmatprep.mubr.bf16.mxu0 %v512_v6  ;;  %v489_v48 = vmax.f32 %v457_v8, 0.0  ;;  %v520_v7 = vpack.c.bf16 %v501_v24, %v500_v14  ;;  %v472_v28 = vadd.f32 %v1677_v11, %v433_v21  ;;  %v473_v29 = vadd.f32 %v1677_v11, %v434_v22 }
  0x31   : > { %v513_v16 = vpack.c.bf16 %v487_v15, %v486_v18  ;;  %v458_v20 = vadd.f32 %v1677_v11, %v1738_v13  ;;  %v459_v30 = vadd.f32 %v1677_v11, %v420_v19  ;;  %v502_v4 = vmax.f32 %v470_v25, 0.0 }
  0x32   : > { %v503_v31 = vmax.f32 %v471_v10, 0.0  ;;  %v435_v32 = vmul.f32 %v1334_v26, %v1669_v5  ;;  %v436_v33 = vmul.f32 %v1335_v27, %v1669_v5  ;;  %v514_v34 = vpack.c.bf16 %v489_v48, %v488_v23 }
  0x33   : > { %1507 = vmatmul.mubr.bf16.gmra.mrb[4].mxu1 %v519_v12  ;;  %v504_v35 = vmax.f32 %v472_v28, 0.0  ;;  %v505_v36 = vmax.f32 %v473_v29, 0.0  ;;  %v490_v37 = vmax.f32 %v458_v20, 0.0  ;;  %v491_v38 = vmax.f32 %v459_v30, 0.0 }
  0x34   : > { %1510 = vmatprep.mubr.bf16.mxu1 %v520_v7  ;;  %v521_v39 = vpack.c.bf16 %v503_v31, %v502_v4  ;;  %v474_v13 = vadd.f32 %v1677_v11, %v435_v32  ;;  %v475_v40 = vadd.f32 %v1677_v11, %v436_v33 }
  0x35   : > { %v522_v41 = vpack.c.bf16 %v505_v36, %v504_v35  ;;  %v515_v42 = vpack.c.bf16 %v491_v38, %v490_v37 }
  0x36   : > { %v506_v43 = vmax.f32 %v474_v13, 0.0  ;;  %v507_v44 = vmax.f32 %v475_v40, 0.0 }
  0x37   : > { %1495 = vmatmul.mubr.bf16.gmra.mrb[8].mxu0 %v513_v16 }
  0x38   : > { %1498 = vmatprep.mubr.bf16.mxu0 %v514_v34  ;;  %v523_v5 = vpack.c.bf16 %v507_v44, %v506_v43 }
  0x3b   : > { %1511 = vmatmul.mubr.bf16.gmra.mrb[8].mxu1 %v521_v39 }
  0x3c   : > { %1514 = vmatprep.mubr.bf16.mxu1 %v522_v41 }
  0x3f   : > { %1499 = vmatmul.mubr.bf16.gmra.mrb[12].mxu0 %v515_v42 }
  0x43   : > { %1515 = vmatmul.mubr.bf16.gmra.mrb[12].mxu1 %v523_v5 }
  0xfa   : > { %v1488_v45 = vpop.f32.mrb[0].mxu0 }
  0xfb   : > { %v622_v46 = vpop.f32.mrb[1].mxu0  ;;  %v782_v56 = vmul.f32 %v1488_v45, %v1488_v45 }
  0xfc   : > { %v1489_v11 = vpop.f32.mrb[2].mxu0  ;;  %v780_v50 = vmul.f32 %v622_v46, %v622_v46 }
  0xfd   : > { %v1344_v47 = vpack.c.bf16 %v1489_v11, %v1488_v45  ;;  %v625_v49 = vpop.f32.mrb[3].mxu0  ;;  %v783_v62 = vmul.f32 %v1489_v11, %v1489_v11 }
  0xfe   : > { %v749_v51 = vadd.f32 %v625_v49, %v622_v46  ;;  %v781_v52 = vmul.f32 %v625_v49, %v625_v49  ;;  %v1339_v53 = vpack.c.bf16 %v625_v49, %v622_v46  ;;  %v1804_v54 = vpop.f32.mrb[0].mxu1 }
  0xff   : > { %1431 = vst [vmem:[%s1802_s8 + $0x8] sm:$0xff] %v1344_v47   ;;  %v1807_v55 = vpop.f32.mrb[1].mxu1 }
 0x100   : > { %v750_v57 = vadd.f32 %v1488_v45, %v749_v51  ;;  %v812_v58 = vadd.f32 %v781_v52, %v780_v50  ;;  %1340 = vst [vmem:[%s1802_s8] sm:$0xff] %v1339_v53   ;;  %v1810_v59 = vpop.f32.mrb[2].mxu1 }
 0x101   : > { %v1384_v60 = vpack.c.bf16 %v1810_v59, %v1804_v54  ;;  %v1814_v61 = vpop.f32.mrb[3].mxu1 }
 0x102   : > { %v813_v63 = vadd.f32 %v812_v58, %v782_v56  ;;  %v1492_v0 = vpop.f32.mrb[4].mxu0  ;;  %v751_v1 = vadd.f32 %v1489_v11, %v750_v57  ;;  %v1379_v2 = vpack.c.bf16 %v1814_v61, %v1807_v55 }
 0x103   : > { %v638_v3 = vpop.f32.mrb[5].mxu0  ;;  %1439 = vst [vmem:[%s1802_s8 + $0x48] sm:$0xff] %v1384_v60   ;;  %v786_v24 = vmul.f32 %v1492_v0, %v1492_v0 }
 0x104   : > { %v752_v6 = vadd.f32 %v751_v1, %v638_v3  ;;  %v784_v8 = vmul.f32 %v638_v3, %v638_v3  ;;  %v814_v9 = vadd.f32 %v813_v63, %v783_v62  ;;  %v1493_v14 = vpop.f32.mrb[6].mxu0  ;;  %1438 = vst [vmem:[%s1802_s8 + $0x40] sm:$0xff] %v1379_v2  }
 0x105   : > { %v1354_v17 = vpack.c.bf16 %v1493_v14, %v1492_v0  ;;  %v641_v18 = vpop.f32.mrb[7].mxu0  ;;  %v787_v7 = vmul.f32 %v1493_v14, %v1493_v14 }
 0x106   : > { %v815_v19 = vadd.f32 %v814_v9, %v784_v8  ;;  %v753_v21 = vadd.f32 %v752_v6, %v641_v18  ;;  %v785_v22 = vmul.f32 %v641_v18, %v641_v18  ;;  %v1349_v15 = vpack.c.bf16 %v641_v18, %v638_v3  ;;  %v1820_v23 = vpop.f32.mrb[4].mxu1 }
 0x107   : > { %1433 = vst [vmem:[%s1802_s8 + $0x18] sm:$0xff] %v1354_v17   ;;  %v1823_v12 = vpop.f32.mrb[5].mxu1  ;;  %v796_v17 = vmul.f32 %v1807_v55, %v1807_v55 }
 0x108   : > { %v754_v25 = vadd.f32 %v1492_v0, %v753_v21  ;;  %v816_v10 = vadd.f32 %v815_v19, %v785_v22  ;;  %1432 = vst [vmem:[%s1802_s8 + $0x10] sm:$0xff] %v1349_v15   ;;  %v1826_v26 = vpop.f32.mrb[6].mxu1 }
 0x109   : > { %v1394_v27 = vpack.c.bf16 %v1826_v26, %v1820_v23  ;;  %v1830_v48 = vpop.f32.mrb[7].mxu1 }
 0x10a   : > { %v817_v28 = vadd.f32 %v816_v10, %v786_v24  ;;  %v1496_v29 = vpop.f32.mrb[8].mxu0  ;;  %v755_v16 = vadd.f32 %v1493_v14, %v754_v25  ;;  %v1389_v20 = vpack.c.bf16 %v1830_v48, %v1823_v12 }
 0x10b   : > { %v654_v30 = vpop.f32.mrb[9].mxu0  ;;  %1441 = vst [vmem:[%s1802_s8 + $0x58] sm:$0xff] %v1394_v27   ;;  %v790_v41 = vmul.f32 %v1496_v29, %v1496_v29 }
 0x10c   : > { %v756_v4 = vadd.f32 %v755_v16, %v654_v30  ;;  %v788_v31 = vmul.f32 %v654_v30, %v654_v30  ;;  %v818_v32 = vadd.f32 %v817_v28, %v787_v7  ;;  %v1497_v33 = vpop.f32.mrb[10].mxu0  ;;  %1440 = vst [vmem:[%s1802_s8 + $0x50] sm:$0xff] %v1389_v20   ;;  %v797_v28 = vmul.f32 %v1814_v61, %v1814_v61 }
 0x10d   : > { %v1364_v34 = vpack.c.bf16 %v1497_v33, %v1496_v29  ;;  %v657_v35 = vpop.f32.mrb[11].mxu0  ;;  %v791_v46 = vmul.f32 %v1497_v33, %v1497_v33 }
 0x10e   : > { %v819_v36 = vadd.f32 %v818_v32, %v788_v31  ;;  %v757_v37 = vadd.f32 %v756_v4, %v657_v35  ;;  %v789_v38 = vmul.f32 %v657_v35, %v657_v35  ;;  %v1359_v39 = vpack.c.bf16 %v657_v35, %v654_v30  ;;  %v1836_v13 = vpop.f32.mrb[8].mxu1 }
 0x10f   : > { %1435 = vst [vmem:[%s1802_s8 + $0x28] sm:$0xff] %v1364_v34   ;;  %v1839_v40 = vpop.f32.mrb[9].mxu1  ;;  %v799_v30 = vmul.f32 %v1810_v59, %v1810_v59  ;;  %v800_v31 = vmul.f32 %v1823_v12, %v1823_v12  ;;  %v801_v35 = vmul.f32 %v1830_v48, %v1830_v48 }
 0x110   : > { %v758_v42 = vadd.f32 %v1496_v29, %v757_v37  ;;  %v820_v43 = vadd.f32 %v819_v36, %v789_v38  ;;  %1434 = vst [vmem:[%s1802_s8 + $0x20] sm:$0xff] %v1359_v39   ;;  %v1842_v44 = vpop.f32.mrb[10].mxu1  ;;  %v798_v29 = vmul.f32 %v1804_v54, %v1804_v54 }
 0x111   : > { %v1404_v5 = vpack.c.bf16 %v1842_v44, %v1836_v13  ;;  %v1846_v45 = vpop.f32.mrb[11].mxu1 }
 0x112   : > { %v821_v11 = vadd.f32 %v820_v43, %v790_v41  ;;  %v1500_v47 = vpop.f32.mrb[12].mxu0  ;;  %v759_v49 = vadd.f32 %v1497_v33, %v758_v42  ;;  %v1399_v50 = vpack.c.bf16 %v1846_v45, %v1839_v40 }
 0x113   : > { %v670_v51 = vpop.f32.mrb[13].mxu0  ;;  %1443 = vst [vmem:[%s1802_s8 + $0x68] sm:$0xff] %v1404_v5   ;;  %v794_v6 = vmul.f32 %v1500_v47, %v1500_v47  ;;  %v806_v5 = vmul.f32 %v1836_v13, %v1836_v13 }
 0x114   : > { %v760_v52 = vadd.f32 %v759_v49, %v670_v51  ;;  %v792_v53 = vmul.f32 %v670_v51, %v670_v51  ;;  %v822_v56 = vadd.f32 %v821_v11, %v791_v46  ;;  %v1501_v57 = vpop.f32.mrb[14].mxu0  ;;  %1442 = vst [vmem:[%s1802_s8 + $0x60] sm:$0xff] %v1399_v50  }
 0x115   : > { %v1374_v58 = vpack.c.bf16 %v1501_v57, %v1500_v47  ;;  %v673_v60 = vpop.f32.mrb[15].mxu0  ;;  %v795_v21 = vmul.f32 %v1501_v57, %v1501_v57 }
 0x116   : > { %v823_v62 = vadd.f32 %v822_v56, %v792_v53  ;;  %v761_v63 = vadd.f32 %v760_v52, %v673_v60  ;;  %v793_v0 = vmul.f32 %v673_v60, %v673_v60  ;;  %v1369_v1 = vpack.c.bf16 %v673_v60, %v670_v51  ;;  %v1516_v2 = vpop.f32.mrb[12].mxu1 }
 0x117   : > { %1437 = vst [vmem:[%s1802_s8 + $0x38] sm:$0xff] %v1374_v58   ;;  %v734_v3 = vpop.f32.mrb[13].mxu1 }
 0x118   : > { %v762_v8 = vadd.f32 %v1500_v47, %v761_v63  ;;  %v824_v9 = vadd.f32 %v823_v62, %v793_v0  ;;  %1436 = vst [vmem:[%s1802_s8 + $0x30] sm:$0xff] %v1369_v1   ;;  %v1517_v14 = vpop.f32.mrb[14].mxu1 }
 0x119   : > { %v1414_v18 = vpack.c.bf16 %v1517_v14, %v1516_v2  ;;  %v737_v19 = vpop.f32.mrb[15].mxu1 }
 0x11a   : > { %v825_v22 = vadd.f32 %v824_v9, %v794_v6  ;;  %v763_v15 = vadd.f32 %v1501_v57, %v762_v8  ;;  %v1409_v24 = vpack.c.bf16 %v737_v19, %v734_v3  ;;  %v809_v56 = vmul.f32 %v737_v19, %v737_v19 }
 0x11b   : > { %1445 = vst [vmem:[%s1802_s8 + $0x78] sm:$0xff] %v1414_v18  }
 0x11c   : > { %v764_v25 = vadd.f32 %v763_v15, %v1807_v55  ;;  %v826_v10 = vadd.f32 %v825_v22, %v795_v21  ;;  %1444 = vst [vmem:[%s1802_s8 + $0x70] sm:$0xff] %v1409_v24  }
 0x11e   : > { %v827_v27 = vadd.f32 %v826_v10, %v796_v17  ;;  %v765_v7 = vadd.f32 %v764_v25, %v1814_v61 }
 0x120   : > { %v766_v16 = vadd.f32 %v1804_v54, %v765_v7  ;;  %v828_v20 = vadd.f32 %v827_v27, %v797_v28  ;;  %v802_v54 = vmul.f32 %v1820_v23, %v1820_v23 }
 0x122   : > { %v829_v4 = vadd.f32 %v828_v20, %v798_v29  ;;  %v767_v55 = vadd.f32 %v1810_v59, %v766_v16  ;;  %v803_v59 = vmul.f32 %v1826_v26, %v1826_v26 }
 0x124   : > { %v768_v32 = vadd.f32 %v767_v55, %v1823_v12  ;;  %v830_v33 = vadd.f32 %v829_v4, %v799_v30  ;;  %v804_v12 = vmul.f32 %v1839_v40, %v1839_v40 }
 0x126   : > { %v831_v34 = vadd.f32 %v830_v33, %v800_v31  ;;  %v769_v61 = vadd.f32 %v768_v32, %v1830_v48 }
 0x128   : > { %v770_v36 = vadd.f32 %v1820_v23, %v769_v61  ;;  %v832_v37 = vadd.f32 %v831_v34, %v801_v35  ;;  %v805_v23 = vmul.f32 %v1846_v45, %v1846_v45 }
 0x12a   : > { %v833_v38 = vadd.f32 %v832_v37, %v802_v54  ;;  %v771_v39 = vadd.f32 %v1826_v26, %v770_v36  ;;  %v807_v26 = vmul.f32 %v1842_v44, %v1842_v44 }
 0x12c   : > { %v772_v41 = vadd.f32 %v771_v39, %v1839_v40  ;;  %v834_v42 = vadd.f32 %v833_v38, %v803_v59  ;;  %v808_v40 = vmul.f32 %v734_v3, %v734_v3 }
 0x12e   : > { %v835_v48 = vadd.f32 %v834_v42, %v804_v12  ;;  %v773_v43 = vadd.f32 %v772_v41, %v1846_v45  ;;  %v810_v45 = vmul.f32 %v1516_v2, %v1516_v2 }
 0x130   : > { %v774_v46 = vadd.f32 %v1836_v13, %v773_v43  ;;  %v836_v11 = vadd.f32 %v835_v48, %v805_v23  ;;  %v811_v13 = vmul.f32 %v1517_v14, %v1517_v14 }
 0x132   : > { %v837_v47 = vadd.f32 %v836_v11, %v806_v5  ;;  %v775_v49 = vadd.f32 %v1842_v44, %v774_v46 }
 0x134   : > { %v776_v50 = vadd.f32 %v775_v49, %v734_v3  ;;  %v838_v51 = vadd.f32 %v837_v47, %v807_v26 }
 0x136   : > { %v839_v52 = vadd.f32 %v838_v51, %v808_v40  ;;  %v777_v53 = vadd.f32 %v776_v50, %v737_v19 }
 0x138   : > { %v778_v57 = vadd.f32 %v1516_v2, %v777_v53  ;;  %v840_v58 = vadd.f32 %v839_v52, %v809_v56 }
 0x13a   : > { %v779_v60 = vadd.f32 %v1517_v14, %v778_v57  ;;  %v841_v62 = vadd.f32 %v840_v58, %v810_v45 }
 0x13c   : > { %v842_v44 = vadd.f32 %v841_v62, %v811_v13  ;;  %843 = vst [vmem:[%s325_s11] sm:$0xff] %v779_v60 }
 0x13e   : > { %844 = vst [vmem:[%s332_s14] sm:$0xff] %v842_v44 }
 0x13f PF: > { %s17_s23 = sadd.s32 1, %s1588_s23   ;;  %s1915_s21 = smov %s1584_s22 }
 0x140   : > { %p14_p5 = scmp.ge.s32.totalorder %s17_s23, 4   ;;  %s1916_s22 = smov %s1918_s24 }
 0x142   :  { %16 = sbr.rel (!%p14_p5) target bundleno = 2 (0x2), region = 90 }

// kernel: bottleneck_forward.7
= control target key start
LH: loop header
LB: loop body
LE: loop exit
PB: predicated region body
PF: predicated region fallthrough
CT: control target
= control target key end

     0   :  { %s1236_s15 = smov 0   ;;  %s1238_s16 = smov 0   ;;  %s1405_s0 = inlined_call_operand.vmem [shape: bf16[2,16,16,128], index: 0, kind: input, shape index: {}]   ;;  %s1406_s1 = inlined_call_operand.vmem [shape: f32[1,128], index: 1, kind: input, shape index: {}]   ;;  %s1407_s2 = inlined_call_operand.vmem [shape: f32[1,128], index: 2, kind: input, shape index: {}]   ;;  %s1408_s3 = inlined_call_operand.vmem [shape: bf16[2,16,16,128], index: 3, kind: input, shape index: {}]   ;;  %s1409_s4 = inlined_call_operand.vmem [shape: bf16[2,16,16,128], index: 4, kind: output, shape index: {}]  }
   0x1   :  { %s1240_s17 = smov 0  }
   0x2 LB: > { %s26_s18 = sadd.s32 1, %s1205_s16  ;;  %p832_p0 = scmp.ge.s32.totalorder %s1209_s17, 1  ;;  %s1209_s17 = sphi %s1240_s17, %s14_s17   ;;  %s1205_s16 = sphi %s1238_s16, %s1411_s16   ;;  %s1201_s15 = sphi %s1236_s15, %s1410_s15  }
   0x3   : > { %p28_p1 = scmp.ge.s32.totalorder %s26_s18, 2  ;;  %p202_p2 = scmp.lt.s32.totalorder %s1209_s17, 3 }
   0x5   : > { %s1413_s18 = smov (%p28_p1, %s26_s18), 0  ;;  %p203_p3 = pnand %p832_p0, %p202_p2 }
   0x6   : > { %p249_p4 = scmp.lt.s32.totalorder (!%p203_p3), %s1201_s15, 1  ;;  %v1271_v0 = vld [vmem:[%s1406_s1] ss:$0 sm:$0xff] (!%p203_p3) }
   0x7   : > { %206 = sbr.rel (%p203_p3) target bundleno = 77 (0x4d), region = 36  ;;  %v1282_v11 = vld [vmem:[%s1407_s2] ss:$0 sm:$0xff] (!%p203_p3) }
   0xe   : > { %s1415_s15 = smov (!%p249_p4, %s1201_s15), 1 }
   0xf   : > { %s1254_s19 = sshll.u32 %s1415_s15, 7 }
  0x10   : > { %s1260_s22 = scalar_lea.vmem %s1405_s0, %s1254_s19  ;;  %s1266_s25 = scalar_lea.vmem %s1408_s3, %s1254_s19 }
  0x11   : > { %v911_v1 = vld [vmem:[%s1260_s22] sm:$0xff]   ;;  %v1118_v3 = vld [vmem:[%s1260_s22 + $0x8] sm:$0xff]   ;;  %v1119_v9 = vld [vmem:[%s1260_s22 + $0x10] sm:$0xff]   ;;  %s1305_s6 = scalar_lea.vmem %s1409_s4, %s1254_s19 }
  0x12   : > { %v975_v2 = vld [vmem:[%s1266_s25] sm:$0xff]   ;;  %v912_v4 = vunpack.c.l.bf16 %v911_v1  ;;  %v913_v5 = vunpack.c.h.bf16 %v911_v1  ;;  %v1133_v8 = vld [vmem:[%s1266_s25 + $0x8] sm:$0xff]   ;;  %v1134_v10 = vld [vmem:[%s1266_s25 + $0x10] sm:$0xff]   ;;  %v916_v12 = vunpack.c.l.bf16 %v1118_v3  ;;  %v917_v13 = vunpack.c.h.bf16 %v1118_v3 }
  0x13   : > { %v976_v6 = vunpack.c.l.bf16 %v975_v2  ;;  %v977_v7 = vunpack.c.h.bf16 %v975_v2  ;;  %v980_v14 = vunpack.c.l.bf16 %v1133_v8  ;;  %v981_v15 = vunpack.c.h.bf16 %v1133_v8  ;;  %v1120_v20 = vld [vmem:[%s1260_s22 + $0x18] sm:$0xff]   ;;  %v1121_v46 = vld [vmem:[%s1260_s22 + $0x20] sm:$0xff]   ;;  %v1122_v56 = vld [vmem:[%s1260_s22 + $0x28] sm:$0xff]  }
  0x14   : > { %v353_v16 = vmul.f32 %v912_v4, %v1271_v0  ;;  %v354_v17 = vmul.f32 %v913_v5, %v1271_v0  ;;  %v920_v18 = vunpack.c.l.bf16 %v1119_v9  ;;  %v921_v19 = vunpack.c.h.bf16 %v1119_v9  ;;  %v1135_v41 = vld [vmem:[%s1266_s25 + $0x18] sm:$0xff]   ;;  %v1136_v51 = vld [vmem:[%s1266_s25 + $0x20] sm:$0xff]   ;;  %v1137_v61 = vld [vmem:[%s1266_s25 + $0x28] sm:$0xff]  }
  0x15   : > { %v355_v21 = vmul.f32 %v916_v12, %v1271_v0  ;;  %v356_v22 = vmul.f32 %v917_v13, %v1271_v0  ;;  %v984_v23 = vunpack.c.l.bf16 %v1134_v10  ;;  %v985_v24 = vunpack.c.h.bf16 %v1134_v10  ;;  %v1138_v8 = vld [vmem:[%s1266_s25 + $0x30] sm:$0xff]  }
  0x16   : > { %v391_v25 = vadd.f32 %v1282_v11, %v353_v16  ;;  %v392_v26 = vadd.f32 %v1282_v11, %v354_v17  ;;  %v357_v27 = vmul.f32 %v920_v18, %v1271_v0  ;;  %v358_v28 = vmul.f32 %v921_v19, %v1271_v0 }
  0x17   : > { %v393_v29 = vadd.f32 %v1282_v11, %v355_v21  ;;  %v394_v30 = vadd.f32 %v1282_v11, %v356_v22  ;;  %v924_v31 = vunpack.c.l.bf16 %v1120_v20  ;;  %v925_v32 = vunpack.c.h.bf16 %v1120_v20  ;;  %v1124_v22 = vld [vmem:[%s1260_s22 + $0x38] sm:$0xff]  }
  0x18   : > { %v487_v33 = vadd.f32 %v976_v6, %v391_v25  ;;  %v488_v34 = vadd.f32 %v977_v7, %v392_v26  ;;  %v395_v35 = vadd.f32 %v1282_v11, %v357_v27  ;;  %v396_v36 = vadd.f32 %v1282_v11, %v358_v28  ;;  %v1123_v7 = vld [vmem:[%s1260_s22 + $0x30] sm:$0xff]  }
  0x19   : > { %v489_v37 = vadd.f32 %v980_v14, %v393_v29  ;;  %v490_v38 = vadd.f32 %v981_v15, %v394_v30  ;;  %v359_v39 = vmul.f32 %v924_v31, %v1271_v0  ;;  %v360_v40 = vmul.f32 %v925_v32, %v1271_v0  ;;  %v1139_v31 = vld [vmem:[%s1266_s25 + $0x38] sm:$0xff]  }
  0x1a   : > { %v519_v42 = vmax.f32 %v487_v33, 0.0  ;;  %v520_v43 = vmax.f32 %v488_v34, 0.0  ;;  %v491_v44 = vadd.f32 %v984_v23, %v395_v35  ;;  %v492_v45 = vadd.f32 %v985_v24, %v396_v36 }
  0x1b   : > { %v521_v47 = vmax.f32 %v489_v37, 0.0  ;;  %v522_v48 = vmax.f32 %v490_v38, 0.0  ;;  %v397_v49 = vadd.f32 %v1282_v11, %v359_v39  ;;  %v398_v50 = vadd.f32 %v1282_v11, %v360_v40  ;;  %v1125_v40 = vld [vmem:[%s1260_s22 + $0x40] sm:$0xff]  }
  0x1c   : > { %v1041_v52 = vpack.c.bf16 %v520_v43, %v519_v42  ;;  %v523_v53 = vmax.f32 %v491_v44, 0.0  ;;  %v524_v54 = vmax.f32 %v492_v45, 0.0  ;;  %v988_v55 = vunpack.c.l.bf16 %v1135_v41 }
  0x1d   : > { %v1046_v57 = vpack.c.bf16 %v522_v48, %v521_v47  ;;  %v989_v58 = vunpack.c.h.bf16 %v1135_v41  ;;  %v928_v59 = vunpack.c.l.bf16 %v1121_v46  ;;  %v929_v60 = vunpack.c.h.bf16 %v1121_v46 }
  0x1e   : > { %1042 = vst [vmem:[%s1305_s6] sm:$0xff] %v1041_v52   ;;  %v1051_v62 = vpack.c.bf16 %v524_v54, %v523_v53  ;;  %v493_v63 = vadd.f32 %v988_v55, %v397_v49  ;;  %v992_v1 = vunpack.c.l.bf16 %v1136_v51  ;;  %v993_v2 = vunpack.c.h.bf16 %v1136_v51  ;;  %v1140_v49 = vld [vmem:[%s1266_s25 + $0x40] sm:$0xff]   ;;  %v1126_v54 = vld [vmem:[%s1260_s22 + $0x48] sm:$0xff]  }
  0x1f   : > { %1148 = vst [vmem:[%s1305_s6 + $0x8] sm:$0xff] %v1046_v57   ;;  %v494_v3 = vadd.f32 %v989_v58, %v398_v50  ;;  %v361_v4 = vmul.f32 %v928_v59, %v1271_v0  ;;  %v362_v5 = vmul.f32 %v929_v60, %v1271_v0  ;;  %v932_v6 = vunpack.c.l.bf16 %v1122_v56 }
  0x20   : > { %1149 = vst [vmem:[%s1305_s6 + $0x10] sm:$0xff] %v1051_v62   ;;  %v525_v9 = vmax.f32 %v493_v63, 0.0  ;;  %v933_v10 = vunpack.c.h.bf16 %v1122_v56  ;;  %v996_v12 = vunpack.c.l.bf16 %v1137_v61  ;;  %v997_v13 = vunpack.c.h.bf16 %v1137_v61  ;;  %v1141_v63 = vld [vmem:[%s1266_s25 + $0x48] sm:$0xff]  }
  0x21   : > { %v526_v14 = vmax.f32 %v494_v3, 0.0  ;;  %v399_v15 = vadd.f32 %v1282_v11, %v361_v4  ;;  %v400_v16 = vadd.f32 %v1282_v11, %v362_v5  ;;  %v363_v17 = vmul.f32 %v932_v6, %v1271_v0  ;;  %v1127_v5 = vld [vmem:[%s1260_s22 + $0x50] sm:$0xff]  }
  0x22   : > { %v364_v18 = vmul.f32 %v933_v10, %v1271_v0  ;;  %v936_v19 = vunpack.c.l.bf16 %v1123_v7  ;;  %v937_v20 = vunpack.c.h.bf16 %v1123_v7  ;;  %v1000_v21 = vunpack.c.l.bf16 %v1138_v8  ;;  %v1142_v10 = vld [vmem:[%s1266_s25 + $0x50] sm:$0xff]  }
  0x23   : > { %v1056_v23 = vpack.c.bf16 %v526_v14, %v525_v9  ;;  %v495_v24 = vadd.f32 %v992_v1, %v399_v15  ;;  %v496_v25 = vadd.f32 %v993_v2, %v400_v16  ;;  %v401_v26 = vadd.f32 %v1282_v11, %v363_v17 }
  0x24   : > { %v402_v27 = vadd.f32 %v1282_v11, %v364_v18  ;;  %v365_v28 = vmul.f32 %v936_v19, %v1271_v0  ;;  %v366_v29 = vmul.f32 %v937_v20, %v1271_v0  ;;  %v1001_v30 = vunpack.c.h.bf16 %v1138_v8  ;;  %v1128_v20 = vld [vmem:[%s1260_s22 + $0x58] sm:$0xff]  }
  0x25   : > { %1150 = vst [vmem:[%s1305_s6 + $0x18] sm:$0xff] %v1056_v23   ;;  %v527_v32 = vmax.f32 %v495_v24, 0.0  ;;  %v528_v33 = vmax.f32 %v496_v25, 0.0  ;;  %v497_v34 = vadd.f32 %v996_v12, %v401_v26  ;;  %v940_v35 = vunpack.c.l.bf16 %v1124_v22 }
  0x26   : > { %v498_v36 = vadd.f32 %v997_v13, %v402_v27  ;;  %v403_v37 = vadd.f32 %v1282_v11, %v365_v28  ;;  %v404_v38 = vadd.f32 %v1282_v11, %v366_v29  ;;  %v941_v39 = vunpack.c.h.bf16 %v1124_v22  ;;  %v1143_v29 = vld [vmem:[%s1266_s25 + $0x58] sm:$0xff]  }
  0x27   : > { %v1061_v41 = vpack.c.bf16 %v528_v33, %v527_v32  ;;  %v529_v42 = vmax.f32 %v497_v34, 0.0  ;;  %v367_v43 = vmul.f32 %v940_v35, %v1271_v0  ;;  %v1004_v44 = vunpack.c.l.bf16 %v1139_v31 }
  0x28   : > { %v530_v45 = vmax.f32 %v498_v36, 0.0  ;;  %v499_v46 = vadd.f32 %v1000_v21, %v403_v37  ;;  %v500_v47 = vadd.f32 %v1001_v30, %v404_v38  ;;  %v368_v48 = vmul.f32 %v941_v39, %v1271_v0  ;;  %v1129_v38 = vld [vmem:[%s1260_s22 + $0x60] sm:$0xff]  }
  0x29   : > { %1151 = vst [vmem:[%s1305_s6 + $0x20] sm:$0xff] %v1061_v41   ;;  %v405_v50 = vadd.f32 %v1282_v11, %v367_v43  ;;  %v1005_v51 = vunpack.c.h.bf16 %v1139_v31  ;;  %v944_v52 = vunpack.c.l.bf16 %v1125_v40  ;;  %v945_v53 = vunpack.c.h.bf16 %v1125_v40  ;;  %v1144_v43 = vld [vmem:[%s1266_s25 + $0x60] sm:$0xff]  }
  0x2a   : > { %v1066_v55 = vpack.c.bf16 %v530_v45, %v529_v42  ;;  %v531_v56 = vmax.f32 %v499_v46, 0.0  ;;  %v532_v57 = vmax.f32 %v500_v47, 0.0  ;;  %v406_v58 = vadd.f32 %v1282_v11, %v368_v48 }
  0x2b   : > { %v501_v59 = vadd.f32 %v1004_v44, %v405_v50  ;;  %v369_v60 = vmul.f32 %v944_v52, %v1271_v0  ;;  %v370_v61 = vmul.f32 %v945_v53, %v1271_v0  ;;  %v1008_v62 = vunpack.c.l.bf16 %v1140_v49  ;;  %v1130_v52 = vld [vmem:[%s1260_s22 + $0x68] sm:$0xff]  }
  0x2c   : > { %1152 = vst [vmem:[%s1305_s6 + $0x28] sm:$0xff] %v1066_v55   ;;  %v1071_v1 = vpack.c.bf16 %v532_v57, %v531_v56  ;;  %v502_v2 = vadd.f32 %v1005_v51, %v406_v58  ;;  %v1009_v3 = vunpack.c.h.bf16 %v1140_v49  ;;  %v948_v4 = vunpack.c.l.bf16 %v1126_v54 }
  0x2d   : > { %v533_v6 = vmax.f32 %v501_v59, 0.0  ;;  %v407_v7 = vadd.f32 %v1282_v11, %v369_v60  ;;  %v408_v8 = vadd.f32 %v1282_v11, %v370_v61  ;;  %v949_v9 = vunpack.c.h.bf16 %v1126_v54  ;;  %v1145_v61 = vld [vmem:[%s1266_s25 + $0x68] sm:$0xff]  }
  0x2e   : > { %1153 = vst [vmem:[%s1305_s6 + $0x30] sm:$0xff] %v1071_v1   ;;  %v534_v12 = vmax.f32 %v502_v2, 0.0  ;;  %v371_v13 = vmul.f32 %v948_v4, %v1271_v0  ;;  %v1012_v14 = vunpack.c.l.bf16 %v1141_v63  ;;  %v1013_v15 = vunpack.c.h.bf16 %v1141_v63 }
  0x2f   : > { %v503_v16 = vadd.f32 %v1008_v62, %v407_v7  ;;  %v504_v17 = vadd.f32 %v1009_v3, %v408_v8  ;;  %v372_v18 = vmul.f32 %v949_v9, %v1271_v0  ;;  %v952_v19 = vunpack.c.l.bf16 %v1127_v5  ;;  %v1131_v3 = vld [vmem:[%s1260_s22 + $0x70] sm:$0xff]  }
  0x30   : > { %v1076_v21 = vpack.c.bf16 %v534_v12, %v533_v6  ;;  %v409_v22 = vadd.f32 %v1282_v11, %v371_v13  ;;  %v953_v23 = vunpack.c.h.bf16 %v1127_v5  ;;  %v1016_v24 = vunpack.c.l.bf16 %v1142_v10  ;;  %v1146_v13 = vld [vmem:[%s1266_s25 + $0x70] sm:$0xff]  }
  0x31   : > { %v535_v25 = vmax.f32 %v503_v16, 0.0  ;;  %v536_v26 = vmax.f32 %v504_v17, 0.0  ;;  %v410_v27 = vadd.f32 %v1282_v11, %v372_v18  ;;  %v373_v28 = vmul.f32 %v952_v19, %v1271_v0 }
  0x32   : > { %1154 = vst [vmem:[%s1305_s6 + $0x38] sm:$0xff] %v1076_v21   ;;  %v505_v30 = vadd.f32 %v1012_v14, %v409_v22  ;;  %v374_v31 = vmul.f32 %v953_v23, %v1271_v0  ;;  %v1017_v32 = vunpack.c.h.bf16 %v1142_v10  ;;  %v956_v33 = vunpack.c.l.bf16 %v1128_v20  ;;  %v1132_v22 = vld [vmem:[%s1260_s22 + $0x78] sm:$0xff]  }
  0x33   : > { %v1081_v34 = vpack.c.bf16 %v536_v26, %v535_v25  ;;  %v506_v35 = vadd.f32 %v1013_v15, %v410_v27  ;;  %v411_v36 = vadd.f32 %v1282_v11, %v373_v28  ;;  %v957_v37 = vunpack.c.h.bf16 %v1128_v20  ;;  %v1147_v27 = vld [vmem:[%s1266_s25 + $0x78] sm:$0xff]  }
  0x34   : > { %v537_v39 = vmax.f32 %v505_v30, 0.0  ;;  %v412_v40 = vadd.f32 %v1282_v11, %v374_v31  ;;  %v375_v41 = vmul.f32 %v956_v33, %v1271_v0  ;;  %v1020_v42 = vunpack.c.l.bf16 %v1143_v29 }
  0x35   : > { %1155 = vst [vmem:[%s1305_s6 + $0x40] sm:$0xff] %v1081_v34   ;;  %v538_v44 = vmax.f32 %v506_v35, 0.0  ;;  %v507_v45 = vadd.f32 %v1016_v24, %v411_v36  ;;  %v376_v46 = vmul.f32 %v957_v37, %v1271_v0  ;;  %v1021_v47 = vunpack.c.h.bf16 %v1143_v29 }
  0x36   : > { %v508_v48 = vadd.f32 %v1017_v32, %v412_v40  ;;  %v413_v49 = vadd.f32 %v1282_v11, %v375_v41  ;;  %v960_v50 = vunpack.c.l.bf16 %v1129_v38  ;;  %v961_v51 = vunpack.c.h.bf16 %v1129_v38 }
  0x37   : > { %v1086_v53 = vpack.c.bf16 %v538_v44, %v537_v39  ;;  %v539_v54 = vmax.f32 %v507_v45, 0.0  ;;  %v414_v55 = vadd.f32 %v1282_v11, %v376_v46  ;;  %v1024_v56 = vunpack.c.l.bf16 %v1144_v43 }
  0x38   : > { %v540_v57 = vmax.f32 %v508_v48, 0.0  ;;  %v509_v58 = vadd.f32 %v1020_v42, %v413_v49  ;;  %v377_v59 = vmul.f32 %v960_v50, %v1271_v0  ;;  %v378_v60 = vmul.f32 %v961_v51, %v1271_v0 }
  0x39   : > { %1156 = vst [vmem:[%s1305_s6 + $0x48] sm:$0xff] %v1086_v53   ;;  %v510_v62 = vadd.f32 %v1021_v47, %v414_v55  ;;  %v1025_v63 = vunpack.c.h.bf16 %v1144_v43  ;;  %v964_v1 = vunpack.c.l.bf16 %v1130_v52  ;;  %v965_v2 = vunpack.c.h.bf16 %v1130_v52 }
  0x3a   : > { %v1091_v4 = vpack.c.bf16 %v540_v57, %v539_v54  ;;  %v541_v5 = vmax.f32 %v509_v58, 0.0  ;;  %v415_v6 = vadd.f32 %v1282_v11, %v377_v59  ;;  %v416_v7 = vadd.f32 %v1282_v11, %v378_v60 }
  0x3b   : > { %v542_v8 = vmax.f32 %v510_v62, 0.0  ;;  %v379_v9 = vmul.f32 %v964_v1, %v1271_v0  ;;  %v380_v10 = vmul.f32 %v965_v2, %v1271_v0  ;;  %v1028_v12 = vunpack.c.l.bf16 %v1145_v61 }
  0x3c   : > { %1157 = vst [vmem:[%s1305_s6 + $0x50] sm:$0xff] %v1091_v4   ;;  %v511_v14 = vadd.f32 %v1024_v56, %v415_v6  ;;  %v512_v15 = vadd.f32 %v1025_v63, %v416_v7  ;;  %v1029_v16 = vunpack.c.h.bf16 %v1145_v61  ;;  %v968_v17 = vunpack.c.l.bf16 %v1131_v3 }
  0x3d   : > { %v1096_v18 = vpack.c.bf16 %v542_v8, %v541_v5  ;;  %v417_v19 = vadd.f32 %v1282_v11, %v379_v9  ;;  %v418_v20 = vadd.f32 %v1282_v11, %v380_v10  ;;  %v969_v21 = vunpack.c.h.bf16 %v1131_v3 }
  0x3e   : > { %v543_v23 = vmax.f32 %v511_v14, 0.0  ;;  %v544_v24 = vmax.f32 %v512_v15, 0.0  ;;  %v381_v25 = vmul.f32 %v968_v17, %v1271_v0  ;;  %v1032_v26 = vunpack.c.l.bf16 %v1146_v13 }
  0x3f   : > { %1158 = vst [vmem:[%s1305_s6 + $0x58] sm:$0xff] %v1096_v18   ;;  %v513_v28 = vadd.f32 %v1028_v12, %v417_v19  ;;  %v514_v29 = vadd.f32 %v1029_v16, %v418_v20  ;;  %v382_v30 = vmul.f32 %v969_v21, %v1271_v0  ;;  %v1033_v31 = vunpack.c.h.bf16 %v1146_v13 }
  0x40   : > { %v1101_v32 = vpack.c.bf16 %v544_v24, %v543_v23  ;;  %v419_v33 = vadd.f32 %v1282_v11, %v381_v25  ;;  %v972_v34 = vunpack.c.l.bf16 %v1132_v22  ;;  %v973_v35 = vunpack.c.h.bf16 %v1132_v22 }
  0x41   : > { %v545_v36 = vmax.f32 %v513_v28, 0.0  ;;  %v546_v37 = vmax.f32 %v514_v29, 0.0  ;;  %v420_v38 = vadd.f32 %v1282_v11, %v382_v30  ;;  %v1036_v39 = vunpack.c.l.bf16 %v1147_v27 }
  0x42   : > { %1159 = vst [vmem:[%s1305_s6 + $0x60] sm:$0xff] %v1101_v32   ;;  %v515_v40 = vadd.f32 %v1032_v26, %v419_v33  ;;  %v383_v41 = vmul.f32 %v972_v34, %v1271_v0  ;;  %v384_v42 = vmul.f32 %v973_v35, %v1271_v0  ;;  %v1037_v43 = vunpack.c.h.bf16 %v1147_v27 }
  0x43   : > { %v1106_v44 = vpack.c.bf16 %v546_v37, %v545_v36  ;;  %v516_v45 = vadd.f32 %v1033_v31, %v420_v38 }
  0x44   : > { %v547_v46 = vmax.f32 %v515_v40, 0.0  ;;  %v421_v47 = vadd.f32 %v1282_v11, %v383_v41  ;;  %v422_v48 = vadd.f32 %v1282_v11, %v384_v42 }
  0x45   : > { %1160 = vst [vmem:[%s1305_s6 + $0x68] sm:$0xff] %v1106_v44   ;;  %v548_v49 = vmax.f32 %v516_v45, 0.0 }
  0x46   : > { %v517_v50 = vadd.f32 %v1036_v39, %v421_v47  ;;  %v518_v51 = vadd.f32 %v1037_v43, %v422_v48 }
  0x47   : > { %v1111_v52 = vpack.c.bf16 %v548_v49, %v547_v46 }
  0x48   : > { %v549_v53 = vmax.f32 %v517_v50, 0.0  ;;  %v550_v54 = vmax.f32 %v518_v51, 0.0 }
  0x49   : > { %1161 = vst [vmem:[%s1305_s6 + $0x70] sm:$0xff] %v1111_v52  }
  0x4a   : > { %v1116_v55 = vpack.c.bf16 %v550_v54, %v549_v53 }
  0x4c   : > { %1162 = vst [vmem:[%s1305_s6 + $0x78] sm:$0xff] %v1116_v55  }
  0x4d PF: > { %s14_s17 = sadd.s32 1, %s1209_s17   ;;  %s1410_s15 = smov %s1205_s16 }
  0x4e   : > { %p11_p5 = scmp.ge.s32.totalorder %s14_s17, 4   ;;  %s1411_s16 = smov %s1413_s18 }
  0x50   :  { %13 = sbr.rel (!%p11_p5) target bundleno = 2 (0x2), region = 69 }

// kernel: bottleneck_forward.5
= control target key start
LH: loop header
LB: loop body
LE: loop exit
PB: predicated region body
PF: predicated region fallthrough
CT: control target
= control target key end

     0   :  { %s4241_s21 = smov 0   ;;  %s5535_s0 = inlined_call_operand.vmem [shape: bf16[2,16,16,128], index: 0, kind: input, shape index: {}]   ;;  %s5536_s1 = inlined_call_operand.vmem [shape: f32[1,128], index: 1, kind: input, shape index: {}]   ;;  %s5537_s2 = inlined_call_operand.vmem [shape: f32[1,128], index: 2, kind: input, shape index: {}]   ;;  %s5538_s3 = inlined_call_operand.vmem [shape: bf16[3,384,128], index: 3, kind: input, shape index: {}]   ;;  %s5539_s4 = inlined_call_operand.vmem [shape: bf16[2,16,16,128], index: 4, kind: output, shape index: {0}]   ;;  %s5540_s5 = inlined_call_operand.vmem [shape: f32[2,8,128], index: 5, kind: output, shape index: {1}]   ;;  %s5541_s6 = inlined_call_operand.vmem [shape: f32[2,8,128], index: 6, kind: output, shape index: {2}]  }
   0x1 LB: > { %s2961_s22 = sadd.s32 4294967295, %s4203_s21   ;;  %p2965_p0 = scmp.ge.s32.totalorder %s4203_s21, 1  ;;  %s4203_s21 = sphi %s4241_s21, %s17_s21  }
   0x2   : > { %p217_p1 = scmp.lt.s32.totalorder %s4203_s21, 3 }
   0x4   : > { %p218_p2 = pnand %p2965_p0, %p217_p1 }
   0x5   : > { %v4121_v0 = vld [vmem:[%s5538_s3 + $0x100] sm:$0xff] (!%p218_p2)   ;;  %v4124_v3 = vld [vmem:[%s5538_s3 + $0x108] sm:$0xff] (!%p218_p2)   ;;  %v4127_v6 = vld [vmem:[%s5538_s3 + $0x110] sm:$0xff] (!%p218_p2)   ;;  %v4205_v8 = vmov (!%p218_p2), 0   ;;  %p255_p3 = scmp.lt.s32.totalorder (!%p218_p2), %s2961_s22, 1  ;;  %vm523_vm0 = vcmask (!%p218_p2), 1047559  }
   0x6   : > { %221 = sbr.rel (%p218_p2) target bundleno = 557 (0x22d), region = 36  ;;  %v4255_v1 = vld [vmem:[%s5538_s3 + $0x140] sm:$0xff] (!%p218_p2)   ;;  %3384 = vmatprep.subr.bf16.mxu0 (!%p218_p2), %v4121_v0  ;;  %v4268_v4 = vld [vmem:[%s5538_s3 + $0x148] sm:$0xff] (!%p218_p2)   ;;  %v4280_v7 = vld [vmem:[%s5538_s3 + $0x150] sm:$0xff] (!%p218_p2)   ;;  %465 = vst [vmem:[#allocation2 + $0x8] sm:$0xff] (!%p218_p2), %v4205_v8  ;;  %vm472_vm1 = vcmask (!%p218_p2), 1040384  }
   0x7   : > { %v4123_v2 = vld [vmem:[%s5538_s3 + $0xc0] sm:$0xff] (!%p218_p2)   ;;  %3936 = vmatprep.subr.bf16.mxu1 (!%p218_p2), %v4255_v1  ;;  %v4126_v5 = vld [vmem:[%s5538_s3 + $0xc8] sm:$0xff] (!%p218_p2)   ;;  %v4129_v9 = vld [vmem:[%s5538_s3 + $0xd0] sm:$0xff] (!%p218_p2)   ;;  %vm524_vm2 = vsmask.f32 (!%p218_p2), 7966  ;;  %vm702_vm5 = vcmask (!%p218_p2), 1047552  }
   0x8   : > { %3385 = vmatpush3.bf16.msra.mxu0 (!%p218_p2), %v4123_v2  ;;  %3944 = vmatpush3.bf16.msra.mxu1 (!%p218_p2), %v4255_v1  ;;  %v4130_v10 = vld [vmem:[%s5538_s3 + $0x118] sm:$0xff] (!%p218_p2)   ;;  %v4133_v13 = vld [vmem:[%s5538_s3 + $0x120] sm:$0xff] (!%p218_p2)   ;;  %v4136_v16 = vld [vmem:[%s5538_s3 + $0x128] sm:$0xff] (!%p218_p2)   ;;  %vm473_vm4 = vsmask.f32 (!%p218_p2), 256 }
   0x9   : > { %3386 = vmatprep.subr.bf16.mxu0 (!%p218_p2), %v4124_v3  ;;  %3937 = vmatprep.subr.bf16.mxu1 (!%p218_p2), %v4268_v4  ;;  %v4293_v11 = vld [vmem:[%s5538_s3 + $0x158] sm:$0xff] (!%p218_p2)   ;;  %v4308_v14 = vld [vmem:[%s5538_s3 + $0x160] sm:$0xff] (!%p218_p2)   ;;  %v4325_v17 = vld [vmem:[%s5538_s3 + $0x168] sm:$0xff] (!%p218_p2)   ;;  %vm817_vm6 = vsmask.f32 (!%p218_p2), 7424 }
   0xa   : > { %v4132_v12 = vld [vmem:[%s5538_s3 + $0xd8] sm:$0xff] (!%p218_p2)   ;;  %v4135_v15 = vld [vmem:[%s5538_s3 + $0xe0] sm:$0xff] (!%p218_p2)   ;;  %v4138_v18 = vld [vmem:[%s5538_s3 + $0xe8] sm:$0xff] (!%p218_p2)   ;;  %vm703_vm8 = vsmask.f32 (!%p218_p2), 7938 }
   0xb   : > { %v4139_v19 = vld [vmem:[%s5538_s3 + $0x130] sm:$0xff] (!%p218_p2)   ;;  %v4142_v22 = vld [vmem:[%s5538_s3 + $0x138] sm:$0xff] (!%p218_p2)   ;;  %v4363_v24 = vld [vmem:[%s5536_s1] ss:$0 sm:$0xff] (!%p218_p2) }
   0xc   : > { %3387 = vmatpush3.bf16.msra.mxu0 (!%p218_p2), %v4126_v5  ;;  %3945 = vmatpush3.bf16.msra.mxu1 (!%p218_p2), %v4268_v4  ;;  %v4339_v20 = vld [vmem:[%s5538_s3 + $0x170] sm:$0xff] (!%p218_p2)   ;;  %v4358_v23 = vld [vmem:[%s5538_s3 + $0x178] sm:$0xff] (!%p218_p2)   ;;  %v550_v29 = vld [vmem:[#allocation2 + $0xe8] sm:$0x80] (!%p218_p2) }
   0xd   : > { %3388 = vmatprep.subr.bf16.mxu0 %v4127_v6  ;;  %3938 = vmatprep.subr.bf16.mxu1 %v4280_v7  ;;  %s5569_s22 = smov (!%p255_p3, %s2961_s22), 1  ;;  %v4141_v21 = vld [vmem:[%s5538_s3 + $0xf0] sm:$0xff]   ;;  %v4372_v31 = vld [vmem:[%s5537_s2] ss:$0 sm:$0xff]  ;;  %vm4375_vm3 = vmand %vm523_vm0, %vm524_vm2 }
   0xe   : > { %s3176_s11 = sshll.u32 %s5569_s22, 7  ;;  %v475_v35 = vld [vmem:[#allocation2 + $0x18] sm:$0x1]  ;;  %v551_v39 = vsel %vm4375_vm3, 0, %v550_v29  ;;  %v553_v40 = vld [vmem:[#allocation2 + $0x100] sm:$0x80]  ;;  %vm4394_vm7 = vmand %vm472_vm1, %vm473_vm4 }
   0xf   : > { %s4346_s20 = scalar_lea.vmem %s5535_s0, %s3176_s11  ;;  %v4144_v36 = vld [vmem:[%s5538_s3 + $0xf8] sm:$0xff]   ;;  %v4145_v41 = vld [vmem:[%s5538_s3 + $0x40] sm:$0xff]   ;;  %552 = vst [vmem:[#allocation2 + $0xe8] sm:$0x80] %v551_v39  ;;  %v476_v49 = vsel %vm4394_vm7, 0, %v475_v35  ;;  %v554_v50 = vsel %vm4375_vm3, 0, %v553_v40  ;;  %vm4439_vm9 = vmand %vm702_vm5, %vm703_vm8  ;;  %s5454_s30 = scalar_lea.vmem %s5539_s4, %s3176_s11 }
  0x10   : > { %3389 = vmatpush3.bf16.msra.mxu0 %v4129_v9  ;;  %3946 = vmatpush3.bf16.msra.mxu1 %v4280_v7  ;;  %v3211_v25 = vld [vmem:[%s4346_s20] sm:$0xff]   ;;  %v3362_v30 = vld [vmem:[%s4346_s20 + $0x48] sm:$0xff]   ;;  %477 = vst [vmem:[#allocation2 + $0x18] sm:$0x1] %v476_v49  ;;  %555 = vst [vmem:[#allocation2 + $0x100] sm:$0x80] %v554_v50 }
  0x11   : > { %3390 = vmatprep.subr.bf16.mxu0 %v4130_v10  ;;  %3939 = vmatprep.subr.bf16.mxu1 %v4293_v11  ;;  %v3212_v26 = vunpack.c.l.bf16 %v3211_v25  ;;  %v3213_v27 = vunpack.c.h.bf16 %v3211_v25  ;;  %v3361_v28 = vld [vmem:[%s4346_s20 + $0x40] sm:$0xff]   ;;  %v3248_v45 = vunpack.c.l.bf16 %v3362_v30  ;;  %v3249_v46 = vunpack.c.h.bf16 %v3362_v30  ;;  %v3354_v61 = vld [vmem:[%s4346_s20 + $0x8] sm:$0xff]   ;;  %v3363_v62 = vld [vmem:[%s4346_s20 + $0x50] sm:$0xff]   ;;  %s2970_s11 = sshll.u32 %s5569_s22, 3 }
  0x12   : > { %v3244_v32 = vunpack.c.l.bf16 %v3361_v28  ;;  %v3245_v33 = vunpack.c.h.bf16 %v3361_v28  ;;  %v3216_v0 = vunpack.c.l.bf16 %v3354_v61  ;;  %v3217_v2 = vunpack.c.h.bf16 %v3354_v61  ;;  %v478_v29 = vld [vmem:[#allocation2 + $0x30] sm:$0x1]  ;;  %v3364_v30 = vld [vmem:[%s4346_s20 + $0x58] sm:$0xff]   ;;  %vm4449_vm10 = vmand %vm702_vm5, %vm817_vm6  ;;  %s268_s8 = scalar_lea.vmem %s5540_s5, %s2970_s11  ;;  %s272_s12 = scalar_lea.vmem %s5541_s6, %s2970_s11 }
  0x13   : > { %v346_v37 = vmul.f32 %v3212_v26, %v4363_v24  ;;  %v347_v38 = vmul.f32 %v3213_v27, %v4363_v24  ;;  %v364_v53 = vmul.f32 %v3248_v45, %v4363_v24  ;;  %v365_v54 = vmul.f32 %v3249_v46, %v4363_v24  ;;  %v559_v49 = vld [vmem:[#allocation2 + $0x130] sm:$0x80]  ;;  %v4147_v61 = vld [vmem:[%s5538_s3 + $0x48] sm:$0xff]   ;;  %v5026_v39 = vld [vmem:[%s5538_s3 + $0x200] sm:$0xff]  }
  0x14   : > { %3391 = vmatpush3.bf16.msra.mxu0 %v4132_v12  ;;  %3947 = vmatpush3.bf16.msra.mxu1 %v4293_v11  ;;  %v362_v42 = vmul.f32 %v3244_v32, %v4363_v24  ;;  %v363_v43 = vmul.f32 %v3245_v33, %v4363_v24  ;;  %v3252_v3 = vunpack.c.l.bf16 %v3363_v62  ;;  %v3253_v9 = vunpack.c.h.bf16 %v3363_v62 }
  0x15   : > { %3392 = vmatprep.subr.bf16.mxu0 %v4133_v13  ;;  %3940 = vmatprep.subr.bf16.mxu1 %v4308_v14  ;;  %v384_v47 = vadd.f32 %v4372_v31, %v346_v37  ;;  %v385_v48 = vadd.f32 %v4372_v31, %v347_v38  ;;  %v402_v59 = vadd.f32 %v4372_v31, %v364_v53 }
  0x16   : > { %v400_v51 = vadd.f32 %v4372_v31, %v362_v42  ;;  %v401_v52 = vadd.f32 %v4372_v31, %v363_v43  ;;  %v403_v60 = vadd.f32 %v4372_v31, %v365_v54  ;;  %v348_v13 = vmul.f32 %v3216_v0, %v4363_v24  ;;  %v843_v26 = vld [vmem:[#allocation2 + $0xe8] sm:$0xff] }
  0x17   : > { %v416_v55 = vmax.f32 %v384_v47, 0.0  ;;  %v417_v56 = vmax.f32 %v385_v48, 0.0  ;;  %v434_v6 = vmax.f32 %v402_v59, 0.0  ;;  %v705_v35 = vld [vmem:[#allocation2 + $0x18] sm:$0xff]  ;;  %v367_v38 = vmul.f32 %v3253_v9, %v4363_v24 }
  0x18   : > { %3393 = vmatpush3.bf16.msra.mxu0 %v4135_v15  ;;  %3948 = vmatpush3.bf16.msra.mxu1 %v4308_v14  ;;  %v432_v57 = vmax.f32 %v400_v51, 0.0  ;;  %v433_v58 = vmax.f32 %v401_v52, 0.0  ;;  %v435_v8 = vmax.f32 %v403_v60, 0.0  ;;  %v349_v15 = vmul.f32 %v3217_v2, %v4363_v24  ;;  %v846_v51 = vld [vmem:[#allocation2 + $0x100] sm:$0xff] }
  0x19   : > { %3394 = vmatprep.subr.bf16.mxu0 %v4136_v16  ;;  %3941 = vmatprep.subr.bf16.mxu1 %v4325_v17  ;;  %v4414_v63 = vpack.c.bf16 %v417_v56, %v416_v55  ;;  %v556_v16 = vld [vmem:[#allocation2 + $0x118] sm:$0x80]  ;;  %v386_v27 = vadd.f32 %v4372_v31, %v348_v13  ;;  %v405_v47 = vadd.f32 %v4372_v31, %v367_v38  ;;  %v479_v54 = vsel %vm4394_vm7, 0, %v478_v29  ;;  %v3355_v55 = vld [vmem:[%s4346_s20 + $0x10] sm:$0xff]  }
  0x1a   : > { %v4417_v5 = vpack.c.bf16 %v433_v58, %v432_v57  ;;  %v387_v28 = vadd.f32 %v4372_v31, %v349_v15  ;;  %v557_v48 = vsel %vm4375_vm3, 0, %v556_v16  ;;  %v4146_v58 = vld [vmem:[%s5538_s3] sm:$0xff]   ;;  %480 = vst [vmem:[#allocation2 + $0x30] sm:$0x1] %v479_v54  ;;  %v3256_v60 = vunpack.c.l.bf16 %v3364_v30 }
  0x1b   : > { %v5547_v10 = vshrl.u32 %v4414_v63, 16  ;;  %v578_v12 = vshll.u32 %v4414_v63, 16  ;;  %1236 = vmatprep.mubr.bf16.mxu0 %v4414_v63  ;;  %558 = vst [vmem:[#allocation2 + $0x118] sm:$0x80] %v557_v48  ;;  %v437_v59 = vmax.f32 %v405_v47, 0.0  ;;  %v3257_v2 = vunpack.c.h.bf16 %v3364_v30 }
  0x1c   : > { %3395 = vmatpush3.bf16.msra.mxu0 %v4138_v18  ;;  %3949 = vmatpush3.bf16.msra.mxu1 %v4325_v17  ;;  %v631_v18 = vshrl.u32 %v4417_v5, 16  ;;  %761 = vst [vmem:[#allocation2 + $0xe0] sm:$0xff] %v4417_v5  ;;  %v419_v42 = vmax.f32 %v387_v28, 0.0  ;;  %v368_v9 = vmul.f32 %v3256_v60, %v4363_v24  ;;  %v3220_v13 = vunpack.c.l.bf16 %v3355_v55  ;;  %v562_v30 = vld [vmem:[#allocation2 + $0x148] sm:$0x80] }
  0x1d   : > { %3396 = vmatprep.subr.bf16.mxu0 %v4139_v19  ;;  %3942 = vmatprep.subr.bf16.mxu1 %v4339_v20  ;;  %v634_v19 = vshll.u32 %v4417_v5, 16  ;;  %v577_v25 = vrot.slane %v5547_v10, 7  ;;  %v369_v16 = vmul.f32 %v3257_v2, %v4363_v24  ;;  %v563_v54 = vsel %vm4375_vm3, 0, %v562_v30  ;;  %v565_v60 = vld [vmem:[#allocation2 + $0x160] sm:$0x80]  ;;  %v4151_v2 = vld [vmem:[%s5538_s3 + $0x58] sm:$0xff]  }
  0x1e   : > { %v406_v28 = vadd.f32 %v4372_v31, %v368_v9  ;;  %v350_v29 = vmul.f32 %v3220_v13, %v4363_v24  ;;  %564 = vst [vmem:[#allocation2 + $0x148] sm:$0x80] %v563_v54  ;;  %v3356_v9 = vld [vmem:[%s4346_s20 + $0x18] sm:$0xff]  }
  0x1f   : > { %v785_v32 = vrot.slane %v634_v19, 1  ;;  %v580_v40 = vor.u32 %v578_v12, %v577_v25  ;;  %v3365_v25 = vld [vmem:[%s4346_s20 + $0x60] sm:$0xff]   ;;  %v407_v38 = vadd.f32 %v4372_v31, %v369_v16  ;;  %v3225_v54 = vunpack.c.h.bf16 %v3356_v9 }
  0x20   : > { %3397 = vmatpush3.bf16.msra.mxu0 %v4141_v21  ;;  %3950 = vmatpush3.bf16.msra.mxu1 %v4339_v20  ;;  %v4427_v21 = vpack.c.bf16 %v435_v8, %v434_v6 }
  0x21   : > { %3398 = vmatprep.subr.bf16.mxu0 %v4142_v22  ;;  %3943 = vmatprep.subr.bf16.mxu1 %v4358_v23  ;;  %v366_v22 = vmul.f32 %v3252_v3, %v4363_v24  ;;  %v786_v45 = vor.u32 %v785_v32, %v631_v18  ;;  %v4465_v50 = vsel %vm4439_vm9, %v580_v40, %v705_v35  ;;  %v560_v3 = vsel %vm4375_vm3, 0, %v559_v49  ;;  %v4149_v40 = vld [vmem:[%s5538_s3 + $0x50] sm:$0xff]  }
  0x22   : > { %v641_v37 = vshll.u32 %v4427_v21, 16  ;;  %762 = vst [vmem:[#allocation2 + $0xf8] sm:$0xff] %v4427_v21  ;;  %707 = vst [vmem:[#allocation2 + $0x18] sm:$0xff] %v4465_v50  ;;  %v4511_v32 = vrot.slane %v578_v12, 1  ;;  %v388_v12 = vadd.f32 %v4372_v31, %v350_v29  ;;  %v849_v47 = vld [vmem:[#allocation2 + $0x118] sm:$0xff]  ;;  %v708_v48 = vld [vmem:[#allocation2 + $0x30] sm:$0xff] }
  0x23   : > { %v404_v43 = vadd.f32 %v4372_v31, %v366_v22  ;;  %v844_v56 = vsel %vm4449_vm10, %v786_v45, %v843_v26  ;;  %561 = vst [vmem:[#allocation2 + $0x130] sm:$0x80] %v560_v3  ;;  %v3221_v22 = vunpack.c.h.bf16 %v3355_v55  ;;  %v3260_v45 = vunpack.c.l.bf16 %v3365_v25  ;;  %v3366_v55 = vld [vmem:[%s4346_s20 + $0x68] sm:$0xff]  }
  0x24   : > { %3399 = vmatpush3.bf16.msra.mxu0 %v4144_v36  ;;  %3951 = vmatpush3.bf16.msra.mxu1 %v4358_v23  ;;  %v638_v36 = vshrl.u32 %v4427_v21, 16  ;;  %v787_v46 = vrot.slane %v641_v37, 1  ;;  %845 = vst [vmem:[#allocation2 + $0xe8] sm:$0xff] %v844_v56  ;;  %v439_v49 = vmax.f32 %v407_v38, 0.0  ;;  %v3264_v16 = vunpack.c.l.bf16 %v3366_v55 }
  0x25   : > { %3792 = vmatprep.subr.bf16.mxu0 %v4255_v1  ;;  %3520 = vmatprep.subr.bf16.mxu1 %v4145_v41  ;;  %v418_v41 = vmax.f32 %v386_v27, 0.0  ;;  %v436_v53 = vmax.f32 %v404_v43, 0.0  ;;  %v438_v43 = vmax.f32 %v406_v28, 0.0 }
  0x26   : > { %v788_v57 = vor.u32 %v787_v46, %v638_v36  ;;  %3824 = vmatprep.mubr.bf16.mxu1 %v844_v56  ;;  %v481_v46 = vld [vmem:[#allocation2 + $0x48] sm:$0x1]  ;;  %v372_v38 = vmul.f32 %v3264_v16, %v4363_v24 }
  0x27   : > { %v4467_v52 = vpack.c.bf16 %v419_v42, %v418_v41  ;;  %1237 = vmatmul.mubr.bf16.vlgmr.msra.gmra.mrb[0].mxu0 %v4465_v50  ;;  %v4496_v8 = vpack.c.bf16 %v437_v59, %v436_v53  ;;  %v351_v41 = vmul.f32 %v3221_v22, %v4363_v24  ;;  %v3261_v53 = vunpack.c.h.bf16 %v3365_v25 }
  0x28   : > { %3793 = vmatpush3.bf16.msra.mxu0 %v4255_v1  ;;  %v847_v6 = vsel %vm4449_vm10, %v788_v57, %v846_v51  ;;  %v4148_v1 = vld [vmem:[%s5538_s3 + $0x8] sm:$0xff]   ;;  %v4150_v57 = vld [vmem:[%s5538_s3 + $0x10] sm:$0xff]   ;;  %v370_v59 = vmul.f32 %v3260_v45, %v4363_v24  ;;  %v3265_v22 = vunpack.c.h.bf16 %v3366_v55 }
  0x29   : > { %v5544_v62 = vshrl.u32 %v4467_v52, 16  ;;  %v585_v0 = vshll.u32 %v4467_v52, 16  ;;  %754 = vst [vmem:[#allocation2 + $0x38] sm:$0xff] %v4467_v52  ;;  %1244 = vmatprep.mubr.bf16.mxu0 %v4467_v52  ;;  %3794 = vmatprep.subr.bf16.mxu0 %v4268_v4  ;;  %848 = vst [vmem:[#allocation2 + $0x100] sm:$0xff] %v847_v6  ;;  %v645_v26 = vshrl.u32 %v4496_v8, 16  ;;  %v648_v27 = vshll.u32 %v4496_v8, 16 }
  0x2a   : > { %3825 = vmatmul.mubr.bf16.vlgmr.msra.gmra.mrb[0].mxu1 %v847_v6  ;;  %763 = vst [vmem:[#allocation2 + $0x110] sm:$0xff] %v4496_v8  ;;  %v389_v51 = vadd.f32 %v4372_v31, %v351_v41  ;;  %v371_v6 = vmul.f32 %v3261_v53, %v4363_v24  ;;  %v566_v41 = vsel %vm4375_vm3, 0, %v565_v60  ;;  %v3224_v53 = vunpack.c.l.bf16 %v3356_v9 }
  0x2b   : > { %v584_v15 = vrot.slane %v5544_v62, 7  ;;  %3521 = vmatpush3.bf16.msra.mxu1 %v4146_v58  ;;  %v789_v42 = vrot.slane %v648_v27, 1  ;;  %v420_v58 = vmax.f32 %v388_v12, 0.0  ;;  %567 = vst [vmem:[#allocation2 + $0x160] sm:$0x80] %v566_v41 }
  0x2c   : > { %3522 = vmatprep.subr.bf16.mxu1 %v4147_v61  ;;  %3795 = vmatpush3.bf16.msra.mxu0 %v4268_v4  ;;  %v4541_v61 = vpack.c.bf16 %v439_v49, %v438_v43  ;;  %v421_v3 = vmax.f32 %v389_v51, 0.0  ;;  %v409_v30 = vadd.f32 %v4372_v31, %v371_v6  ;;  %v410_v49 = vadd.f32 %v4372_v31, %v372_v38  ;;  %v484_v41 = vld [vmem:[#allocation2 + $0x60] sm:$0x1] }
  0x2d   : > { %v587_v35 = vor.u32 %v585_v0, %v584_v15  ;;  %3796 = vmatprep.subr.bf16.mxu0 %v4280_v7  ;;  %v790_v56 = vor.u32 %v789_v42, %v645_v26  ;;  %v408_v15 = vadd.f32 %v4372_v31, %v370_v59  ;;  %v4569_v42 = vld [vmem:[%s4346_s20 + $0x70] sm:$0xff]   ;;  %v353_v6 = vmul.f32 %v3225_v54, %v4363_v24 }
  0x2e   : > { %v652_v25 = vshrl.u32 %v4541_v61, 16  ;;  %v655_v28 = vshll.u32 %v4541_v61, 16  ;;  %764 = vst [vmem:[#allocation2 + $0x128] sm:$0xff] %v4541_v61  ;;  %v4557_v29 = vpack.c.bf16 %v421_v3, %v420_v58  ;;  %v3268_v58 = vunpack.c.l.bf16 %v4569_v42 }
  0x2f   : > { %3523 = vmatpush3.bf16.msra.mxu1 %v4148_v1  ;;  %v4533_v4 = vsel %vm4439_vm9, %v587_v35, %v708_v48  ;;  %v482_v1 = vsel %vm4394_vm7, 0, %v481_v46  ;;  %v850_v13 = vsel %vm4449_vm10, %v790_v56, %v849_v47  ;;  %v4152_v35 = vld [vmem:[%s5538_s3 + $0x18] sm:$0xff]   ;;  %v441_v46 = vmax.f32 %v409_v30, 0.0  ;;  %v4153_v47 = vld [vmem:[%s5538_s3 + $0x60] sm:$0xff]   ;;  %v852_v48 = vld [vmem:[#allocation2 + $0x130] sm:$0xff] }
  0x30   : > { %710 = vst [vmem:[#allocation2 + $0x30] sm:$0xff] %v4533_v4  ;;  %1245 = vmatmul.mubr.bf16.gmra.mrb[4].mxu0 %v4533_v4  ;;  %3524 = vmatprep.subr.bf16.mxu1 %v4149_v40  ;;  %483 = vst [vmem:[#allocation2 + $0x48] sm:$0x1] %v482_v1  ;;  %v373_v40 = vmul.f32 %v3265_v22, %v4363_v24  ;;  %v791_v43 = vrot.slane %v655_v28, 1  ;;  %v5543_v12 = vshrl.u32 %v4557_v29, 16  ;;  %v5548_v45 = vshll.u32 %v4557_v29, 16 }
  0x31   : > { %3797 = vmatpush3.bf16.msra.mxu0 %v4280_v7  ;;  %851 = vst [vmem:[#allocation2 + $0x118] sm:$0xff] %v850_v13  ;;  %3828 = vmatprep.mubr.bf16.mxu1 %v850_v13  ;;  %v440_v7 = vmax.f32 %v408_v15, 0.0  ;;  %755 = vst [vmem:[#allocation2 + $0x50] sm:$0xff] %v4557_v29  ;;  %v442_v59 = vmax.f32 %v410_v49, 0.0  ;;  %v352_v3 = vmul.f32 %v3224_v53, %v4363_v24  ;;  %v568_v1 = vld [vmem:[#allocation2 + $0x178] sm:$0x80] }
  0x32   : > { %3798 = vmatprep.subr.bf16.mxu0 %v4293_v11  ;;  %1252 = vmatprep.mubr.bf16.mxu0 %v4557_v29  ;;  %v411_v51 = vadd.f32 %v4372_v31, %v373_v40  ;;  %v792_v55 = vor.u32 %v791_v43, %v652_v25  ;;  %v3368_v30 = vld [vmem:[%s4346_s20 + $0x78] sm:$0xff]   ;;  %v391_v38 = vadd.f32 %v4372_v31, %v353_v6  ;;  %v3269_v40 = vunpack.c.h.bf16 %v4569_v42  ;;  %v571_v43 = vld [vmem:[#allocation2 + $0x190] sm:$0x80]  ;;  %v4156_v53 = vld [vmem:[%s5538_s3 + $0x28] sm:$0xff]  }
  0x33   : > { %3525 = vmatpush3.bf16.msra.mxu1 %v4150_v57  ;;  %v4585_v56 = vpack.c.bf16 %v441_v46, %v440_v7  ;;  %v591_v57 = vrot.slane %v5543_v12, 7  ;;  %v390_v7 = vadd.f32 %v4372_v31, %v352_v3  ;;  %v569_v49 = vsel %vm4375_vm3, 0, %v568_v1 }
  0x34   : > { %3526 = vmatprep.subr.bf16.mxu1 %v4151_v2  ;;  %v443_v60 = vmax.f32 %v411_v51, 0.0  ;;  %v4155_v2 = vld [vmem:[%s5538_s3 + $0x68] sm:$0xff]   ;;  %v853_v9 = vsel %vm4449_vm10, %v792_v55, %v852_v48  ;;  %v374_v48 = vmul.f32 %v3268_v58, %v4363_v24  ;;  %v423_v55 = vmax.f32 %v391_v38, 0.0  ;;  %570 = vst [vmem:[#allocation2 + $0x178] sm:$0x80] %v569_v49 }
  0x35   : > { %3799 = vmatpush3.bf16.msra.mxu0 %v4293_v11  ;;  %v4154_v11 = vld [vmem:[%s5538_s3 + $0x20] sm:$0xff]   ;;  %v659_v13 = vshrl.u32 %v4585_v56, 16  ;;  %v662_v15 = vshll.u32 %v4585_v56, 16  ;;  %765 = vst [vmem:[#allocation2 + $0x140] sm:$0xff] %v4585_v56  ;;  %v594_v16 = vor.u32 %v5548_v45, %v591_v57  ;;  %854 = vst [vmem:[#allocation2 + $0x130] sm:$0xff] %v853_v9  ;;  %3829 = vmatmul.mubr.bf16.gmra.mrb[4].mxu1 %v853_v9  ;;  %v855_v51 = vld [vmem:[#allocation2 + $0x148] sm:$0xff]  ;;  %v3272_v1 = vunpack.c.l.bf16 %v3368_v30 }
  0x36   : > { %3800 = vmatprep.subr.bf16.mxu0 %v4308_v14  ;;  %v422_v54 = vmax.f32 %v390_v7, 0.0  ;;  %v375_v58 = vmul.f32 %v3269_v40, %v4363_v24  ;;  %v3273_v9 = vunpack.c.h.bf16 %v3368_v30  ;;  %v572_v40 = vsel %vm4375_vm3, 0, %v571_v43  ;;  %v505_v45 = vld [vmem:[#allocation2 + $0x108] sm:$0x1] }
  0x37   : > { %3527 = vmatpush3.bf16.msra.mxu1 %v4152_v35  ;;  %v711_v22 = vld [vmem:[#allocation2 + $0x48] sm:$0xff]  ;;  %v4607_v35 = vpack.c.bf16 %v443_v60, %v442_v59  ;;  %v793_v46 = vrot.slane %v662_v15, 1  ;;  %v412_v59 = vadd.f32 %v4372_v31, %v374_v48  ;;  %v485_v60 = vsel %vm4394_vm7, 0, %v484_v41  ;;  %v4158_v41 = vld [vmem:[%s5538_s3 + $0x30] sm:$0xff]   ;;  %573 = vst [vmem:[#allocation2 + $0x190] sm:$0x80] %v572_v40 }
  0x38   : > { %3528 = vmatprep.subr.bf16.mxu1 %v4153_v47  ;;  %v4617_v47 = vsel %vm4439_vm9, %v594_v16, %v711_v22  ;;  %v4642_v6 = vpack.c.bf16 %v423_v55, %v422_v54  ;;  %486 = vst [vmem:[#allocation2 + $0x60] sm:$0x1] %v485_v60  ;;  %v858_v22 = vld [vmem:[#allocation2 + $0x160] sm:$0xff]  ;;  %v413_v7 = vadd.f32 %v4372_v31, %v375_v58  ;;  %v4159_v54 = vld [vmem:[%s5538_s3 + $0x78] sm:$0xff]   ;;  %v490_v40 = vld [vmem:[#allocation2 + $0x90] sm:$0x1] }
  0x39   : > { %3801 = vmatpush3.bf16.msra.mxu0 %v4308_v14  ;;  %713 = vst [vmem:[#allocation2 + $0x48] sm:$0xff] %v4617_v47  ;;  %v666_v14 = vshrl.u32 %v4607_v35, 16  ;;  %v669_v42 = vshll.u32 %v4607_v35, 16  ;;  %766 = vst [vmem:[#allocation2 + $0x158] sm:$0xff] %v4607_v35  ;;  %v794_v57 = vor.u32 %v793_v46, %v659_v13  ;;  %v444_v38 = vmax.f32 %v412_v59, 0.0 }
  0x3a   : > { %3802 = vmatprep.subr.bf16.mxu0 %v4325_v17  ;;  %1253 = vmatmul.mubr.bf16.gmra.mrb[8].mxu0 %v4617_v47  ;;  %v487_v46 = vld [vmem:[#allocation2 + $0x78] sm:$0x1]  ;;  %v5542_v30 = vshrl.u32 %v4642_v6, 16  ;;  %v5545_v48 = vshll.u32 %v4642_v6, 16  ;;  %756 = vst [vmem:[#allocation2 + $0x68] sm:$0xff] %v4642_v6  ;;  %v376_v43 = vmul.f32 %v3272_v1, %v4363_v24  ;;  %v445_v49 = vmax.f32 %v413_v7, 0.0 }
  0x3b   : > { %3529 = vmatpush3.bf16.msra.mxu1 %v4154_v11  ;;  %v4157_v11 = vld [vmem:[%s5538_s3 + $0x70] sm:$0xff]   ;;  %v795_v3 = vrot.slane %v669_v42, 1  ;;  %v856_v16 = vsel %vm4449_vm10, %v794_v57, %v855_v51  ;;  %1260 = vmatprep.mubr.bf16.mxu0 %v4642_v6  ;;  %v377_v51 = vmul.f32 %v3273_v9, %v4363_v24  ;;  %v3358_v57 = vld [vmem:[%s4346_s20 + $0x28] sm:$0xff]  }
  0x3c   : > { %3530 = vmatprep.subr.bf16.mxu1 %v4155_v2  ;;  %v3357_v2 = vld [vmem:[%s4346_s20 + $0x20] sm:$0xff]   ;;  %857 = vst [vmem:[#allocation2 + $0x148] sm:$0xff] %v856_v16  ;;  %3832 = vmatprep.mubr.bf16.mxu1 %v856_v16  ;;  %v598_v59 = vrot.slane %v5542_v30, 7  ;;  %v414_v60 = vadd.f32 %v4372_v31, %v376_v43  ;;  %v3232_v7 = vunpack.c.l.bf16 %v3358_v57 }
  0x3d   : > { %3803 = vmatpush3.bf16.msra.mxu0 %v4325_v17  ;;  %v796_v17 = vor.u32 %v795_v3, %v666_v14  ;;  %v3229_v55 = vunpack.c.h.bf16 %v3357_v2  ;;  %v488_v3 = vsel %vm4394_vm7, 0, %v487_v46  ;;  %v415_v1 = vadd.f32 %v4372_v31, %v377_v51  ;;  %v4693_v51 = vld [vmem:[%s5538_s3 + $0x80] sm:$0xff]  }
  0x3e   : > { %3804 = vmatprep.subr.bf16.mxu0 %v4339_v20  ;;  %489 = vst [vmem:[#allocation2 + $0x78] sm:$0x1] %v488_v3  ;;  %v601_v16 = vor.u32 %v5545_v48, %v598_v59  ;;  %v861_v3 = vld [vmem:[#allocation2 + $0x178] sm:$0xff] }
  0x3f   : > { %3531 = vmatpush3.bf16.msra.mxu1 %v4156_v53  ;;  %v3228_v53 = vunpack.c.l.bf16 %v3357_v2  ;;  %v859_v58 = vsel %vm4449_vm10, %v796_v17, %v858_v22  ;;  %v355_v2 = vmul.f32 %v3229_v55, %v4363_v24  ;;  %v446_v22 = vmax.f32 %v414_v60, 0.0  ;;  %v714_v43 = vld [vmem:[#allocation2 + $0x60] sm:$0xff]  ;;  %v493_v60 = vld [vmem:[#allocation2 + $0xa8] sm:$0x1] }
  0x40   : > { %3532 = vmatprep.subr.bf16.mxu1 %v4157_v11  ;;  %860 = vst [vmem:[#allocation2 + $0x160] sm:$0xff] %v859_v58  ;;  %3833 = vmatmul.mubr.bf16.gmra.mrb[8].mxu1 %v859_v58  ;;  %v4675_v11 = vpack.c.bf16 %v445_v49, %v444_v38  ;;  %v3233_v38 = vunpack.c.h.bf16 %v3358_v57  ;;  %v447_v49 = vmax.f32 %v415_v1, 0.0  ;;  %v4698_v55 = vsel %vm4439_vm9, %v601_v16, %v714_v43  ;;  %v4168_v43 = vld [vmem:[%s5538_s3 + $0x1c0] sm:$0xff]  }
  0x41   : > { %3805 = vmatpush3.bf16.msra.mxu0 %v4339_v20  ;;  %v354_v9 = vmul.f32 %v3228_v53, %v4363_v24  ;;  %v4160_v20 = vld [vmem:[%s5538_s3 + $0x38] sm:$0xff]   ;;  %v3359_v53 = vld [vmem:[%s4346_s20 + $0x30] sm:$0xff]   ;;  %v393_v57 = vadd.f32 %v4372_v31, %v355_v2  ;;  %v356_v58 = vmul.f32 %v3232_v7, %v4363_v24  ;;  %716 = vst [vmem:[#allocation2 + $0x60] sm:$0xff] %v4698_v55  ;;  %v491_v2 = vsel %vm4394_vm7, 0, %v490_v40 }
  0x42   : > { %3806 = vmatprep.subr.bf16.mxu0 %v4358_v23  ;;  %v673_v46 = vshrl.u32 %v4675_v11, 16  ;;  %v676_v17 = vshll.u32 %v4675_v11, 16  ;;  %767 = vst [vmem:[#allocation2 + $0x170] sm:$0xff] %v4675_v11  ;;  %v357_v59 = vmul.f32 %v3233_v38, %v4363_v24  ;;  %1261 = vmatmul.mubr.bf16.gmra.mrb[12].mxu0 %v4698_v55  ;;  %v4708_v1 = vpack.c.bf16 %v447_v49, %v446_v22 }
  0x43   : > { %3533 = vmatpush3.bf16.msra.mxu1 %v4158_v41  ;;  %v392_v41 = vadd.f32 %v4372_v31, %v354_v9  ;;  %v425_v16 = vmax.f32 %v393_v57, 0.0  ;;  %v394_v7 = vadd.f32 %v4372_v31, %v356_v58  ;;  %492 = vst [vmem:[#allocation2 + $0x90] sm:$0x1] %v491_v2  ;;  %v3236_v38 = vunpack.c.l.bf16 %v3359_v53  ;;  %v3360_v2 = vld [vmem:[%s4346_s20 + $0x38] sm:$0xff]  }
  0x44   : > { %3534 = vmatprep.subr.bf16.mxu1 %v4159_v54  ;;  %v797_v54 = vrot.slane %v676_v17, 1  ;;  %v680_v49 = vshrl.u32 %v4708_v1, 16  ;;  %v5546_v40 = vshll.u32 %v4708_v1, 16  ;;  %768 = vst [vmem:[#allocation2 + $0x188] sm:$0xff] %v4708_v1  ;;  %v494_v62 = vsel %vm4394_vm7, 0, %v493_v60 }
  0x45   : > { %3807 = vmatpush3.bf16.msra.mxu0 %v4358_v23  ;;  %v424_v9 = vmax.f32 %v392_v41, 0.0  ;;  %v395_v23 = vadd.f32 %v4372_v31, %v357_v59  ;;  %v426_v57 = vmax.f32 %v394_v7, 0.0  ;;  %v358_v59 = vmul.f32 %v3236_v38, %v4363_v24  ;;  %495 = vst [vmem:[#allocation2 + $0xa8] sm:$0x1] %v494_v62  ;;  %v499_v38 = vld [vmem:[#allocation2 + $0xd8] sm:$0x1] }
  0x46   : > { %v798_v22 = vor.u32 %v797_v54, %v673_v46  ;;  %3656 = vmatprep.subr.bf16.mxu0 %v4168_v43  ;;  %v799_v30 = vrot.slane %v5546_v40, 1 }
  0x47   : > { %3535 = vmatpush3.bf16.msra.mxu1 %v4160_v20  ;;  %v3237_v20 = vunpack.c.h.bf16 %v3359_v53  ;;  %v4723_v41 = vpack.c.bf16 %v425_v16, %v424_v9  ;;  %v427_v58 = vmax.f32 %v395_v23, 0.0  ;;  %v496_v53 = vld [vmem:[#allocation2 + $0xc0] sm:$0x1]  ;;  %v864_v9 = vld [vmem:[#allocation2 + $0x190] sm:$0xff] }
  0x48   : > { %3840 = vmatprep.subr.bf16.mxu1 %v4693_v51  ;;  %v862_v54 = vsel %vm4449_vm10, %v798_v22, %v861_v3  ;;  %v396_v3 = vadd.f32 %v4372_v31, %v358_v59  ;;  %v800_v43 = vor.u32 %v799_v30, %v680_v49  ;;  %v3240_v22 = vunpack.c.l.bf16 %v3360_v2  ;;  %v717_v59 = vld [vmem:[#allocation2 + $0x78] sm:$0xff] }
  0x49   : > { %v359_v12 = vmul.f32 %v3237_v20, %v4363_v24  ;;  %863 = vst [vmem:[#allocation2 + $0x178] sm:$0xff] %v862_v54  ;;  %3836 = vmatprep.mubr.bf16.mxu1 %v862_v54  ;;  %v5549_v16 = vshrl.u32 %v4723_v41, 16  ;;  %v606_v7 = vshll.u32 %v4723_v41, 16  ;;  %1268 = vmatprep.mubr.bf16.mxu0 %v4723_v41  ;;  %v4737_v23 = vpack.c.bf16 %v427_v58, %v426_v57  ;;  %v502_v54 = vld [vmem:[#allocation2 + $0xf0] sm:$0x1] }
  0x4a   : > { %v3241_v20 = vunpack.c.h.bf16 %v3360_v2  ;;  %v428_v58 = vmax.f32 %v396_v3, 0.0  ;;  %v865_v62 = vsel %vm4449_vm10, %v800_v43, %v864_v9  ;;  %v360_v30 = vmul.f32 %v3240_v22, %v4363_v24  ;;  %v508_v43 = vld [vmem:[#allocation2 + $0x120] sm:$0x1] }
  0x4b   : > { %v397_v60 = vadd.f32 %v4372_v31, %v359_v12  ;;  %v605_v48 = vrot.slane %v5549_v16, 7  ;;  %v610_v40 = vshrl.u32 %v4737_v23, 16  ;;  %v613_v57 = vshll.u32 %v4737_v23, 16  ;;  %866 = vst [vmem:[#allocation2 + $0x190] sm:$0xff] %v865_v62  ;;  %3837 = vmatmul.mubr.bf16.gmra.mrb[12].mxu1 %v865_v62 }
  0x4c   : > { %v361_v12 = vmul.f32 %v3241_v20, %v4363_v24  ;;  %v497_v3 = vsel %vm4394_vm7, 0, %v496_v53  ;;  %v500_v9 = vsel %vm4394_vm7, 0, %v499_v38  ;;  %v720_v24 = vld [vmem:[#allocation2 + $0x90] sm:$0xff]  ;;  %v398_v20 = vadd.f32 %v4372_v31, %v360_v30  ;;  %v511_v30 = vld [vmem:[#allocation2 + $0x138] sm:$0x1] }
  0x4d   : > { %v429_v10 = vmax.f32 %v397_v60, 0.0  ;;  %v608_v2 = vor.u32 %v606_v7, %v605_v48  ;;  %v612_v16 = vrot.slane %v610_v40, 7  ;;  %v4759_v60 = vld [vmem:[#allocation2 + $0x8] sm:$0xff]  ;;  %498 = vst [vmem:[#allocation2 + $0xc0] sm:$0x1] %v497_v3  ;;  %v633_v53 = vrot.slane %v631_v18, 7 }
  0x4e   : > { %1702 = vmatprep.mubr.bf16.mxu1 %v4759_v60  ;;  %v399_v48 = vadd.f32 %v4372_v31, %v361_v12  ;;  %501 = vst [vmem:[#allocation2 + $0xd8] sm:$0x1] %v500_v9  ;;  %v506_v3 = vsel %vm4394_vm7, 0, %v505_v45  ;;  %v517_v9 = vld [vmem:[#allocation2 + $0x168] sm:$0x1]  ;;  %v509_v5 = vsel %vm4394_vm7, 0, %v508_v43 }
  0x4f   : > { %v4762_v22 = vpack.c.bf16 %v429_v10, %v428_v58  ;;  %v4770_v38 = vsel %vm4439_vm9, %v608_v2, %v717_v59  ;;  %v615_v62 = vor.u32 %v613_v57, %v612_v16  ;;  %v503_v10 = vsel %vm4394_vm7, 0, %v502_v54  ;;  %v514_v2 = vld [vmem:[#allocation2 + $0x150] sm:$0x1]  ;;  %507 = vst [vmem:[#allocation2 + $0x108] sm:$0x1] %v506_v3 }
  0x50   : > { %v640_v58 = vrot.slane %v638_v36, 7  ;;  %719 = vst [vmem:[#allocation2 + $0x78] sm:$0xff] %v4770_v38  ;;  %1269 = vmatmul.mubr.bf16.gmra.mrb[16].mxu0 %v4770_v38  ;;  %v430_v59 = vmax.f32 %v398_v20, 0.0  ;;  %v431_v12 = vmax.f32 %v399_v48, 0.0  ;;  %504 = vst [vmem:[#allocation2 + $0xf0] sm:$0x1] %v503_v10  ;;  %v636_v54 = vor.u32 %v634_v19, %v633_v53 }
  0x51   : > { %v5550_v31 = vshrl.u32 %v4762_v22, 16  ;;  %v620_v18 = vshll.u32 %v4762_v22, 16  ;;  %1276 = vmatprep.mubr.bf16.mxu0 %v4737_v23  ;;  %v4785_v16 = vsel %vm4439_vm9, %v615_v62, %v720_v24  ;;  %v4790_v36 = vld [vmem:[%s5538_s3 + $0x88] sm:$0xff]   ;;  %v647_v62 = vrot.slane %v645_v26, 7  ;;  %v520_v19 = vld [vmem:[#allocation2 + $0x180] sm:$0x1] }
  0x52   : > { %722 = vst [vmem:[#allocation2 + $0x90] sm:$0xff] %v4785_v16  ;;  %v723_v48 = vld [vmem:[#allocation2 + $0xa8] sm:$0xff]  ;;  %v4799_v24 = vpack.c.bf16 %v431_v12, %v430_v59  ;;  %510 = vst [vmem:[#allocation2 + $0x120] sm:$0x1] %v509_v5  ;;  %v654_v45 = vrot.slane %v652_v25, 7  ;;  %v512_v10 = vsel %vm4394_vm7, 0, %v511_v30  ;;  %v643_v5 = vor.u32 %v641_v37, %v640_v58 }
  0x53   : > { %v619_v20 = vrot.slane %v5550_v31, 7  ;;  %v526_v53 = vld [vmem:[#allocation2 + $0x28] sm:$0x80]  ;;  %v661_v59 = vrot.slane %v659_v13, 7  ;;  %v515_v12 = vsel %vm4394_vm7, 0, %v514_v2  ;;  %v4821_v13 = vrot.slane %v585_v0, 1  ;;  %1703 = vmatmul.mubr.bf16.vlgmr.msra.gmra.mrb[16].mxu1 %v4759_v60 }
  0x54   : > { %v624_v43 = vshrl.u32 %v4799_v24, 16  ;;  %v627_v3 = vshll.u32 %v4799_v24, 16  ;;  %513 = vst [vmem:[#allocation2 + $0x138] sm:$0x1] %v512_v10  ;;  %516 = vst [vmem:[#allocation2 + $0x150] sm:$0x1] %v515_v12  ;;  %3841 = vmatpush3.bf16.msra.mxu1 %v4693_v51  ;;  %1710 = vmatprep.mubr.bf16.mxu1 %v4414_v63 }
  0x55   : > { %v622_v26 = vor.u32 %v620_v18, %v619_v20  ;;  %v529_v25 = vld [vmem:[#allocation2 + $0x40] sm:$0x80]  ;;  %v532_v30 = vld [vmem:[#allocation2 + $0x58] sm:$0x80]  ;;  %v650_v20 = vor.u32 %v648_v27, %v647_v62  ;;  %v668_v31 = vrot.slane %v666_v14, 7  ;;  %v518_v21 = vsel %vm4394_vm7, 0, %v517_v9  ;;  %3842 = vmatprep.subr.bf16.mxu1 %v4790_v36 }
  0x56   : > { %v729_v2 = vld [vmem:[#allocation2 + $0xd8] sm:$0xff]  ;;  %v535_v37 = vld [vmem:[#allocation2 + $0x70] sm:$0x80]  ;;  %v626_v58 = vrot.slane %v624_v43, 7  ;;  %519 = vst [vmem:[#allocation2 + $0x168] sm:$0x1] %v518_v21 }
  0x57   : > { %v4834_v0 = vsel %vm4439_vm9, %v622_v26, %v723_v48  ;;  %v4840_v8 = vsel %vm4439_vm9, %v636_v54, %v729_v2  ;;  %v675_v27 = vrot.slane %v673_v46, 7  ;;  %v538_v14 = vld [vmem:[#allocation2 + $0x88] sm:$0x80]  ;;  %v726_v51 = vld [vmem:[#allocation2 + $0xc0] sm:$0xff]  ;;  %v4163_v9 = vld [vmem:[%s5538_s3 + $0x90] sm:$0xff]   ;;  %v657_v54 = vor.u32 %v655_v28, %v654_v45 }
  0x58   : > { %725 = vst [vmem:[#allocation2 + $0xa8] sm:$0xff] %v4834_v0  ;;  %731 = vst [vmem:[#allocation2 + $0xd8] sm:$0xff] %v4840_v8  ;;  %v732_v48 = vld [vmem:[#allocation2 + $0xf0] sm:$0xff]  ;;  %v521_v62 = vsel %vm4394_vm7, 0, %v520_v19  ;;  %v682_v46 = vrot.slane %v680_v49, 7  ;;  %v527_v10 = vsel %vm4375_vm3, 0, %v526_v53  ;;  %1277 = vmatmul.mubr.bf16.gmra.mrb[20].mxu0 %v4785_v16  ;;  %v629_v12 = vor.u32 %v627_v3, %v626_v58  ;;  %3843 = vmatpush3.bf16.msra.mxu1 %v4790_v36 }
  0x59   : > { %v4863_v26 = vsel %vm4439_vm9, %v643_v5, %v732_v48  ;;  %v664_v28 = vor.u32 %v662_v15, %v661_v59  ;;  %v671_v44 = vor.u32 %v669_v42, %v668_v31  ;;  %522 = vst [vmem:[#allocation2 + $0x180] sm:$0x1] %v521_v62  ;;  %528 = vst [vmem:[#allocation2 + $0x28] sm:$0x80] %v527_v10  ;;  %v541_v49 = vld [vmem:[#allocation2 + $0xa0] sm:$0x80]  ;;  %1284 = vmatprep.mubr.bf16.mxu0 %v4762_v22 }
  0x5a   : > { %734 = vst [vmem:[#allocation2 + $0xf0] sm:$0xff] %v4863_v26  ;;  %v735_v19 = vld [vmem:[#allocation2 + $0x108] sm:$0xff]  ;;  %v4874_v53 = vld [vmem:[%s5538_s3 + $0x98] sm:$0xff]   ;;  %v678_v45 = vor.u32 %v676_v17, %v675_v27  ;;  %v530_v15 = vsel %vm4375_vm3, 0, %v529_v25  ;;  %v533_v42 = vsel %vm4375_vm3, 0, %v532_v30  ;;  %v5559_v31 = vshll.u32 %v4557_v29, 16  ;;  %3844 = vmatprep.subr.bf16.mxu1 %v4163_v9 }
  0x5b   : > { %v544_v5 = vld [vmem:[#allocation2 + $0xb8] sm:$0x80]  ;;  %v4887_v2 = vsel %vm4439_vm9, %v629_v12, %v726_v51  ;;  %v4891_v21 = vsel %vm4439_vm9, %v650_v20, %v735_v19  ;;  %v738_v17 = vld [vmem:[#allocation2 + $0x120] sm:$0xff]  ;;  %v5560_v25 = vshrl.u32 %v4414_v63, 16  ;;  %531 = vst [vmem:[#allocation2 + $0x40] sm:$0x80] %v530_v15  ;;  %1711 = vmatmul.mubr.bf16.gmra.mrb[20].mxu1 %v4465_v50 }
  0x5c   : > { %v773_v59 = vrot.slane %v5559_v31, 1  ;;  %534 = vst [vmem:[#allocation2 + $0x58] sm:$0x80] %v533_v42  ;;  %v536_v30 = vsel %vm4375_vm3, 0, %v535_v37  ;;  %v547_v27 = vld [vmem:[#allocation2 + $0xd0] sm:$0x80]  ;;  %v4902_v36 = vsel %vm4439_vm9, %v657_v54, %v738_v17  ;;  %1718 = vmatprep.mubr.bf16.mxu1 %v4467_v52  ;;  %3845 = vmatpush3.bf16.msra.mxu1 %v4163_v9 }
  0x5d   : > { %v770_v58 = vor.u32 %v4511_v32, %v5560_v25  ;;  %728 = vst [vmem:[#allocation2 + $0xc0] sm:$0xff] %v4887_v2  ;;  %737 = vst [vmem:[#allocation2 + $0x108] sm:$0xff] %v4891_v21  ;;  %v741_v20 = vld [vmem:[#allocation2 + $0x138] sm:$0xff]  ;;  %v744_v51 = vld [vmem:[#allocation2 + $0x150] sm:$0xff]  ;;  %v5561_v63 = vshll.u32 %v4708_v1, 16  ;;  %v5562_v48 = vshll.u32 %v4642_v6, 16  ;;  %3846 = vmatprep.subr.bf16.mxu1 %v4874_v53 }
  0x5e   : > { %537 = vst [vmem:[#allocation2 + $0x70] sm:$0x80] %v536_v30  ;;  %v539_v37 = vsel %vm4375_vm3, 0, %v538_v14  ;;  %740 = vst [vmem:[#allocation2 + $0x120] sm:$0xff] %v4902_v36  ;;  %v4913_v10 = vsel %vm4439_vm9, %v664_v28, %v741_v20  ;;  %v4917_v54 = vsel %vm4439_vm9, %v671_v44, %v744_v51  ;;  %v542_v12 = vsel %vm4375_vm3, 0, %v541_v49  ;;  %v747_v28 = vld [vmem:[#allocation2 + $0x168] sm:$0xff] }
  0x5f   : > { %v685_v32 = vor.u32 %v5561_v63, %v682_v46  ;;  %v775_v62 = vrot.slane %v5562_v48, 1  ;;  %540 = vst [vmem:[#allocation2 + $0x88] sm:$0x80] %v539_v37  ;;  %v777_v46 = vrot.slane %v606_v7, 1  ;;  %v5563_v19 = vshrl.u32 %v4467_v52, 16  ;;  %743 = vst [vmem:[#allocation2 + $0x138] sm:$0xff] %v4913_v10 }
  0x60   : > { %746 = vst [vmem:[#allocation2 + $0x150] sm:$0xff] %v4917_v54  ;;  %543 = vst [vmem:[#allocation2 + $0xa0] sm:$0x80] %v542_v12  ;;  %v779_v44 = vrot.slane %v613_v57, 1  ;;  %v545_v7 = vsel %vm4375_vm3, 0, %v544_v5  ;;  %v4939_v50 = vsel %vm4439_vm9, %v678_v45, %v747_v28  ;;  %v5564_v49 = vshrl.u32 %v4557_v29, 16  ;;  %1285 = vmatmul.mubr.bf16.gmra.mrb[24].mxu0 %v4834_v0  ;;  %3847 = vmatpush3.bf16.msra.mxu1 %v4874_v53 }
  0x61   : > { %v772_v14 = vor.u32 %v4821_v13, %v5563_v19  ;;  %v4165_v13 = vld [vmem:[%s5538_s3 + $0xa0] sm:$0xff]   ;;  %546 = vst [vmem:[#allocation2 + $0xb8] sm:$0x80] %v545_v7  ;;  %v781_v57 = vrot.slane %v620_v18, 1  ;;  %v548_v42 = vsel %vm4375_vm3, 0, %v547_v27  ;;  %749 = vst [vmem:[#allocation2 + $0x168] sm:$0xff] %v4939_v50  ;;  %1292 = vmatprep.mubr.bf16.mxu0 %v4799_v24 }
  0x62   : > { %v774_v15 = vor.u32 %v773_v59, %v5564_v49  ;;  %v750_v52 = vld [vmem:[#allocation2 + $0x180] sm:$0xff]  ;;  %v819_v9 = vld [vmem:[#allocation2 + $0x28] sm:$0xff]  ;;  %v5565_v31 = vshrl.u32 %v4642_v6, 16  ;;  %549 = vst [vmem:[#allocation2 + $0xd0] sm:$0x80] %v548_v42  ;;  %v783_v59 = vrot.slane %v627_v3, 1  ;;  %v780_v33 = vor.u32 %v779_v44, %v610_v40  ;;  %3848 = vmatprep.subr.bf16.mxu1 %v4165_v13 }
  0x63   : > { %v4956_v18 = vsel %vm4439_vm9, %v685_v32, %v750_v52  ;;  %v4960_v34 = vsel %vm4449_vm10, %v770_v58, %v819_v9  ;;  %v5566_v5 = vshrl.u32 %v4723_v41, 16  ;;  %v822_v3 = vld [vmem:[#allocation2 + $0x40] sm:$0xff]  ;;  %v825_v25 = vld [vmem:[#allocation2 + $0x58] sm:$0xff]  ;;  %v5567_v20 = vshrl.u32 %v4762_v22, 16  ;;  %v4166_v63 = vld [vmem:[%s5538_s3 + $0xa8] sm:$0xff]   ;;  %1719 = vmatmul.mubr.bf16.gmra.mrb[24].mxu1 %v4533_v4 }
  0x64   : > { %v776_v45 = vor.u32 %v775_v62, %v5565_v31  ;;  %752 = vst [vmem:[#allocation2 + $0x180] sm:$0xff] %v4956_v18  ;;  %821 = vst [vmem:[#allocation2 + $0x28] sm:$0xff] %v4960_v34  ;;  %v4972_v58 = vsel %vm4449_vm10, %v772_v14, %v822_v3  ;;  %v4976_v30 = vsel %vm4449_vm10, %v774_v15, %v825_v25  ;;  %1726 = vmatprep.mubr.bf16.mxu1 %v4557_v29  ;;  %v4167_v4 = vld [vmem:[%s5538_s3 + $0xb0] sm:$0xff]   ;;  %v4194_v29 = vld [vmem:[#allocation2 + $0xe0] sm:$0xff] }
  0x65   : > { %v778_v17 = vor.u32 %v777_v46, %v5566_v5  ;;  %v828_v27 = vld [vmem:[#allocation2 + $0x70] sm:$0xff]  ;;  %v782_v51 = vor.u32 %v781_v57, %v5567_v20  ;;  %824 = vst [vmem:[#allocation2 + $0x40] sm:$0xff] %v4972_v58  ;;  %827 = vst [vmem:[#allocation2 + $0x58] sm:$0xff] %v4976_v30  ;;  %v784_v32 = vor.u32 %v783_v59, %v624_v43  ;;  %3849 = vmatpush3.bf16.msra.mxu1 %v4165_v13  ;;  %v4176_v14 = vld [vmem:[%s5538_s3 + $0xb8] sm:$0xff]  }
  0x66   : > { %v4987_v40 = vsel %vm4449_vm10, %v776_v45, %v828_v27  ;;  %v831_v53 = vld [vmem:[#allocation2 + $0x88] sm:$0xff]  ;;  %3850 = vmatprep.subr.bf16.mxu1 %v4166_v63  ;;  %v4195_v28 = vld [vmem:[#allocation2 + $0xf8] sm:$0xff]  ;;  %v4169_v44 = vld [vmem:[%s5538_s3 + $0x180] sm:$0xff]  }
  0x67   : > { %830 = vst [vmem:[#allocation2 + $0x70] sm:$0xff] %v4987_v40  ;;  %v4994_v48 = vsel %vm4449_vm10, %v778_v17, %v831_v53  ;;  %v834_v62 = vld [vmem:[#allocation2 + $0xa0] sm:$0xff]  ;;  %v4170_v7 = vld [vmem:[%s5538_s3 + $0x1c8] sm:$0xff]   ;;  %v4172_v13 = vld [vmem:[%s5538_s3 + $0x1d0] sm:$0xff]  }
  0x68   : > { %833 = vst [vmem:[#allocation2 + $0x88] sm:$0xff] %v4994_v48  ;;  %v5000_v37 = vsel %vm4449_vm10, %v780_v33, %v834_v62  ;;  %v837_v46 = vld [vmem:[#allocation2 + $0xb8] sm:$0xff]  ;;  %1293 = vmatmul.mubr.bf16.gmra.mrb[28].mxu0 %v4887_v2  ;;  %v4177_v57 = vld [vmem:[%s5538_s3 + $0x1e0] sm:$0xff]   ;;  %v4179_v42 = vld [vmem:[%s5538_s3 + $0x1e8] sm:$0xff]  }
  0x69   : > { %836 = vst [vmem:[#allocation2 + $0xa0] sm:$0xff] %v5000_v37  ;;  %v5006_v43 = vsel %vm4449_vm10, %v782_v51, %v837_v46  ;;  %v840_v12 = vld [vmem:[#allocation2 + $0xd0] sm:$0xff]  ;;  %1300 = vmatprep.mubr.bf16.mxu0 %v4194_v29  ;;  %3851 = vmatpush3.bf16.msra.mxu1 %v4166_v63  ;;  %v4174_v49 = vld [vmem:[%s5538_s3 + $0x1d8] sm:$0xff]   ;;  %v4180_v52 = vld [vmem:[%s5538_s3 + $0x1a8] sm:$0xff]  }
  0x6a   : > { %839 = vst [vmem:[#allocation2 + $0xb8] sm:$0xff] %v5006_v43  ;;  %v5014_v19 = vsel %vm4449_vm10, %v784_v32, %v840_v12  ;;  %3852 = vmatprep.subr.bf16.mxu1 %v4167_v4  ;;  %v4175_v15 = vld [vmem:[%s5538_s3 + $0x198] sm:$0xff]   ;;  %v4181_v9 = vld [vmem:[%s5538_s3 + $0x1f0] sm:$0xff]   ;;  %v4186_v17 = vld [vmem:[%s5538_s3 + $0x208] sm:$0xff]  }
  0x6b   : > { %842 = vst [vmem:[#allocation2 + $0xd0] sm:$0xff] %v5014_v19  ;;  %1727 = vmatmul.mubr.bf16.gmra.mrb[28].mxu1 %v4617_v47  ;;  %v4196_v47 = vld [vmem:[#allocation2 + $0x110] sm:$0xff]  ;;  %v4183_v31 = vld [vmem:[%s5538_s3 + $0x1f8] sm:$0xff]   ;;  %v1996_v3 = vld [vmem:[#allocation2 + $0x48] sm:$0xff] }
  0x6c   : > { %1734 = vmatprep.mubr.bf16.mxu1 %v4642_v6  ;;  %v5045_v6 = vld [vmem:[#allocation2 + $0xe0] sm:$0xff]  ;;  %v1994_v45 = vld [vmem:[#allocation2 + $0x38] sm:$0xff]  ;;  %v1993_v5 = vld [vmem:[#allocation2 + $0x30] sm:$0xff] }
  0x6d   : > { %3853 = vmatpush3.bf16.msra.mxu1 %v4167_v4  ;;  %v4184_v59 = vld [vmem:[%s5538_s3 + $0x1b8] sm:$0xff]   ;;  %v2000_v25 = vld [vmem:[#allocation2 + $0x68] sm:$0xff]  ;;  %v4187_v33 = vld [vmem:[%s5538_s3 + $0x210] sm:$0xff]  }
  0x6e   : > { %3854 = vmatprep.subr.bf16.mxu1 %v4176_v14  ;;  %v4188_v27 = vld [vmem:[%s5538_s3 + $0x218] sm:$0xff]   ;;  %v4189_v20 = vld [vmem:[%s5538_s3 + $0x220] sm:$0xff]   ;;  %v4190_v51 = vld [vmem:[%s5538_s3 + $0x228] sm:$0xff]  }
  0x6f   : > { %v4191_v63 = vld [vmem:[%s5538_s3 + $0x230] sm:$0xff]   ;;  %v5157_v53 = vld [vmem:[#allocation2 + $0xe8] sm:$0xff]  ;;  %v5165_v62 = vld [vmem:[#allocation2 + $0x118] sm:$0xff] }
  0x70   : > { %1301 = vmatmul.mubr.bf16.gmra.mrb[32].mxu0 %v4840_v8  ;;  %v5169_v46 = vld [vmem:[#allocation2 + $0x130] sm:$0xff] }
  0x71   : > { %1308 = vmatprep.mubr.bf16.mxu0 %v4195_v28  ;;  %3855 = vmatpush3.bf16.msra.mxu1 %v4176_v14  ;;  %v5179_v14 = vld [vmem:[#allocation2 + $0x160] sm:$0xff] }
  0x72   : > { %3888 = vmatprep.subr.bf16.mxu1 %v5026_v39 }
  0x73   : > { %1735 = vmatmul.mubr.bf16.gmra.mrb[32].mxu1 %v4698_v55  ;;  %v5051_v55 = vld [vmem:[#allocation2 + $0xf8] sm:$0xff] }
  0x74   : > { %1742 = vmatprep.mubr.bf16.mxu1 %v4723_v41 }
  0x78   : > { %1309 = vmatmul.mubr.bf16.gmra.mrb[36].mxu0 %v4863_v26 }
  0x79   : > { %1316 = vmatprep.mubr.bf16.mxu0 %v4196_v47 }
  0x7b   : > { %1743 = vmatmul.mubr.bf16.gmra.mrb[36].mxu1 %v4770_v38 }
  0x7c   : > { %1750 = vmatprep.mubr.bf16.mxu1 %v4737_v23 }
  0x80   : > { %1317 = vmatmul.mubr.bf16.gmra.mrb[40].mxu0 %v4891_v21 }
  0x81   : > { %1324 = vmatprep.mubr.bf16.mxu0 %v4541_v61 }
  0x83   : > { %1751 = vmatmul.mubr.bf16.gmra.mrb[40].mxu1 %v4785_v16 }
  0x84   : > { %1758 = vmatprep.mubr.bf16.mxu1 %v4762_v22 }
  0x88   : > { %1325 = vmatmul.mubr.bf16.gmra.mrb[44].mxu0 %v4902_v36 }
  0x89   : > { %1332 = vmatprep.mubr.bf16.mxu0 %v4585_v56 }
  0x8b   : > { %1759 = vmatmul.mubr.bf16.gmra.mrb[44].mxu1 %v4834_v0 }
  0x8c   : > { %1766 = vmatprep.mubr.bf16.mxu1 %v4799_v24 }
  0x90   : > { %1333 = vmatmul.mubr.bf16.gmra.mrb[48].mxu0 %v4913_v10 }
  0x91   : > { %1340 = vmatprep.mubr.bf16.mxu0 %v4607_v35 }
  0x93   : > { %1767 = vmatmul.mubr.bf16.gmra.mrb[48].mxu1 %v4887_v2 }
  0x94   : > { %1774 = vmatprep.mubr.bf16.mxu1 %v5045_v6 }
  0x98   : > { %1341 = vmatmul.mubr.bf16.gmra.mrb[52].mxu0 %v4917_v54 }
  0x99   : > { %1348 = vmatprep.mubr.bf16.mxu0 %v4675_v11 }
  0x9b   : > { %1775 = vmatmul.mubr.bf16.gmra.mrb[52].mxu1 %v4840_v8 }
  0x9c   : > { %1782 = vmatprep.mubr.bf16.mxu1 %v5051_v55 }
  0xa0   : > { %1349 = vmatmul.mubr.bf16.gmra.mrb[56].mxu0 %v4939_v50 }
  0xa1   : > { %1356 = vmatprep.mubr.bf16.mxu0 %v4708_v1  ;;  %v4171_v1 = vld [vmem:[%s5538_s3 + $0x188] sm:$0xff]  }
  0xa3   : > { %1783 = vmatmul.mubr.bf16.gmra.mrb[56].mxu1 %v4863_v26 }
  0xa4   : > { %1790 = vmatprep.mubr.bf16.mxu1 %v4196_v47 }
  0xa8   : > { %1357 = vmatmul.mubr.bf16.gmra.mrb[60].mxu0 %v4956_v18 }
  0xa9   : > { %3808 = vmatprep.mubr.bf16.mxu0 %v4960_v34 }
  0xab   : > { %1791 = vmatmul.mubr.bf16.gmra.mrb[60].mxu1 %v4891_v21 }
  0xac   : > { %1798 = vmatprep.mubr.bf16.mxu1 %v4541_v61  ;;  %v4173_v61 = vld [vmem:[%s5538_s3 + $0x190] sm:$0xff]  }
  0xb0   : > { %3809 = vmatmul.mubr.bf16.vlgmr.msra.gmra.mrb[64].mxu0 %v4972_v58 }
  0xb1   : > { %3657 = vmatpush3.bf16.msra.mxu0 %v4169_v44  ;;  %3812 = vmatprep.mubr.bf16.mxu0 %v4976_v30 }
  0xb2   : > { %3658 = vmatprep.subr.bf16.mxu0 %v4170_v7 }
  0xb3   : > { %1799 = vmatmul.mubr.bf16.gmra.mrb[64].mxu1 %v4902_v36 }
  0xb4   : > { %1806 = vmatprep.mubr.bf16.mxu1 %v4585_v56  ;;  %v4178_v56 = vld [vmem:[%s5538_s3 + $0x1a0] sm:$0xff]  }
  0xb5   : > { %3659 = vmatpush3.bf16.msra.mxu0 %v4171_v1 }
  0xb6   : > { %3660 = vmatprep.subr.bf16.mxu0 %v4172_v13 }
  0xb8   : > { %3813 = vmatmul.mubr.bf16.gmra.mrb[68].mxu0 %v4987_v40 }
  0xb9   : > { %3661 = vmatpush3.bf16.msra.mxu0 %v4173_v61  ;;  %3816 = vmatprep.mubr.bf16.mxu0 %v4994_v48  ;;  %v2021_v61 = vld [vmem:[#allocation2 + $0x110] sm:$0xff] }
  0xba   : > { %3662 = vmatprep.subr.bf16.mxu0 %v4174_v49 }
  0xbb   : > { %1807 = vmatmul.mubr.bf16.gmra.mrb[68].mxu1 %v4913_v10 }
  0xbc   : > { %1814 = vmatprep.mubr.bf16.mxu1 %v4607_v35  ;;  %v4182_v35 = vld [vmem:[%s5538_s3 + $0x1b0] sm:$0xff]  }
  0xbd   : > { %3663 = vmatpush3.bf16.msra.mxu0 %v4175_v15 }
  0xbe   : > { %3664 = vmatprep.subr.bf16.mxu0 %v4177_v57 }
  0xc0   : > { %3817 = vmatmul.mubr.bf16.gmra.mrb[72].mxu0 %v5000_v37 }
  0xc1   : > { %3665 = vmatpush3.bf16.msra.mxu0 %v4178_v56  ;;  %3820 = vmatprep.mubr.bf16.mxu0 %v5006_v43 }
  0xc2   : > { %3666 = vmatprep.subr.bf16.mxu0 %v4179_v42 }
  0xc3   : > { %1815 = vmatmul.mubr.bf16.gmra.mrb[72].mxu1 %v4917_v54 }
  0xc4   : > { %1822 = vmatprep.mubr.bf16.mxu1 %v4675_v11  ;;  %v1997_v11 = vld [vmem:[#allocation2 + $0x50] sm:$0xff] }
  0xc5   : > { %3667 = vmatpush3.bf16.msra.mxu0 %v4180_v52 }
  0xc6   : > { %3668 = vmatprep.subr.bf16.mxu0 %v4181_v9 }
  0xc8   : > { %3821 = vmatmul.mubr.bf16.gmra.mrb[76].mxu0 %v5014_v19 }
  0xc9   : > { %3669 = vmatpush3.bf16.msra.mxu0 %v4182_v35  ;;  %2266 = vmatprep.mubr.bf16.mxu0 %v1994_v45 }
  0xca   : > { %3670 = vmatprep.subr.bf16.mxu0 %v4183_v31  ;;  %v2030_v31 = vld [vmem:[#allocation2 + $0x158] sm:$0xff] }
  0xcb   : > { %1823 = vmatmul.mubr.bf16.gmra.mrb[76].mxu1 %v4939_v50 }
  0xcc   : > { %3856 = vmatprep.mubr.bf16.mxu1 %v4759_v60 }
  0xcd   : > { %3671 = vmatpush3.bf16.msra.mxu0 %v4184_v59 }
  0xd0   : > { %2267 = vmatmul.mubr.bf16.vlgmr.msra.gmra.mrb[80].mxu0 %v1993_v5 }
  0xd1   : > { %2274 = vmatprep.mubr.bf16.mxu0 %v1997_v11 }
  0xd3   : > { %3857 = vmatmul.mubr.bf16.vlgmr.msra.gmra.mrb[80].mxu1 %v4960_v34  ;;  %v1999_v34 = vld [vmem:[#allocation2 + $0x60] sm:$0xff] }
  0xd4   : > { %3889 = vmatpush3.bf16.msra.mxu1 %v5026_v39  ;;  %3860 = vmatprep.mubr.bf16.mxu1 %v4972_v58 }
  0xd5   : > { %3890 = vmatprep.subr.bf16.mxu1 %v4186_v17 }
  0xd8   : > { %2275 = vmatmul.mubr.bf16.gmra.mrb[84].mxu0 %v1996_v3  ;;  %3891 = vmatpush3.bf16.msra.mxu1 %v4186_v17 }
  0xd9   : > { %2282 = vmatprep.mubr.bf16.mxu0 %v2000_v25  ;;  %3892 = vmatprep.subr.bf16.mxu1 %v4187_v33 }
  0xdb   : > { %3861 = vmatmul.mubr.bf16.gmra.mrb[84].mxu1 %v4976_v30 }
  0xdc   : > { %3864 = vmatprep.mubr.bf16.mxu1 %v4987_v40  ;;  %3893 = vmatpush3.bf16.msra.mxu1 %v4187_v33  ;;  %v2033_v33 = vld [vmem:[#allocation2 + $0x170] sm:$0xff] }
  0xdd   : > { %3894 = vmatprep.subr.bf16.mxu1 %v4188_v27 }
  0xe0   : > { %2283 = vmatmul.mubr.bf16.gmra.mrb[88].mxu0 %v1999_v34  ;;  %3895 = vmatpush3.bf16.msra.mxu1 %v4188_v27 }
  0xe1   : > { %2290 = vmatprep.mubr.bf16.mxu0 %v4723_v41  ;;  %3896 = vmatprep.subr.bf16.mxu1 %v4189_v20  ;;  %v4192_v41 = vld [vmem:[%s5538_s3 + $0x238] sm:$0xff]  }
  0xe3   : > { %3865 = vmatmul.mubr.bf16.gmra.mrb[88].mxu1 %v4994_v48 }
  0xe4   : > { %3868 = vmatprep.mubr.bf16.mxu1 %v5000_v37  ;;  %3897 = vmatpush3.bf16.msra.mxu1 %v4189_v20 }
  0xe5   : > { %3898 = vmatprep.subr.bf16.mxu1 %v4190_v51 }
  0xe8   : > { %2291 = vmatmul.mubr.bf16.gmra.mrb[92].mxu0 %v4770_v38  ;;  %3899 = vmatpush3.bf16.msra.mxu1 %v4190_v51 }
  0xe9   : > { %2298 = vmatprep.mubr.bf16.mxu0 %v4737_v23  ;;  %3900 = vmatprep.subr.bf16.mxu1 %v4191_v63  ;;  %v5159_v23 = vld [vmem:[#allocation2 + $0x100] sm:$0xff] }
  0xeb   : > { %3869 = vmatmul.mubr.bf16.gmra.mrb[92].mxu1 %v5006_v43 }
  0xec   : > { %3872 = vmatprep.mubr.bf16.mxu1 %v5014_v19  ;;  %3901 = vmatpush3.bf16.msra.mxu1 %v4191_v63 }
  0xed   : > { %3902 = vmatprep.subr.bf16.mxu1 %v4192_v41 }
  0xf0   : > { %2299 = vmatmul.mubr.bf16.gmra.mrb[96].mxu0 %v4785_v16  ;;  %3903 = vmatpush3.bf16.msra.mxu1 %v4192_v41 }
  0xf1   : > { %2306 = vmatprep.mubr.bf16.mxu0 %v4762_v22 }
  0xf3   : > { %3873 = vmatmul.mubr.bf16.gmra.mrb[0].mxu1 %v5157_v53 }
  0xf4   : > { %3876 = vmatprep.mubr.bf16.mxu1 %v5159_v23 }
  0xf8   : > { %2307 = vmatmul.mubr.bf16.gmra.mrb[100].mxu0 %v4834_v0  ;;  %v5177_v0 = vld [vmem:[#allocation2 + $0x148] sm:$0xff] }
  0xf9   : > { %2314 = vmatprep.mubr.bf16.mxu0 %v4799_v24 }
  0xfa   : > { %v3400_v38 = vpop.f32.mrb[0].mxu0 }
  0xfb   : > { %v3401_v32 = vpop.f32.mrb[1].mxu0  ;;  %3877 = vmatmul.mubr.bf16.gmra.mrb[4].mxu1 %v5165_v62 }
  0xfc   : > { %v5167_v16 = vadd.f32 %v3401_v32, %v3400_v38  ;;  %v3403_v22 = vpop.f32.mrb[2].mxu0  ;;  %3880 = vmatprep.mubr.bf16.mxu1 %v5169_v46 }
  0xfd   : > { %v3404_v12 = vpop.f32.mrb[3].mxu0 }
  0xfe   : > { %v5171_v4 = vadd.f32 %v3404_v12, %v3403_v22  ;;  %v2036_v12 = vld [vmem:[#allocation2 + $0x188] sm:$0xff] }
 0x100   : > { %2315 = vmatmul.mubr.bf16.gmra.mrb[104].mxu0 %v4887_v2  ;;  %v5189_v2 = vld [vmem:[#allocation2 + $0x178] sm:$0xff] }
 0x101   : > { %2322 = vmatprep.mubr.bf16.mxu0 %v5045_v6 }
 0x103   : > { %v3406_v24 = vpop.f32.mrb[4].mxu0  ;;  %3881 = vmatmul.mubr.bf16.gmra.mrb[8].mxu1 %v5177_v0 }
 0x104   : > { %v3407_v29 = vpop.f32.mrb[5].mxu0  ;;  %3884 = vmatprep.mubr.bf16.mxu1 %v5179_v14 }
 0x105   : > { %v5181_v39 = vadd.f32 %v3407_v29, %v3406_v24  ;;  %v3409_v28 = vpop.f32.mrb[6].mxu0 }
 0x106   : > { %v3410_v47 = vpop.f32.mrb[7].mxu0 }
 0x107   : > { %v5184_v44 = vadd.f32 %v3410_v47, %v3409_v28 }
 0x108   : > { %2323 = vmatmul.mubr.bf16.gmra.mrb[108].mxu0 %v4840_v8  ;;  %v2024_v8 = vld [vmem:[#allocation2 + $0x128] sm:$0xff] }
 0x109   : > { %2330 = vmatprep.mubr.bf16.mxu0 %v5051_v55 }
 0x10b   : > { %3885 = vmatmul.mubr.bf16.gmra.mrb[12].mxu1 %v5189_v2 }
 0x10c   : > { %3904 = vmatprep.mubr.bf16.mxu1 %v4972_v58 }
 0x10d   : > { %v3412_v6 = vpop.f32.mrb[8].mxu0 }
 0x10e   : > { %v3413_v7 = vpop.f32.mrb[9].mxu0 }
 0x10f   : > { %v5193_v1 = vadd.f32 %v3413_v7, %v3412_v6  ;;  %v3415_v13 = vpop.f32.mrb[10].mxu0 }
 0x110   : > { %v3416_v49 = vpop.f32.mrb[11].mxu0  ;;  %2331 = vmatmul.mubr.bf16.gmra.mrb[112].mxu0 %v4863_v26  ;;  %v2027_v26 = vld [vmem:[#allocation2 + $0x140] sm:$0xff] }
 0x111   : > { %v5196_v15 = vadd.f32 %v3416_v49, %v3415_v13  ;;  %2338 = vmatprep.mubr.bf16.mxu0 %v2021_v61 }
 0x113   : > { %3905 = vmatmul.mubr.bf16.vlgmr.msra.gmra.mrb[80].mxu1 %v4976_v30 }
 0x114   : > { %3908 = vmatprep.mubr.bf16.mxu1 %v4987_v40 }
 0x115   : > { %v3418_v55 = vpop.f32.mrb[12].mxu0 }
 0x116   : > { %v3419_v57 = vpop.f32.mrb[13].mxu0 }
 0x117   : > { %v5201_v58 = vadd.f32 %v3419_v57, %v3418_v55  ;;  %v3421_v56 = vpop.f32.mrb[14].mxu0 }
 0x118   : > { %2339 = vmatmul.mubr.bf16.gmra.mrb[116].mxu0 %v4891_v21  ;;  %v3422_v42 = vpop.f32.mrb[15].mxu0 }
 0x119   : > { %2346 = vmatprep.mubr.bf16.mxu0 %v2024_v8  ;;  %v5203_v52 = vadd.f32 %v3422_v42, %v3421_v56 }
 0x11b   : > { %3909 = vmatmul.mubr.bf16.gmra.mrb[84].mxu1 %v4994_v48 }
 0x11c   : > { %3912 = vmatprep.mubr.bf16.mxu1 %v5000_v37 }
 0x120   : > { %2347 = vmatmul.mubr.bf16.gmra.mrb[120].mxu0 %v4902_v36 }
 0x121   : > { %2354 = vmatprep.mubr.bf16.mxu0 %v2027_v26 }
 0x123   : > { %v3424_v30 = vpop.f32.mrb[16].mxu0  ;;  %3913 = vmatmul.mubr.bf16.gmra.mrb[88].mxu1 %v5006_v43 }
 0x124   : > { %v3425_v40 = vpop.f32.mrb[17].mxu0  ;;  %3916 = vmatprep.mubr.bf16.mxu1 %v5014_v19 }
 0x125   : > { %v5209_v21 = vadd.f32 %v3425_v40, %v3424_v30  ;;  %v3427_v9 = vpop.f32.mrb[18].mxu0 }
 0x126   : > { %v3428_v35 = vpop.f32.mrb[19].mxu0  ;;  %v3536_v48 = vpop.f32.mrb[16].mxu1 }
 0x127   : > { %v5212_v45 = vadd.f32 %v3428_v35, %v3427_v9  ;;  %v3537_v37 = vpop.f32.mrb[17].mxu1 }
 0x128   : > { %2355 = vmatmul.mubr.bf16.gmra.mrb[124].mxu0 %v4913_v10  ;;  %v5215_v36 = vadd.f32 %v3537_v37, %v3536_v48  ;;  %v3539_v59 = vpop.f32.mrb[18].mxu1 }
 0x129   : > { %2362 = vmatprep.mubr.bf16.mxu0 %v2030_v31  ;;  %v3540_v5 = vpop.f32.mrb[19].mxu1 }
 0x12a   : > { %v5217_v43 = vadd.f32 %v3540_v5, %v3539_v59 }
 0x12b   : > { %v3430_v11 = vpop.f32.mrb[20].mxu0  ;;  %3917 = vmatmul.mubr.bf16.gmra.mrb[92].mxu1 %v5157_v53 }
 0x12c   : > { %v3431_v17 = vpop.f32.mrb[21].mxu0  ;;  %3920 = vmatprep.mubr.bf16.mxu1 %v5159_v23 }
 0x12d   : > { %v5220_v3 = vadd.f32 %v3431_v17, %v3430_v11  ;;  %v3433_v19 = vpop.f32.mrb[22].mxu0 }
 0x12e   : > { %v3434_v25 = vpop.f32.mrb[23].mxu0  ;;  %v3542_v27 = vpop.f32.mrb[20].mxu1 }
 0x12f   : > { %v5223_v10 = vadd.f32 %v3434_v25, %v3433_v19  ;;  %v3543_v34 = vpop.f32.mrb[21].mxu1 }
 0x130   : > { %2363 = vmatmul.mubr.bf16.gmra.mrb[128].mxu0 %v4917_v54  ;;  %v5226_v20 = vadd.f32 %v3543_v34, %v3542_v27  ;;  %v3545_v51 = vpop.f32.mrb[22].mxu1 }
 0x131   : > { %2370 = vmatprep.mubr.bf16.mxu0 %v2033_v33  ;;  %v3546_v63 = vpop.f32.mrb[23].mxu1 }
 0x132   : > { %v5228_v53 = vadd.f32 %v3546_v63, %v3545_v51 }
 0x133   : > { %v3436_v41 = vpop.f32.mrb[24].mxu0  ;;  %3921 = vmatmul.mubr.bf16.gmra.mrb[0].mxu1 %v5165_v62 }
 0x134   : > { %v3437_v38 = vpop.f32.mrb[25].mxu0  ;;  %3924 = vmatprep.mubr.bf16.mxu1 %v5169_v46 }
 0x135   : > { %v5231_v32 = vadd.f32 %v3437_v38, %v3436_v41  ;;  %v3439_v23 = vpop.f32.mrb[26].mxu0 }
 0x136   : > { %v3440_v22 = vpop.f32.mrb[27].mxu0  ;;  %v3548_v24 = vpop.f32.mrb[24].mxu1 }
 0x137   : > { %v5234_v54 = vadd.f32 %v3440_v22, %v3439_v23  ;;  %v3549_v29 = vpop.f32.mrb[25].mxu1 }
 0x138   : > { %2371 = vmatmul.mubr.bf16.gmra.mrb[132].mxu0 %v4939_v50  ;;  %v5237_v28 = vadd.f32 %v3549_v29, %v3548_v24  ;;  %v3551_v47 = vpop.f32.mrb[26].mxu1 }
 0x139   : > { %2378 = vmatprep.mubr.bf16.mxu0 %v2036_v12  ;;  %v3552_v6 = vpop.f32.mrb[27].mxu1 }
 0x13a   : > { %v5239_v62 = vadd.f32 %v3552_v6, %v3551_v47 }
 0x13b   : > { %v3442_v7 = vpop.f32.mrb[28].mxu0  ;;  %3925 = vmatmul.mubr.bf16.gmra.mrb[4].mxu1 %v5177_v0  ;;  %v2037_v0 = vld [vmem:[#allocation2 + $0x190] sm:$0xff] }
 0x13c   : > { %v3443_v13 = vpop.f32.mrb[29].mxu0  ;;  %3928 = vmatprep.mubr.bf16.mxu1 %v5179_v14 }
 0x13d   : > { %v5242_v61 = vadd.f32 %v3443_v13, %v3442_v7  ;;  %v3445_v46 = vpop.f32.mrb[30].mxu0 }
 0x13e   : > { %v3446_v49 = vpop.f32.mrb[31].mxu0  ;;  %v3554_v50 = vpop.f32.mrb[28].mxu1 }
 0x13f   : > { %v5245_v8 = vadd.f32 %v3446_v49, %v3445_v46  ;;  %v3555_v55 = vpop.f32.mrb[29].mxu1 }
 0x140   : > { %2379 = vmatmul.mubr.bf16.gmra.mrb[136].mxu0 %v4956_v18  ;;  %v5249_v57 = vadd.f32 %v3555_v55, %v3554_v50  ;;  %v3557_v56 = vpop.f32.mrb[30].mxu1 }
 0x141   : > { %2386 = vmatprep.mubr.bf16.mxu0 %v4759_v60  ;;  %v3558_v42 = vpop.f32.mrb[31].mxu1 }
 0x142   : > { %v5251_v30 = vadd.f32 %v3558_v42, %v3557_v56 }
 0x143   : > { %v3448_v26 = vpop.f32.mrb[32].mxu0  ;;  %3929 = vmatmul.mubr.bf16.gmra.mrb[8].mxu1 %v5189_v2 }
 0x144   : > { %v3449_v40 = vpop.f32.mrb[33].mxu0  ;;  %3932 = vmatprep.mubr.bf16.mxu1 %v2037_v0 }
 0x145   : > { %v3450_v14 = vadd.f32 %v3449_v40, %v3448_v26  ;;  %v3451_v9 = vpop.f32.mrb[34].mxu0 }
 0x146   : > { %v3452_v35 = vpop.f32.mrb[35].mxu0  ;;  %v3560_v18 = vpop.f32.mrb[32].mxu1 }
 0x147   : > { %v3453_v31 = vadd.f32 %v3452_v35, %v3451_v9  ;;  %v3561_v48 = vpop.f32.mrb[33].mxu1 }
 0x148   : > { %2387 = vmatmul.mubr.bf16.gmra.mrb[140].mxu0 %v4759_v60  ;;  %v5255_v37 = vadd.f32 %v3561_v48, %v3560_v18  ;;  %v3563_v59 = vpop.f32.mrb[34].mxu1 }
 0x149   : > { %v3564_v5 = vpop.f32.mrb[35].mxu1 }
 0x14a   : > { %v5257_v17 = vadd.f32 %v3564_v5, %v3563_v59 }
 0x14b   : > { %v3454_v11 = vpop.f32.mrb[36].mxu0  ;;  %3933 = vmatmul.mubr.bf16.gmra.mrb[12].mxu1 %v4759_v60 }
 0x14c   : > { %v3455_v19 = vpop.f32.mrb[37].mxu0 }
 0x14d   : > { %v3456_v2 = vadd.f32 %v3455_v19, %v3454_v11  ;;  %v3457_v25 = vpop.f32.mrb[38].mxu0 }
 0x14e   : > { %v3458_v33 = vpop.f32.mrb[39].mxu0  ;;  %v3566_v34 = vpop.f32.mrb[36].mxu1 }
 0x14f   : > { %v3459_v27 = vadd.f32 %v3458_v33, %v3457_v25  ;;  %v3567_v51 = vpop.f32.mrb[37].mxu1 }
 0x150   : > { %v5260_v63 = vadd.f32 %v3567_v51, %v3566_v34  ;;  %v3569_v41 = vpop.f32.mrb[38].mxu1 }
 0x151   : > { %v3570_v38 = vpop.f32.mrb[39].mxu1 }
 0x152   : > { %v5262_v22 = vadd.f32 %v3570_v38, %v3569_v41 }
 0x153   : > { %v3460_v23 = vpop.f32.mrb[40].mxu0 }
 0x154   : > { %v3461_v12 = vpop.f32.mrb[41].mxu0 }
 0x155   : > { %v3462_v24 = vadd.f32 %v3461_v12, %v3460_v23  ;;  %v3463_v29 = vpop.f32.mrb[42].mxu0 }
 0x156   : > { %v3464_v47 = vpop.f32.mrb[43].mxu0  ;;  %v3572_v60 = vpop.f32.mrb[40].mxu1 }
 0x157   : > { %v5264_v6 = vadd.f32 %v3464_v47, %v3463_v29  ;;  %v3573_v7 = vpop.f32.mrb[41].mxu1 }
 0x158   : > { %v5266_v13 = vadd.f32 %v3573_v7, %v3572_v60  ;;  %v3575_v46 = vpop.f32.mrb[42].mxu1 }
 0x159   : > { %v3576_v49 = vpop.f32.mrb[43].mxu1 }
 0x15a   : > { %v5268_v55 = vadd.f32 %v3576_v49, %v3575_v46 }
 0x15b   : > { %v3466_v50 = vpop.f32.mrb[44].mxu0 }
 0x15c   : > { %v3467_v56 = vpop.f32.mrb[45].mxu0 }
 0x15d   : > { %v5270_v42 = vadd.f32 %v3467_v56, %v3466_v50  ;;  %v3469_v26 = vpop.f32.mrb[46].mxu0 }
 0x15e   : > { %v3470_v0 = vpop.f32.mrb[47].mxu0  ;;  %v3578_v9 = vpop.f32.mrb[44].mxu1 }
 0x15f   : > { %v5272_v40 = vadd.f32 %v3470_v0, %v3469_v26  ;;  %v3579_v35 = vpop.f32.mrb[45].mxu1 }
 0x160   : > { %v5274_v18 = vadd.f32 %v3579_v35, %v3578_v9  ;;  %v3581_v48 = vpop.f32.mrb[46].mxu1 }
 0x161   : > { %v3582_v59 = vpop.f32.mrb[47].mxu1 }
 0x162   : > { %v5276_v11 = vadd.f32 %v3582_v59, %v3581_v48 }
 0x163   : > { %v3472_v5 = vpop.f32.mrb[48].mxu0 }
 0x164   : > { %v3473_v19 = vpop.f32.mrb[49].mxu0 }
 0x165   : > { %v5278_v25 = vadd.f32 %v3473_v19, %v3472_v5  ;;  %v3475_v33 = vpop.f32.mrb[50].mxu0 }
 0x166   : > { %v3476_v34 = vpop.f32.mrb[51].mxu0  ;;  %v3584_v41 = vpop.f32.mrb[48].mxu1 }
 0x167   : > { %v5280_v51 = vadd.f32 %v3476_v34, %v3475_v33  ;;  %v3585_v38 = vpop.f32.mrb[49].mxu1 }
 0x168   : > { %v3586_v23 = vadd.f32 %v3585_v38, %v3584_v41  ;;  %v3587_v12 = vpop.f32.mrb[50].mxu1 }
 0x169   : > { %v3588_v29 = vpop.f32.mrb[51].mxu1 }
 0x16a   : > { %v5282_v60 = vadd.f32 %v3586_v23, %v3450_v14  ;;  %v3589_v7 = vadd.f32 %v3588_v29, %v3587_v12 }
 0x16b   : > { %v3478_v47 = vpop.f32.mrb[52].mxu0 }
 0x16c   : > { %v3479_v46 = vpop.f32.mrb[53].mxu0  ;;  %v5286_v56 = vadd.f32 %v3589_v7, %v3453_v31 }
 0x16d   : > { %v5284_v49 = vadd.f32 %v3479_v46, %v3478_v47  ;;  %v3481_v50 = vpop.f32.mrb[54].mxu0 }
 0x16e   : > { %v3482_v26 = vpop.f32.mrb[55].mxu0  ;;  %v3590_v9 = vpop.f32.mrb[52].mxu1 }
 0x16f   : > { %v5288_v0 = vadd.f32 %v3482_v26, %v3481_v50  ;;  %v3591_v35 = vpop.f32.mrb[53].mxu1 }
 0x170   : > { %v3592_v48 = vadd.f32 %v3591_v35, %v3590_v9  ;;  %v3593_v59 = vpop.f32.mrb[54].mxu1 }
 0x171   : > { %v3594_v5 = vpop.f32.mrb[55].mxu1 }
 0x172   : > { %v5290_v33 = vadd.f32 %v3592_v48, %v3456_v2  ;;  %v3595_v14 = vadd.f32 %v3594_v5, %v3593_v59 }
 0x173   : > { %v3484_v19 = vpop.f32.mrb[56].mxu0 }
 0x174   : > { %v3485_v34 = vpop.f32.mrb[57].mxu0  ;;  %v5294_v23 = vadd.f32 %v3595_v14, %v3459_v27 }
 0x175   : > { %v5292_v41 = vadd.f32 %v3485_v34, %v3484_v19  ;;  %v3487_v38 = vpop.f32.mrb[58].mxu0 }
 0x176   : > { %v3488_v31 = vpop.f32.mrb[59].mxu0  ;;  %v3596_v29 = vpop.f32.mrb[56].mxu1 }
 0x177   : > { %v5296_v12 = vadd.f32 %v3488_v31, %v3487_v38  ;;  %v3597_v47 = vpop.f32.mrb[57].mxu1 }
 0x178   : > { %v3598_v7 = vadd.f32 %v3597_v47, %v3596_v29  ;;  %v3599_v46 = vpop.f32.mrb[58].mxu1 }
 0x179   : > { %v3600_v50 = vpop.f32.mrb[59].mxu1 }
 0x17a   : > { %v5298_v9 = vadd.f32 %v3598_v7, %v3462_v24  ;;  %v3601_v2 = vadd.f32 %v3600_v50, %v3599_v46 }
 0x17b   : > { %v3490_v26 = vpop.f32.mrb[60].mxu0 }
 0x17c   : > { %v3491_v35 = vpop.f32.mrb[61].mxu0  ;;  %v5303_v5 = vadd.f32 %v3601_v2, %v5264_v6 }
 0x17d   : > { %v5300_v48 = vadd.f32 %v3491_v35, %v3490_v26  ;;  %v3493_v59 = vpop.f32.mrb[62].mxu0 }
 0x17e   : > { %v3494_v27 = vpop.f32.mrb[63].mxu0  ;;  %v3602_v14 = vpop.f32.mrb[60].mxu1 }
 0x17f   : > { %v5305_v19 = vadd.f32 %v3494_v27, %v3493_v59  ;;  %v3603_v34 = vpop.f32.mrb[61].mxu1 }
 0x180   : > { %v3604_v38 = vadd.f32 %v3603_v34, %v3602_v14  ;;  %v3605_v31 = vpop.f32.mrb[62].mxu1 }
 0x181   : > { %v3606_v29 = vpop.f32.mrb[63].mxu1 }
 0x182   : > { %v5308_v24 = vadd.f32 %v3604_v38, %v5270_v42  ;;  %v3607_v7 = vadd.f32 %v3606_v29, %v3605_v31 }
 0x183   : > { %v3810_v47 = vpop.f32.mrb[64].mxu0 }
 0x184   : > { %v1408_v46 = vadd.f32 %v3810_v47, %v5181_v39  ;;  %v1399_v50 = vpop.f32.mrb[65].mxu0  ;;  %v5313_v2 = vadd.f32 %v3607_v7, %v5272_v40 }
 0x185   : > { %v1400_v26 = vadd.f32 %v5167_v16, %v1399_v50  ;;  %v3811_v6 = vpop.f32.mrb[66].mxu0 }
 0x186   : > { %v5316_v35 = vadd.f32 %v5226_v20, %v1408_v46  ;;  %v1411_v59 = vadd.f32 %v3811_v6, %v5184_v44  ;;  %v1402_v27 = vpop.f32.mrb[67].mxu0  ;;  %v3608_v34 = vpop.f32.mrb[64].mxu1 }
 0x187   : > { %v5320_v14 = vadd.f32 %v5215_v36, %v1400_v26  ;;  %v1403_v42 = vadd.f32 %v5171_v4, %v1402_v27  ;;  %v3609_v16 = vpop.f32.mrb[65].mxu1 }
 0x188   : > { %v5324_v39 = vadd.f32 %v5228_v53, %v1411_v59  ;;  %v3610_v40 = vadd.f32 %v3609_v16, %v3608_v34  ;;  %v3611_v31 = vpop.f32.mrb[66].mxu1 }
 0x189   : > { %v5327_v38 = vadd.f32 %v5217_v43, %v1403_v42  ;;  %v3612_v20 = vpop.f32.mrb[67].mxu1 }
 0x18a   : > { %v5330_v44 = vadd.f32 %v3610_v40, %v5278_v25  ;;  %v3613_v47 = vadd.f32 %v3612_v20, %v3611_v31 }
 0x18b   : > { %v3814_v29 = vpop.f32.mrb[68].mxu0 }
 0x18c   : > { %v1424_v36 = vadd.f32 %v3814_v29, %v5201_v58  ;;  %v1415_v7 = vpop.f32.mrb[69].mxu0  ;;  %v5335_v53 = vadd.f32 %v3613_v47, %v5280_v51 }
 0x18d   : > { %v1416_v4 = vadd.f32 %v5193_v1, %v1415_v7  ;;  %v3815_v46 = vpop.f32.mrb[70].mxu0 }
 0x18e   : > { %v5338_v43 = vadd.f32 %v5249_v57, %v1424_v36  ;;  %v1427_v50 = vadd.f32 %v3815_v46, %v5203_v52  ;;  %v1418_v26 = vpop.f32.mrb[71].mxu0  ;;  %v3614_v59 = vpop.f32.mrb[68].mxu1 }
 0x18f   : > { %v5342_v6 = vadd.f32 %v5237_v28, %v1416_v4  ;;  %v1419_v25 = vadd.f32 %v5196_v15, %v1418_v26  ;;  %v3615_v1 = vpop.f32.mrb[69].mxu1 }
 0x190   : > { %v5346_v58 = vadd.f32 %v5251_v30, %v1427_v50  ;;  %v3616_v51 = vadd.f32 %v3615_v1, %v3614_v59  ;;  %v3617_v42 = vpop.f32.mrb[70].mxu1 }
 0x191   : > { %v5349_v27 = vadd.f32 %v5239_v62, %v1419_v25  ;;  %v3618_v57 = vpop.f32.mrb[71].mxu1 }
 0x192   : > { %v5352_v52 = vadd.f32 %v3616_v51, %v5284_v49  ;;  %v3619_v16 = vadd.f32 %v3618_v57, %v3617_v42 }
 0x193   : > { %v3818_v34 = vpop.f32.mrb[72].mxu0 }
 0x194   : > { %v1440_v28 = vadd.f32 %v3818_v34, %v5220_v3  ;;  %v1431_v40 = vpop.f32.mrb[73].mxu0  ;;  %v5357_v30 = vadd.f32 %v3619_v16, %v5288_v0 }
 0x195   : > { %v1432_v15 = vadd.f32 %v5209_v21, %v1431_v40  ;;  %v3819_v31 = vpop.f32.mrb[74].mxu0 }
 0x196   : > { %v5360_v62 = vadd.f32 %v5260_v63, %v1440_v28  ;;  %v1443_v20 = vadd.f32 %v3819_v31, %v5223_v10  ;;  %v1434_v29 = vpop.f32.mrb[75].mxu0  ;;  %v3620_v36 = vpop.f32.mrb[72].mxu1 }
 0x197   : > { %v5364_v47 = vadd.f32 %v5255_v37, %v1432_v15  ;;  %v1435_v49 = vadd.f32 %v5212_v45, %v1434_v29  ;;  %v3621_v21 = vpop.f32.mrb[73].mxu1 }
 0x198   : > { %v5368_v3 = vadd.f32 %v5262_v22, %v1443_v20  ;;  %v3622_v0 = vadd.f32 %v3621_v21, %v3620_v36  ;;  %v3623_v4 = vpop.f32.mrb[74].mxu1 }
 0x199   : > { %v5371_v7 = vadd.f32 %v5257_v17, %v1435_v49  ;;  %v3624_v63 = vpop.f32.mrb[75].mxu1 }
 0x19a   : > { %v5374_v10 = vadd.f32 %v3622_v0, %v5292_v41  ;;  %v3625_v50 = vadd.f32 %v3624_v63, %v3623_v4 }
 0x19b   : > { %v3822_v46 = vpop.f32.mrb[76].mxu0 }
 0x19c   : > { %v1456_v37 = vadd.f32 %v3822_v46, %v5242_v61  ;;  %v1447_v26 = vpop.f32.mrb[77].mxu0  ;;  %v5379_v22 = vadd.f32 %v3625_v50, %v5296_v12 }
 0x19d   : > { %v1448_v45 = vadd.f32 %v5231_v32, %v1447_v26  ;;  %v3823_v25 = vpop.f32.mrb[78].mxu0 }
 0x19e   : > { %v5382_v17 = vadd.f32 %v5274_v18, %v1456_v37  ;;  %v1459_v59 = vadd.f32 %v3823_v25, %v5245_v8  ;;  %v1450_v1 = vpop.f32.mrb[79].mxu0  ;;  %v3626_v42 = vpop.f32.mrb[76].mxu1 }
 0x19f   : > { %v5386_v51 = vadd.f32 %v5266_v13, %v1448_v45  ;;  %v1451_v41 = vadd.f32 %v5234_v54, %v1450_v1  ;;  %v3627_v32 = vpop.f32.mrb[77].mxu1 }
 0x1a0   : > { %v5390_v61 = vadd.f32 %v5276_v11, %v1459_v59  ;;  %v3628_v12 = vadd.f32 %v3627_v32, %v3626_v42  ;;  %v3629_v34 = vpop.f32.mrb[78].mxu1 }
 0x1a1   : > { %v1756_v57 = vadd.f32 %v5268_v55, %v1451_v41  ;;  %v3630_v16 = vpop.f32.mrb[79].mxu1 }
 0x1a2   : > { %v5394_v28 = vadd.f32 %v3628_v12, %v5300_v48  ;;  %v3631_v8 = vadd.f32 %v3630_v16, %v3629_v34 }
 0x1a3   : > { %v3672_v18 = vpop.f32.mrb[80].mxu0 }
 0x1a4   : > { %v3673_v40 = vpop.f32.mrb[81].mxu0  ;;  %v5397_v54 = vadd.f32 %v3631_v8, %v5305_v19 }
 0x1a5   : > { %v3674_v13 = vadd.f32 %v3673_v40, %v3672_v18  ;;  %v3675_v15 = vpop.f32.mrb[82].mxu0 }
 0x1a6   : > { %v3676_v31 = vpop.f32.mrb[83].mxu0 }
 0x1a7   : > { %v3677_v11 = vadd.f32 %v3676_v31, %v3675_v15  ;;  %v5400_v20 = vadd.f32 %v3674_v13, %v5320_v14 }
 0x1a9   : > { %v5403_v55 = vadd.f32 %v3677_v11, %v5327_v38 }
 0x1ab   : > { %v3678_v29 = vpop.f32.mrb[84].mxu0 }
 0x1ac   : > { %v3679_v49 = vpop.f32.mrb[85].mxu0 }
 0x1ad   : > { %v3680_v36 = vadd.f32 %v3679_v49, %v3678_v29  ;;  %v3681_v48 = vpop.f32.mrb[86].mxu0 }
 0x1ae   : > { %v3682_v21 = vpop.f32.mrb[87].mxu0 }
 0x1af   : > { %v3683_v0 = vadd.f32 %v3682_v21, %v3681_v48  ;;  %v3954_v4 = vadd.f32 %v3680_v36, %v5316_v35 }
 0x1b1   : > { %v3962_v63 = vadd.f32 %v3683_v0, %v5324_v39 }
 0x1b3   : > { %v3684_v19 = vpop.f32.mrb[88].mxu0 }
 0x1b4   : > { %v3685_v46 = vpop.f32.mrb[89].mxu0 }
 0x1b5   : > { %v3686_v50 = vadd.f32 %v3685_v46, %v3684_v19  ;;  %v3687_v37 = vpop.f32.mrb[90].mxu0 }
 0x1b6   : > { %v3688_v26 = vpop.f32.mrb[91].mxu0 }
 0x1b7   : > { %v3689_v14 = vadd.f32 %v3688_v26, %v3687_v37  ;;  %v5408_v45 = vadd.f32 %v3686_v50, %v5342_v6 }
 0x1b9   : > { %v5411_v38 = vadd.f32 %v3689_v14, %v5349_v27 }
 0x1bb   : > { %v3690_v25 = vpop.f32.mrb[92].mxu0 }
 0x1bc   : > { %v3691_v59 = vpop.f32.mrb[93].mxu0 }
 0x1bd   : > { %v3692_v1 = vadd.f32 %v3691_v59, %v3690_v25  ;;  %v3693_v41 = vpop.f32.mrb[94].mxu0 }
 0x1be   : > { %v3694_v42 = vpop.f32.mrb[95].mxu0 }
 0x1bf   : > { %v3695_v35 = vadd.f32 %v3694_v42, %v3693_v41  ;;  %v5414_v39 = vadd.f32 %v3692_v1, %v5338_v43 }
 0x1c1   : > { %v5417_v32 = vadd.f32 %v3695_v35, %v5346_v58 }
 0x1c3   : > { %v3696_v12 = vpop.f32.mrb[96].mxu0 }
 0x1c4   : > { %v3697_v34 = vpop.f32.mrb[97].mxu0 }
 0x1c5   : > { %v3698_v16 = vadd.f32 %v3697_v34, %v3696_v12  ;;  %v3699_v6 = vpop.f32.mrb[98].mxu0 }
 0x1c6   : > { %v3700_v18 = vpop.f32.mrb[99].mxu0 }
 0x1c7   : > { %v3701_v8 = vadd.f32 %v3700_v18, %v3699_v6  ;;  %v5420_v27 = vadd.f32 %v3698_v16, %v5364_v47 }
 0x1c9   : > { %v5423_v40 = vadd.f32 %v3701_v8, %v5371_v7 }
 0x1cb   : > { %v3702_v13 = vpop.f32.mrb[100].mxu0 }
 0x1cc   : > { %v3703_v15 = vpop.f32.mrb[101].mxu0 }
 0x1cd   : > { %v3704_v31 = vadd.f32 %v3703_v15, %v3702_v13  ;;  %v3705_v43 = vpop.f32.mrb[102].mxu0 }
 0x1ce   : > { %v3706_v11 = vpop.f32.mrb[103].mxu0 }
 0x1cf   : > { %v3707_v29 = vadd.f32 %v3706_v11, %v3705_v43  ;;  %v5426_v58 = vadd.f32 %v3704_v31, %v5360_v62 }
 0x1d1   : > { %v5429_v49 = vadd.f32 %v3707_v29, %v5368_v3 }
 0x1d3   : > { %v3708_v36 = vpop.f32.mrb[104].mxu0 }
 0x1d4   : > { %v3709_v48 = vpop.f32.mrb[105].mxu0 }
 0x1d5   : > { %v3710_v21 = vadd.f32 %v3709_v48, %v3708_v36  ;;  %v3711_v47 = vpop.f32.mrb[106].mxu0 }
 0x1d6   : > { %v3712_v0 = vpop.f32.mrb[107].mxu0 }
 0x1d7   : > { %v3713_v19 = vadd.f32 %v3712_v0, %v3711_v47  ;;  %v5432_v7 = vadd.f32 %v3710_v21, %v5386_v51 }
 0x1d9   : > { %v5434_v46 = vadd.f32 %v3713_v19, %v1756_v57 }
 0x1db   : > { %v3714_v50 = vpop.f32.mrb[108].mxu0 }
 0x1dc   : > { %v3715_v37 = vpop.f32.mrb[109].mxu0 }
 0x1dd   : > { %v3716_v26 = vadd.f32 %v3715_v37, %v3714_v50  ;;  %v3717_v14 = vpop.f32.mrb[110].mxu0 }
 0x1de   : > { %v3718_v62 = vpop.f32.mrb[111].mxu0 }
 0x1df   : > { %v3719_v25 = vadd.f32 %v3718_v62, %v3717_v14  ;;  %v5437_v3 = vadd.f32 %v3716_v26, %v5382_v17 }
 0x1e1   : > { %v5440_v59 = vadd.f32 %v3719_v25, %v5390_v61 }
 0x1e3   : > { %v3720_v1 = vpop.f32.mrb[112].mxu0 }
 0x1e4   : > { %v3721_v41 = vpop.f32.mrb[113].mxu0 }
 0x1e5   : > { %v3722_v42 = vadd.f32 %v3721_v41, %v3720_v1  ;;  %v3723_v51 = vpop.f32.mrb[114].mxu0 }
 0x1e6   : > { %v3724_v35 = vpop.f32.mrb[115].mxu0  ;;  %v3906_v34 = vpop.f32.mrb[80].mxu1 }
 0x1e7   : > { %v3725_v57 = vadd.f32 %v3724_v35, %v3723_v51  ;;  %v5443_v12 = vadd.f32 %v5282_v60, %v3722_v42  ;;  %v3955_v16 = vadd.f32 %v3954_v4, %v3906_v34  ;;  %v2429_v6 = vpop.f32.mrb[81].mxu1 }
 0x1e8   : > { %v3959_v17 = vadd.f32 %v5400_v20, %v2429_v6  ;;  %v3907_v61 = vpop.f32.mrb[82].mxu1 }
 0x1e9   : > { %v5446_v18 = vadd.f32 %v5286_v56, %v3725_v57  ;;  %v3963_v8 = vadd.f32 %v3962_v63, %v3907_v61  ;;  %v2432_v13 = vpop.f32.mrb[83].mxu1  ;;  %v2621_v47 = vmul.f32 %v3955_v16, %v3955_v16 }
 0x1ea   : > { %v3967_v60 = vadd.f32 %v5403_v55, %v2432_v13  ;;  %v2619_v11 = vmul.f32 %v3959_v17, %v3959_v17 }
 0x1eb   : > { %v3726_v15 = vpop.f32.mrb[116].mxu0  ;;  %v3282_v31 = vpack.c.bf16 %v3963_v8, %v3955_v16  ;;  %v2622_v14 = vmul.f32 %v3963_v8, %v3963_v8 }
 0x1ec   : > { %v3727_v4 = vpop.f32.mrb[117].mxu0  ;;  %v2588_v20 = vadd.f32 %v3967_v60, %v3959_v17  ;;  %v2620_v29 = vmul.f32 %v3967_v60, %v3967_v60  ;;  %v3277_v63 = vpack.c.bf16 %v3967_v60, %v3959_v17 }
 0x1ed   : > { %v3728_v56 = vadd.f32 %v3727_v4, %v3726_v15  ;;  %v3729_v43 = vpop.f32.mrb[118].mxu0  ;;  %3369 = vst [vmem:[%s5454_s30 + $0x8] sm:$0xff] %v3282_v31  }
 0x1ee   : > { %v3730_v36 = vpop.f32.mrb[119].mxu0  ;;  %v2589_v0 = vadd.f32 %v3955_v16, %v2588_v20  ;;  %v2651_v19 = vadd.f32 %v2620_v29, %v2619_v11  ;;  %3278 = vst [vmem:[%s5454_s30] sm:$0xff] %v3277_v63   ;;  %v3910_v55 = vpop.f32.mrb[84].mxu1 }
 0x1ef   : > { %v3731_v48 = vadd.f32 %v3730_v36, %v3729_v43  ;;  %v5459_v21 = vadd.f32 %v5290_v33, %v3728_v56  ;;  %v3971_v50 = vadd.f32 %v5414_v39, %v3910_v55  ;;  %v2445_v37 = vpop.f32.mrb[85].mxu1 }
 0x1f0   : > { %v2652_v62 = vadd.f32 %v2651_v19, %v2621_v47  ;;  %v3975_v25 = vadd.f32 %v5408_v45, %v2445_v37  ;;  %v2590_v1 = vadd.f32 %v3963_v8, %v2589_v0  ;;  %v3911_v41 = vpop.f32.mrb[86].mxu1 }
 0x1f1   : > { %v5464_v26 = vadd.f32 %v5294_v23, %v3731_v48  ;;  %v3979_v33 = vadd.f32 %v5417_v32, %v3911_v41  ;;  %v2448_v42 = vpop.f32.mrb[87].mxu1  ;;  %v2625_v4 = vmul.f32 %v3971_v50, %v3971_v50 }
 0x1f2   : > { %v2591_v35 = vadd.f32 %v3975_v25, %v2590_v1  ;;  %v2623_v57 = vmul.f32 %v3975_v25, %v3975_v25  ;;  %v2653_v34 = vadd.f32 %v2652_v62, %v2622_v14  ;;  %v3983_v39 = vadd.f32 %v5411_v38, %v2448_v42 }
 0x1f3   : > { %v3732_v51 = vpop.f32.mrb[120].mxu0  ;;  %v3292_v23 = vpack.c.bf16 %v3979_v33, %v3971_v50  ;;  %v2626_v29 = vmul.f32 %v3979_v33, %v3979_v33 }
 0x1f4   : > { %v3733_v16 = vpop.f32.mrb[121].mxu0  ;;  %v2654_v61 = vadd.f32 %v2653_v34, %v2623_v57  ;;  %v2592_v13 = vadd.f32 %v3983_v39, %v2591_v35  ;;  %v2624_v45 = vmul.f32 %v3983_v39, %v3983_v39  ;;  %v3287_v8 = vpack.c.bf16 %v3983_v39, %v3975_v25 }
 0x1f5   : > { %v3734_v6 = vadd.f32 %v3733_v16, %v3732_v51  ;;  %v3735_v17 = vpop.f32.mrb[122].mxu0  ;;  %3371 = vst [vmem:[%s5454_s30 + $0x18] sm:$0xff] %v3292_v23  }
 0x1f6   : > { %v3736_v15 = vpop.f32.mrb[123].mxu0  ;;  %v2593_v31 = vadd.f32 %v3971_v50, %v2592_v13  ;;  %v2655_v56 = vadd.f32 %v2654_v61, %v2624_v45  ;;  %3370 = vst [vmem:[%s5454_s30 + $0x10] sm:$0xff] %v3287_v8   ;;  %v3914_v38 = vpop.f32.mrb[88].mxu1 }
 0x1f7   : > { %v3737_v32 = vadd.f32 %v3736_v15, %v3735_v17  ;;  %v5471_v60 = vadd.f32 %v5298_v9, %v3734_v6  ;;  %v3987_v43 = vadd.f32 %v5426_v58, %v3914_v38  ;;  %v2461_v11 = vpop.f32.mrb[89].mxu1 }
 0x1f8   : > { %v2656_v63 = vadd.f32 %v2655_v56, %v2625_v4  ;;  %v3991_v36 = vadd.f32 %v5420_v27, %v2461_v11  ;;  %v2594_v48 = vadd.f32 %v3979_v33, %v2593_v31  ;;  %v3915_v47 = vpop.f32.mrb[90].mxu1 }
 0x1f9   : > { %v5476_v20 = vadd.f32 %v5303_v5, %v3737_v32  ;;  %v3995_v9 = vadd.f32 %v5429_v49, %v3915_v47  ;;  %v2464_v0 = vpop.f32.mrb[91].mxu1  ;;  %v2629_v35 = vmul.f32 %v3987_v43, %v3987_v43 }
 0x1fa   : > { %v2595_v55 = vadd.f32 %v3991_v36, %v2594_v48  ;;  %v2627_v50 = vmul.f32 %v3991_v36, %v3991_v36  ;;  %v2657_v37 = vadd.f32 %v2656_v63, %v2626_v29  ;;  %v3999_v58 = vadd.f32 %v5423_v40, %v2464_v0 }
 0x1fb   : > { %v3738_v19 = vpop.f32.mrb[124].mxu0  ;;  %v3302_v5 = vpack.c.bf16 %v3995_v9, %v3987_v43  ;;  %v2630_v6 = vmul.f32 %v3995_v9, %v3995_v9 }
 0x1fc   : > { %v3739_v14 = vpop.f32.mrb[125].mxu0  ;;  %v2658_v1 = vadd.f32 %v2657_v37, %v2627_v50  ;;  %v2596_v41 = vadd.f32 %v3999_v58, %v2595_v55  ;;  %v2628_v27 = vmul.f32 %v3999_v58, %v3999_v58  ;;  %v3297_v33 = vpack.c.bf16 %v3999_v58, %v3991_v36 }
 0x1fd   : > { %v3740_v62 = vadd.f32 %v3739_v14, %v3738_v19  ;;  %v3741_v25 = vpop.f32.mrb[126].mxu0  ;;  %3373 = vst [vmem:[%s5454_s30 + $0x28] sm:$0xff] %v3302_v5  }
 0x1fe   : > { %v3742_v42 = vpop.f32.mrb[127].mxu0  ;;  %v2597_v57 = vadd.f32 %v3987_v43, %v2596_v41  ;;  %v2659_v34 = vadd.f32 %v2658_v1, %v2628_v27  ;;  %3372 = vst [vmem:[%s5454_s30 + $0x20] sm:$0xff] %v3297_v33   ;;  %v3918_v40 = vpop.f32.mrb[92].mxu1 }
 0x1ff   : > { %v3743_v49 = vadd.f32 %v3742_v42, %v3741_v25  ;;  %v5483_v51 = vadd.f32 %v5308_v24, %v3740_v62  ;;  %v4003_v39 = vadd.f32 %v5437_v3, %v3918_v40  ;;  %v2477_v16 = vpop.f32.mrb[93].mxu1 }
 0x200   : > { %v2660_v17 = vadd.f32 %v2659_v34, %v2629_v35  ;;  %v4007_v61 = vadd.f32 %v5432_v7, %v2477_v16  ;;  %v2598_v13 = vadd.f32 %v3995_v9, %v2597_v57  ;;  %v3919_v45 = vpop.f32.mrb[94].mxu1 }
 0x201   : > { %v5488_v23 = vadd.f32 %v5313_v2, %v3743_v49  ;;  %v4011_v24 = vadd.f32 %v5440_v59, %v3919_v45  ;;  %v2480_v8 = vpop.f32.mrb[95].mxu1  ;;  %v2633_v47 = vmul.f32 %v4003_v39, %v4003_v39 }
 0x202   : > { %v2599_v32 = vadd.f32 %v4007_v61, %v2598_v13  ;;  %v2631_v4 = vmul.f32 %v4007_v61, %v4007_v61  ;;  %v2661_v31 = vadd.f32 %v2660_v17, %v2630_v6  ;;  %v4015_v3 = vadd.f32 %v5434_v46, %v2480_v8 }
 0x203   : > { %v3744_v15 = vpop.f32.mrb[128].mxu0  ;;  %v3312_v2 = vpack.c.bf16 %v4011_v24, %v4003_v39  ;;  %v2634_v37 = vmul.f32 %v4011_v24, %v4011_v24 }
 0x204   : > { %v3745_v56 = vpop.f32.mrb[129].mxu0  ;;  %v2662_v11 = vadd.f32 %v2661_v31, %v2631_v4  ;;  %v2600_v29 = vadd.f32 %v4015_v3, %v2599_v32  ;;  %v2632_v7 = vmul.f32 %v4015_v3, %v4015_v3  ;;  %v3307_v63 = vpack.c.bf16 %v4015_v3, %v4007_v61 }
 0x205   : > { %v3746_v38 = vadd.f32 %v3745_v56, %v3744_v15  ;;  %v3747_v43 = vpop.f32.mrb[130].mxu0  ;;  %3375 = vst [vmem:[%s5454_s30 + $0x38] sm:$0xff] %v3312_v2  }
 0x206   : > { %v3748_v36 = vpop.f32.mrb[131].mxu0  ;;  %v2601_v9 = vadd.f32 %v4003_v39, %v2600_v29  ;;  %v2663_v0 = vadd.f32 %v2662_v11, %v2632_v7  ;;  %3374 = vst [vmem:[%s5454_s30 + $0x30] sm:$0xff] %v3307_v63   ;;  %v3922_v46 = vpop.f32.mrb[0].mxu1 }
 0x207   : > { %v3749_v59 = vadd.f32 %v3748_v36, %v3747_v43  ;;  %v5495_v48 = vadd.f32 %v5330_v44, %v3746_v38  ;;  %v4018_v19 = vadd.f32 %v5459_v21, %v3922_v46  ;;  %v2493_v55 = vpop.f32.mrb[1].mxu1 }
 0x208   : > { %v2664_v58 = vadd.f32 %v2663_v0, %v2633_v47  ;;  %v4021_v14 = vadd.f32 %v5443_v12, %v2493_v55  ;;  %v2602_v5 = vadd.f32 %v4011_v24, %v2601_v9  ;;  %v3923_v62 = vpop.f32.mrb[2].mxu1 }
 0x209   : > { %v5500_v50 = vadd.f32 %v5335_v53, %v3749_v59  ;;  %v4024_v44 = vadd.f32 %v5464_v26, %v3923_v62  ;;  %v2496_v25 = vpop.f32.mrb[3].mxu1  ;;  %v2637_v6 = vmul.f32 %v4018_v19, %v4018_v19 }
 0x20a   : > { %v2603_v41 = vadd.f32 %v4021_v14, %v2602_v5  ;;  %v2635_v27 = vmul.f32 %v4021_v14, %v4021_v14  ;;  %v2665_v33 = vadd.f32 %v2664_v58, %v2634_v37  ;;  %v4027_v21 = vadd.f32 %v5446_v18, %v2496_v25 }
 0x20b   : > { %v3750_v1 = vpop.f32.mrb[132].mxu0  ;;  %v3322_v53 = vpack.c.bf16 %v4024_v44, %v4018_v19  ;;  %v2638_v8 = vmul.f32 %v4024_v44, %v4024_v44 }
 0x20c   : > { %v3751_v42 = vpop.f32.mrb[133].mxu0  ;;  %v2666_v57 = vadd.f32 %v2665_v33, %v2635_v27  ;;  %v2604_v34 = vadd.f32 %v4027_v21, %v2603_v41  ;;  %v2636_v12 = vmul.f32 %v4027_v21, %v4027_v21  ;;  %v3317_v40 = vpack.c.bf16 %v4027_v21, %v4021_v14 }
 0x20d   : > { %v3752_v49 = vadd.f32 %v3751_v42, %v3750_v1  ;;  %v3753_v35 = vpop.f32.mrb[134].mxu0  ;;  %3377 = vst [vmem:[%s5454_s30 + $0x48] sm:$0xff] %v3322_v53  }
 0x20e   : > { %v3754_v39 = vpop.f32.mrb[135].mxu0  ;;  %v2605_v17 = vadd.f32 %v4018_v19, %v2604_v34  ;;  %v2667_v61 = vadd.f32 %v2666_v57, %v2636_v12  ;;  %3376 = vst [vmem:[%s5454_s30 + $0x40] sm:$0xff] %v3317_v40   ;;  %v3926_v13 = vpop.f32.mrb[4].mxu1 }
 0x20f   : > { %v3755_v26 = vadd.f32 %v3754_v39, %v3753_v35  ;;  %v4041_v16 = vadd.f32 %v5352_v52, %v3752_v49  ;;  %v4030_v18 = vadd.f32 %v5483_v51, %v3926_v13  ;;  %v2509_v45 = vpop.f32.mrb[5].mxu1 }
 0x210   : > { %v2668_v15 = vadd.f32 %v2667_v61, %v2637_v6  ;;  %v4033_v32 = vadd.f32 %v5471_v60, %v2509_v45  ;;  %v2606_v4 = vadd.f32 %v4024_v44, %v2605_v17  ;;  %v3927_v31 = vpop.f32.mrb[6].mxu1 }
 0x211   : > { %v4047_v24 = vadd.f32 %v5357_v30, %v3755_v26  ;;  %v4036_v3 = vadd.f32 %v5488_v23, %v3927_v31  ;;  %v2512_v52 = vpop.f32.mrb[7].mxu1  ;;  %v2641_v0 = vmul.f32 %v4030_v18, %v4030_v18 }
 0x212   : > { %v2607_v2 = vadd.f32 %v4033_v32, %v2606_v4  ;;  %v2639_v38 = vmul.f32 %v4033_v32, %v4033_v32  ;;  %v2669_v43 = vadd.f32 %v2668_v15, %v2638_v8  ;;  %v4039_v11 = vadd.f32 %v5476_v20, %v2512_v52 }
 0x213   : > { %v3756_v56 = vpop.f32.mrb[136].mxu0  ;;  %v3332_v29 = vpack.c.bf16 %v4036_v3, %v4030_v18  ;;  %v2642_v14 = vmul.f32 %v4036_v3, %v4036_v3 }
 0x214   : > { %v3757_v51 = vpop.f32.mrb[137].mxu0  ;;  %v2670_v63 = vadd.f32 %v2669_v43, %v2639_v38  ;;  %v2608_v36 = vadd.f32 %v4039_v11, %v2607_v2  ;;  %v2640_v60 = vmul.f32 %v4039_v11, %v4039_v11  ;;  %v3327_v59 = vpack.c.bf16 %v4039_v11, %v4033_v32 }
 0x215   : > { %v3758_v30 = vadd.f32 %v3757_v51, %v3756_v56  ;;  %v3759_v7 = vpop.f32.mrb[138].mxu0  ;;  %3379 = vst [vmem:[%s5454_s30 + $0x58] sm:$0xff] %v3332_v29  }
 0x216   : > { %v3760_v47 = vpop.f32.mrb[139].mxu0  ;;  %v2609_v46 = vadd.f32 %v4030_v18, %v2608_v36  ;;  %v2671_v19 = vadd.f32 %v2670_v63, %v2640_v60  ;;  %3378 = vst [vmem:[%s5454_s30 + $0x50] sm:$0xff] %v3327_v59   ;;  %v3930_v55 = vpop.f32.mrb[8].mxu1 }
 0x217   : > { %v3761_v23 = vadd.f32 %v3760_v47, %v3759_v7  ;;  %v4056_v9 = vadd.f32 %v5374_v10, %v3758_v30  ;;  %v4042_v20 = vadd.f32 %v4041_v16, %v3930_v55  ;;  %v2525_v37 = vpop.f32.mrb[9].mxu1 }
 0x218   : > { %v2672_v5 = vadd.f32 %v2671_v19, %v2641_v0  ;;  %v4045_v62 = vadd.f32 %v5495_v48, %v2525_v37  ;;  %v2610_v44 = vadd.f32 %v4036_v3, %v2609_v46  ;;  %v3931_v25 = vpop.f32.mrb[10].mxu1 }
 0x219   : > { %v4062_v58 = vadd.f32 %v5379_v22, %v3761_v23  ;;  %v4048_v1 = vadd.f32 %v4047_v24, %v3931_v25  ;;  %v2528_v41 = vpop.f32.mrb[11].mxu1  ;;  %v2645_v16 = vmul.f32 %v4042_v20, %v4042_v20 }
 0x21a   : > { %v2611_v10 = vadd.f32 %v4045_v62, %v2610_v44  ;;  %v2643_v33 = vmul.f32 %v4045_v62, %v4045_v62  ;;  %v2673_v21 = vadd.f32 %v2672_v5, %v2642_v14  ;;  %v4051_v42 = vadd.f32 %v5500_v50, %v2528_v41 }
 0x21b   : > { %v3762_v27 = vpop.f32.mrb[140].mxu0  ;;  %v3342_v49 = vpack.c.bf16 %v4048_v1, %v4042_v20  ;;  %v2646_v45 = vmul.f32 %v4048_v1, %v4048_v1 }
 0x21c   : > { %v3763_v53 = vpop.f32.mrb[141].mxu0  ;;  %v2674_v57 = vadd.f32 %v2673_v21, %v2643_v33  ;;  %v2612_v34 = vadd.f32 %v4051_v42, %v2611_v10  ;;  %v2644_v12 = vmul.f32 %v4051_v42, %v4051_v42  ;;  %v3337_v48 = vpack.c.bf16 %v4051_v42, %v4045_v62 }
 0x21d   : > { %v3764_v35 = vadd.f32 %v3763_v53, %v3762_v27  ;;  %v3765_v22 = vpop.f32.mrb[142].mxu0  ;;  %3381 = vst [vmem:[%s5454_s30 + $0x68] sm:$0xff] %v3342_v49  }
 0x21e   : > { %v3766_v40 = vpop.f32.mrb[143].mxu0  ;;  %v2613_v6 = vadd.f32 %v4042_v20, %v2612_v34  ;;  %v2675_v17 = vadd.f32 %v2674_v57, %v2644_v12  ;;  %3380 = vst [vmem:[%s5454_s30 + $0x60] sm:$0xff] %v3337_v48   ;;  %v3934_v61 = vpop.f32.mrb[12].mxu1 }
 0x21f   : > { %v4053_v39 = vadd.f32 %v5394_v28, %v3764_v35  ;;  %v3767_v26 = vadd.f32 %v3766_v40, %v3765_v22  ;;  %v2541_v13 = vpop.f32.mrb[13].mxu1 }
 0x220   : > { %v2676_v24 = vadd.f32 %v2675_v17, %v2645_v16  ;;  %v4057_v8 = vadd.f32 %v4056_v9, %v2541_v13  ;;  %v2614_v15 = vadd.f32 %v4048_v1, %v2613_v6  ;;  %v3935_v32 = vpop.f32.mrb[14].mxu1 }
 0x221   : > { %v4054_v50 = vadd.f32 %v4053_v39, %v3934_v61  ;;  %v4059_v18 = vadd.f32 %v5397_v54, %v3767_v26  ;;  %v2544_v31 = vpop.f32.mrb[15].mxu1 }
 0x222   : > { %v2615_v28 = vadd.f32 %v4057_v8, %v2614_v15  ;;  %v2647_v3 = vmul.f32 %v4057_v8, %v4057_v8  ;;  %v2677_v52 = vadd.f32 %v2676_v24, %v2646_v45  ;;  %v4063_v56 = vadd.f32 %v4062_v58, %v2544_v31 }
 0x223   : > { %v4060_v4 = vadd.f32 %v4059_v18, %v3935_v32  ;;  %v2649_v2 = vmul.f32 %v4054_v50, %v4054_v50 }
 0x224   : > { %v2678_v43 = vadd.f32 %v2677_v52, %v2647_v3  ;;  %v2616_v11 = vadd.f32 %v4063_v56, %v2615_v28  ;;  %v2648_v51 = vmul.f32 %v4063_v56, %v4063_v56  ;;  %v3347_v54 = vpack.c.bf16 %v4063_v56, %v4057_v8 }
 0x225   : > { %v3352_v38 = vpack.c.bf16 %v4060_v4, %v4054_v50  ;;  %v2650_v29 = vmul.f32 %v4060_v4, %v4060_v4 }
 0x226   : > { %v2617_v30 = vadd.f32 %v4054_v50, %v2616_v11  ;;  %v2679_v7 = vadd.f32 %v2678_v43, %v2648_v51  ;;  %3382 = vst [vmem:[%s5454_s30 + $0x70] sm:$0xff] %v3347_v54  }
 0x227   : > { %3383 = vst [vmem:[%s5454_s30 + $0x78] sm:$0xff] %v3352_v38  }
 0x228   : > { %v2618_v63 = vadd.f32 %v4060_v4, %v2617_v30  ;;  %v2680_v36 = vadd.f32 %v2679_v7, %v2649_v2 }
 0x22a   : > { %v2681_v60 = vadd.f32 %v2680_v36, %v2650_v29  ;;  %2682 = vst [vmem:[%s268_s8] sm:$0xff] %v2618_v63 }
 0x22c   : > { %2683 = vst [vmem:[%s272_s12] sm:$0xff] %v2681_v60 }
 0x22d PF: > { %s17_s21 = sadd.s32 1, %s4203_s21  }
 0x22e   : > { %p14_p4 = scmp.ge.s32.totalorder %s17_s21, 4  }
 0x230   :  { %16 = sbr.rel (!%p14_p4) target bundleno = 1 (0x1), region = 95 }

</bundles_post_ra>
